<compile_context>
chip_gen: v6e
topology: v6e:2x2x1
jax: 0.10.0
libtpu: 0.0.40
codegen_flags: <defaults>
</compile_context>

<pallas_src>
import jax
import jax.numpy as jnp
from jax import lax
from jax.experimental import pallas as pl
from jax.experimental.pallas import tpu as pltpu  # noqa: F401  (TPU backend assumed)

# ---- model dims (small, consistent with the module defaults) ----------------
VOCAB = 50
EMBED = 16      # embed_dim
NHID = 32       # nhidden (encoder hidden / classifier input dim)
NLABEL = 2      # nlabel
B, S = 2, 8     # batch, sequence length
NSTEPS = 8      # fixed RK4 steps over t in [0, 1]

HP = 128        # hidden dim zero-padded to lane width
LP = 128        # label dim zero-padded to lane width


def _elu(z):
    # ELU(alpha=1), computed in f32 (keeps exp on the EUP with no bf16 converts).
    return jnp.where(z > 0, z, jnp.exp(z) - 1.0)


def lr_classifier_kernel(e_ref, wp_ref, bp_ref, w1_ref, b1_ref, w2_ref, b2_ref,
                         wd_ref, bd_ref, avg_ref, out_ref):
    n = e_ref.shape[0]          # B*S
    hp = w1_ref.shape[0]        # padded hidden (128)

    # ---- encoder projection: (N, E) @ (E, HP) + (1, HP) --------------------
    h0 = jnp.dot(e_ref[...], wp_ref[...],
                 preferred_element_type=jnp.float32) + bp_ref[...]

    w1 = w1_ref[...]
    w2 = w2_ref[...]
    b2 = b2_ref[...]

    # ---- one-time chain matrices (f32 accumulate) ---------------------------
    w21 = jnp.dot(w2, w1, preferred_element_type=jnp.float32)    # (HP, HP)
    b2w1 = jnp.dot(b2, w1, preferred_element_type=jnp.float32)   # (1, HP)

    # bf16 operands for the serial MXU chain (accumulation stays f32).
    w1_b = w1.astype(jnp.bfloat16)
    w2_b = w2.astype(jnp.bfloat16)
    w21_b = w21.astype(jnp.bfloat16)

    dt = jnp.float32(1.0 / NSTEPS)
    half_dt = jnp.float32(0.5 / NSTEPS)
    dt_6 = jnp.float32(1.0 / (6.0 * NSTEPS))

    # ---- hoisted broadcasts (traced once, reused by every unrolled step) ----
    b1_full = jnp.broadcast_to(b1_ref[...], (n, hp))
    b2w1_full = jnp.broadcast_to(b2w1, (n, hp))
    dt_b2_full = dt * jnp.broadcast_to(b2, (n, hp))

    def mm(x_f32, w_bf16):
        return jnp.dot(x_f32.astype(jnp.bfloat16), w_bf16,
                       preferred_element_type=jnp.float32)

    # RK4 with f(y) = ELU(y@w1 + b1) @ w2 + b2, algebraically refactored to
    # 5 matmuls per step:
    #   p1 = y@w1 + b1 ;  p_{i+1} = p1 + a_{i+1}*dt*(ELU(p_i)@W21 + b2@w1)
    #   y' = y + dt/6 * (ELU(p1)+2ELU(p2)+2ELU(p3)+ELU(p4)) @ w2 + dt*b2
    def rk4_step(_, y):
        p1 = mm(y, w1_b) + b1_full
        e1 = _elu(p1)
        p2 = p1 + half_dt * (mm(e1, w21_b) + b2w1_full)
        e2 = _elu(p2)
        p3 = p1 + half_dt * (mm(e2, w21_b) + b2w1_full)
        e3 = _elu(p3)
        p4 = p1 + dt * (mm(e3, w21_b) + b2w1_full)
        e4 = _elu(p4)
        s = e1 + 2.0 * e2 + 2.0 * e3 + e4
        return y + dt_6 * mm(s, w2_b) + dt_b2_full

    y1 = lax.fori_loop(0, NSTEPS, rk4_step, h0, unroll=True)     # (N, HP) f32

    # ---- decoder + mean over sequence + softmax -----------------------------
    # mean over the sequence folded into a (B, N) @ (N, HP) matmul.
    xmean = jnp.dot(avg_ref[...], y1, preferred_element_type=jnp.float32)   # (B, HP)
    logits = jnp.dot(xmean, wd_ref[...],
                     preferred_element_type=jnp.float32) + bd_ref[...]      # (B, LP)

    # mask padded label lanes, then a numerically stable softmax
    col = lax.broadcasted_iota(jnp.int32, logits.shape, 1)
    logits = jnp.where(col < NLABEL, logits, -jnp.inf)
    m = jnp.max(logits, axis=-1, keepdims=True)
    p = jnp.exp(logits - m)
    out_ref[...] = (p / jnp.sum(p, axis=-1, keepdims=True)).astype(out_ref.dtype)


def lr_classifier_forward(tokens, params):
    """tokens: (B, S) int32 -> softmax scores (B, NLABEL) float32."""
    b, s = tokens.shape
    n = b * s

    # Embedding lookup (gather) kept as plain-JAX glue.
    e = params["embed"][tokens.reshape(-1)]                        # (N, EMBED)

    # Constant sequence-averaging matrix: (B, N), rows sum to 1.
    avg = jnp.kron(jnp.eye(b, dtype=jnp.float32),
                   jnp.full((1, s), 1.0 / s, dtype=jnp.float32))   # (B, N)

    out = pl.pallas_call(
        lr_classifier_kernel,
        out_shape=jax.ShapeDtypeStruct((b, LP), jnp.float32),
        in_specs=[
            pl.BlockSpec((n, EMBED), lambda: (0, 0)),      # e
            pl.BlockSpec((EMBED, HP), lambda: (0, 0)),     # wp
            pl.BlockSpec((1, HP), lambda: (0, 0)),         # bp
            pl.BlockSpec((HP, HP), lambda: (0, 0)),        # w1
            pl.BlockSpec((1, HP), lambda: (0, 0)),         # b1
            pl.BlockSpec((HP, HP), lambda: (0, 0)),        # w2
            pl.BlockSpec((1, HP), lambda: (0, 0)),         # b2
            pl.BlockSpec((HP, LP), lambda: (0, 0)),        # wd
            pl.BlockSpec((1, LP), lambda: (0, 0)),         # bd
            pl.BlockSpec((b, n), lambda: (0, 0)),          # avg
        ],
        out_specs=pl.BlockSpec((b, LP), lambda: (0, 0)),
    )(e, params["wp"], params["bp"], params["w1"], params["b1"],
      params["w2"], params["b2"], params["wd"], params["bd"], avg)

    return out[:, :NLABEL]


def _pad2(x, rows, cols):
    return jnp.pad(x, ((0, rows - x.shape[0]), (0, cols - x.shape[1])))


def init_params(key):
    ks = jax.random.split(key, 9)
    sp = EMBED ** -0.5
    sh = NHID ** -0.5

    def u(k, shape, s):
        return jax.random.uniform(k, shape, jnp.float32, -s, s)

    # Weights stored as (in_features, out_features); zero-padded to lane-dense
    # shapes once at init (layout plumbing, not per-call work).
    return {
        "embed": jax.random.normal(ks[0], (VOCAB, EMBED), jnp.float32),
        "wp": _pad2(u(ks[1], (EMBED, NHID), sp), EMBED, HP),
        "bp": _pad2(u(ks[2], (1, NHID), sp), 1, HP),
        "w1": _pad2(u(ks[3], (NHID, NHID), sh), HP, HP),
        "b1": _pad2(u(ks[4], (1, NHID), sh), 1, HP),
        "w2": _pad2(u(ks[5], (NHID, NHID), sh), HP, HP),
        "b2": _pad2(u(ks[6], (1, NHID), sh), 1, HP),
        "wd": _pad2(u(ks[7], (NHID, NLABEL), sh), HP, LP),
        "bd": _pad2(u(ks[8], (1, NLABEL), sh), 1, LP),
    }


if __name__ == "__main__":
    key = jax.random.PRNGKey(0)
    k_tok, k_par = jax.random.split(key)
    tokens = jax.random.randint(k_tok, (B, S), 0, VOCAB, dtype=jnp.int32)
    params = init_params(k_par)

    score = lr_classifier_forward(tokens, params)
    score = jax.block_until_ready(score)

    assert score.shape == (B, NLABEL), score.shape
    assert score.dtype == jnp.float32
    assert bool(jnp.all(jnp.isfinite(score)))
    assert bool(jnp.allclose(jnp.sum(score, axis=-1), 1.0, atol=1e-4))
    print("KERNEL_OK")
</pallas_src>

<mosaic_0001>
module attributes {stable_mosaic.version = 11 : i64} {
  func.func @lr_classifier_kernel(%arg0: memref<16x16xf32, #tpu.memory_space<vmem>>, %arg1: memref<16x128xf32, #tpu.memory_space<vmem>>, %arg2: memref<1x128xf32, #tpu.memory_space<vmem>>, %arg3: memref<128x128xf32, #tpu.memory_space<vmem>>, %arg4: memref<1x128xf32, #tpu.memory_space<vmem>>, %arg5: memref<128x128xf32, #tpu.memory_space<vmem>>, %arg6: memref<1x128xf32, #tpu.memory_space<vmem>>, %arg7: memref<128x128xf32, #tpu.memory_space<vmem>>, %arg8: memref<1x128xf32, #tpu.memory_space<vmem>>, %arg9: memref<2x16xf32, #tpu.memory_space<vmem>>, %arg10: memref<2x128xf32, #tpu.memory_space<vmem>>) attributes {dimension_semantics = [], scalar_prefetch = 0 : i64, scratch_operands = 0 : i64, tpu.core_type = #tpu.core_type<tc>} {
    %c0 = arith.constant 0 : index
    %c0_0 = arith.constant 0 : index
    %0 = vector.load %arg0[%c0, %c0_0] : memref<16x16xf32, #tpu.memory_space<vmem>>, vector<16x16xf32>
    %c0_1 = arith.constant 0 : index
    %c0_2 = arith.constant 0 : index
    %1 = vector.load %arg1[%c0_1, %c0_2] : memref<16x128xf32, #tpu.memory_space<vmem>>, vector<16x128xf32>
    %cst = arith.constant dense<0.000000e+00> : vector<16x128xf32>
    %2 = tpu.matmul %0, %1, %cst {dimension_numbers = #tpu.dot_dimension_numbers<[1], [0], [0], [1], [0, 0, 1, 1], [], []>} : vector<16x16xf32>, vector<16x128xf32>, vector<16x128xf32> -> vector<16x128xf32>
    %c0_3 = arith.constant 0 : index
    %c0_4 = arith.constant 0 : index
    %3 = vector.load %arg2[%c0_3, %c0_4] : memref<1x128xf32, #tpu.memory_space<vmem>>, vector<1x128xf32>
    %4 = vector.broadcast %3 : vector<1x128xf32> to vector<16x128xf32>
    %5 = arith.addf %2, %4 : vector<16x128xf32>
    %c0_5 = arith.constant 0 : index
    %c0_6 = arith.constant 0 : index
    %6 = vector.load %arg3[%c0_5, %c0_6] : memref<128x128xf32, #tpu.memory_space<vmem>>, vector<128x128xf32>
    %c0_7 = arith.constant 0 : index
    %c0_8 = arith.constant 0 : index
    %7 = vector.load %arg5[%c0_7, %c0_8] : memref<128x128xf32, #tpu.memory_space<vmem>>, vector<128x128xf32>
    %c0_9 = arith.constant 0 : index
    %c0_10 = arith.constant 0 : index
    %8 = vector.load %arg6[%c0_9, %c0_10] : memref<1x128xf32, #tpu.memory_space<vmem>>, vector<1x128xf32>
    %cst_11 = arith.constant dense<0.000000e+00> : vector<128x128xf32>
    %9 = tpu.matmul %7, %6, %cst_11 {dimension_numbers = #tpu.dot_dimension_numbers<[1], [0], [0], [1], [0, 0, 1, 1], [], []>} : vector<128x128xf32>, vector<128x128xf32>, vector<128x128xf32> -> vector<128x128xf32>
    %cst_12 = arith.constant dense<0.000000e+00> : vector<1x128xf32>
    %10 = tpu.matmul %8, %6, %cst_12 {dimension_numbers = #tpu.dot_dimension_numbers<[1], [0], [0], [1], [0, 0, 1, 1], [], []>} : vector<1x128xf32>, vector<128x128xf32>, vector<1x128xf32> -> vector<1x128xf32>
    %11 = arith.truncf %6 : vector<128x128xf32> to vector<128x128xbf16>
    %12 = arith.truncf %7 : vector<128x128xf32> to vector<128x128xbf16>
    %13 = arith.truncf %9 : vector<128x128xf32> to vector<128x128xbf16>
    %c0_13 = arith.constant 0 : index
    %c0_14 = arith.constant 0 : index
    %14 = vector.load %arg4[%c0_13, %c0_14] : memref<1x128xf32, #tpu.memory_space<vmem>>, vector<1x128xf32>
    %15 = vector.shape_cast %14 : vector<1x128xf32> to vector<1x128xf32>
    %16 = vector.broadcast %15 : vector<1x128xf32> to vector<16x128xf32>
    %17 = vector.shape_cast %10 : vector<1x128xf32> to vector<1x128xf32>
    %18 = vector.broadcast %17 : vector<1x128xf32> to vector<16x128xf32>
    %19 = vector.shape_cast %8 : vector<1x128xf32> to vector<1x128xf32>
    %20 = vector.broadcast %19 : vector<1x128xf32> to vector<16x128xf32>
    %cst_15 = arith.constant 1.250000e-01 : f32
    %21 = vector.broadcast %cst_15 : f32 to vector<16x128xf32>
    %22 = arith.mulf %21, %20 : vector<16x128xf32>
    %cst_16 = arith.constant 6.250000e-02 : f32
    %cst_17 = arith.constant 1.250000e-01 : f32
    %cst_18 = arith.constant 0.020833334 : f32
    %c0_i32 = arith.constant 0 : i32
    %23 = arith.truncf %5 : vector<16x128xf32> to vector<16x128xbf16>
    %cst_19 = arith.constant dense<0.000000e+00> : vector<16x128xf32>
    %24 = tpu.matmul %23, %11, %cst_19 {dimension_numbers = #tpu.dot_dimension_numbers<[1], [0], [0], [1], [0, 0, 1, 1], [], []>} : vector<16x128xbf16>, vector<128x128xbf16>, vector<16x128xf32> -> vector<16x128xf32>
    %25 = arith.addf %24, %16 : vector<16x128xf32>
    %cst_20 = arith.constant 0.000000e+00 : f32
    %26 = vector.broadcast %cst_20 : f32 to vector<16x128xf32>
    %27 = arith.cmpf ogt, %25, %26 : vector<16x128xf32>
    %28 = math.exp %25 : vector<16x128xf32>
    %cst_21 = arith.constant 1.000000e+00 : f32
    %29 = vector.broadcast %cst_21 : f32 to vector<16x128xf32>
    %30 = arith.subf %28, %29 : vector<16x128xf32>
    %31 = arith.select %27, %25, %30 : vector<16x128xi1>, vector<16x128xf32>
    %32 = arith.truncf %31 : vector<16x128xf32> to vector<16x128xbf16>
    %cst_22 = arith.constant dense<0.000000e+00> : vector<16x128xf32>
    %33 = tpu.matmul %32, %13, %cst_22 {dimension_numbers = #tpu.dot_dimension_numbers<[1], [0], [0], [1], [0, 0, 1, 1], [], []>} : vector<16x128xbf16>, vector<128x128xbf16>, vector<16x128xf32> -> vector<16x128xf32>
    %34 = arith.addf %33, %18 : vector<16x128xf32>
    %35 = vector.broadcast %cst_16 : f32 to vector<16x128xf32>
    %36 = arith.mulf %35, %34 : vector<16x128xf32>
    %37 = arith.addf %25, %36 : vector<16x128xf32>
    %cst_23 = arith.constant 0.000000e+00 : f32
    %38 = vector.broadcast %cst_23 : f32 to vector<16x128xf32>
    %39 = arith.cmpf ogt, %37, %38 : vector<16x128xf32>
    %40 = math.exp %37 : vector<16x128xf32>
    %cst_24 = arith.constant 1.000000e+00 : f32
    %41 = vector.broadcast %cst_24 : f32 to vector<16x128xf32>
    %42 = arith.subf %40, %41 : vector<16x128xf32>
    %43 = arith.select %39, %37, %42 : vector<16x128xi1>, vector<16x128xf32>
    %44 = arith.truncf %43 : vector<16x128xf32> to vector<16x128xbf16>
    %cst_25 = arith.constant dense<0.000000e+00> : vector<16x128xf32>
    %45 = tpu.matmul %44, %13, %cst_25 {dimension_numbers = #tpu.dot_dimension_numbers<[1], [0], [0], [1], [0, 0, 1, 1], [], []>} : vector<16x128xbf16>, vector<128x128xbf16>, vector<16x128xf32> -> vector<16x128xf32>
    %46 = arith.addf %45, %18 : vector<16x128xf32>
    %47 = vector.broadcast %cst_16 : f32 to vector<16x128xf32>
    %48 = arith.mulf %47, %46 : vector<16x128xf32>
    %49 = arith.addf %25, %48 : vector<16x128xf32>
    %cst_26 = arith.constant 0.000000e+00 : f32
    %50 = vector.broadcast %cst_26 : f32 to vector<16x128xf32>
    %51 = arith.cmpf ogt, %49, %50 : vector<16x128xf32>
    %52 = math.exp %49 : vector<16x128xf32>
    %cst_27 = arith.constant 1.000000e+00 : f32
    %53 = vector.broadcast %cst_27 : f32 to vector<16x128xf32>
    %54 = arith.subf %52, %53 : vector<16x128xf32>
    %55 = arith.select %51, %49, %54 : vector<16x128xi1>, vector<16x128xf32>
    %56 = arith.truncf %55 : vector<16x128xf32> to vector<16x128xbf16>
    %cst_28 = arith.constant dense<0.000000e+00> : vector<16x128xf32>
    %57 = tpu.matmul %56, %13, %cst_28 {dimension_numbers = #tpu.dot_dimension_numbers<[1], [0], [0], [1], [0, 0, 1, 1], [], []>} : vector<16x128xbf16>, vector<128x128xbf16>, vector<16x128xf32> -> vector<16x128xf32>
    %58 = arith.addf %57, %18 : vector<16x128xf32>
    %59 = vector.broadcast %cst_17 : f32 to vector<16x128xf32>
    %60 = arith.mulf %59, %58 : vector<16x128xf32>
    %61 = arith.addf %25, %60 : vector<16x128xf32>
    %cst_29 = arith.constant 0.000000e+00 : f32
    %62 = vector.broadcast %cst_29 : f32 to vector<16x128xf32>
    %63 = arith.cmpf ogt, %61, %62 : vector<16x128xf32>
    %64 = math.exp %61 : vector<16x128xf32>
    %cst_30 = arith.constant 1.000000e+00 : f32
    %65 = vector.broadcast %cst_30 : f32 to vector<16x128xf32>
    %66 = arith.subf %64, %65 : vector<16x128xf32>
    %67 = arith.select %63, %61, %66 : vector<16x128xi1>, vector<16x128xf32>
    %cst_31 = arith.constant 2.000000e+00 : f32
    %68 = vector.broadcast %cst_31 : f32 to vector<16x128xf32>
    %69 = arith.mulf %68, %43 : vector<16x128xf32>
    %70 = arith.addf %31, %69 : vector<16x128xf32>
    %cst_32 = arith.constant 2.000000e+00 : f32
    %71 = vector.broadcast %cst_32 : f32 to vector<16x128xf32>
    %72 = arith.mulf %71, %55 : vector<16x128xf32>
    %73 = arith.addf %70, %72 : vector<16x128xf32>
    %74 = arith.addf %73, %67 : vector<16x128xf32>
    %75 = arith.truncf %74 : vector<16x128xf32> to vector<16x128xbf16>
    %cst_33 = arith.constant dense<0.000000e+00> : vector<16x128xf32>
    %76 = tpu.matmul %75, %12, %cst_33 {dimension_numbers = #tpu.dot_dimension_numbers<[1], [0], [0], [1], [0, 0, 1, 1], [], []>} : vector<16x128xbf16>, vector<128x128xbf16>, vector<16x128xf32> -> vector<16x128xf32>
    %77 = vector.broadcast %cst_18 : f32 to vector<16x128xf32>
    %78 = arith.mulf %77, %76 : vector<16x128xf32>
    %79 = arith.addf %5, %78 : vector<16x128xf32>
    %80 = arith.addf %79, %22 : vector<16x128xf32>
    %c1_i32 = arith.constant 1 : i32
    %81 = arith.truncf %80 : vector<16x128xf32> to vector<16x128xbf16>
    %cst_34 = arith.constant dense<0.000000e+00> : vector<16x128xf32>
    %82 = tpu.matmul %81, %11, %cst_34 {dimension_numbers = #tpu.dot_dimension_numbers<[1], [0], [0], [1], [0, 0, 1, 1], [], []>} : vector<16x128xbf16>, vector<128x128xbf16>, vector<16x128xf32> -> vector<16x128xf32>
    %83 = arith.addf %82, %16 : vector<16x128xf32>
    %cst_35 = arith.constant 0.000000e+00 : f32
    %84 = vector.broadcast %cst_35 : f32 to vector<16x128xf32>
    %85 = arith.cmpf ogt, %83, %84 : vector<16x128xf32>
    %86 = math.exp %83 : vector<16x128xf32>
    %cst_36 = arith.constant 1.000000e+00 : f32
    %87 = vector.broadcast %cst_36 : f32 to vector<16x128xf32>
    %88 = arith.subf %86, %87 : vector<16x128xf32>
    %89 = arith.select %85, %83, %88 : vector<16x128xi1>, vector<16x128xf32>
    %90 = arith.truncf %89 : vector<16x128xf32> to vector<16x128xbf16>
    %cst_37 = arith.constant dense<0.000000e+00> : vector<16x128xf32>
    %91 = tpu.matmul %90, %13, %cst_37 {dimension_numbers = #tpu.dot_dimension_numbers<[1], [0], [0], [1], [0, 0, 1, 1], [], []>} : vector<16x128xbf16>, vector<128x128xbf16>, vector<16x128xf32> -> vector<16x128xf32>
    %92 = arith.addf %91, %18 : vector<16x128xf32>
    %93 = vector.broadcast %cst_16 : f32 to vector<16x128xf32>
    %94 = arith.mulf %93, %92 : vector<16x128xf32>
    %95 = arith.addf %83, %94 : vector<16x128xf32>
    %cst_38 = arith.constant 0.000000e+00 : f32
    %96 = vector.broadcast %cst_38 : f32 to vector<16x128xf32>
    %97 = arith.cmpf ogt, %95, %96 : vector<16x128xf32>
    %98 = math.exp %95 : vector<16x128xf32>
    %cst_39 = arith.constant 1.000000e+00 : f32
    %99 = vector.broadcast %cst_39 : f32 to vector<16x128xf32>
    %100 = arith.subf %98, %99 : vector<16x128xf32>
    %101 = arith.select %97, %95, %100 : vector<16x128xi1>, vector<16x128xf32>
    %102 = arith.truncf %101 : vector<16x128xf32> to vector<16x128xbf16>
    %cst_40 = arith.constant dense<0.000000e+00> : vector<16x128xf32>
    %103 = tpu.matmul %102, %13, %cst_40 {dimension_numbers = #tpu.dot_dimension_numbers<[1], [0], [0], [1], [0, 0, 1, 1], [], []>} : vector<16x128xbf16>, vector<128x128xbf16>, vector<16x128xf32> -> vector<16x128xf32>
    %104 = arith.addf %103, %18 : vector<16x128xf32>
    %105 = vector.broadcast %cst_16 : f32 to vector<16x128xf32>
    %106 = arith.mulf %105, %104 : vector<16x128xf32>
    %107 = arith.addf %83, %106 : vector<16x128xf32>
    %cst_41 = arith.constant 0.000000e+00 : f32
    %108 = vector.broadcast %cst_41 : f32 to vector<16x128xf32>
    %109 = arith.cmpf ogt, %107, %108 : vector<16x128xf32>
    %110 = math.exp %107 : vector<16x128xf32>
    %cst_42 = arith.constant 1.000000e+00 : f32
    %111 = vector.broadcast %cst_42 : f32 to vector<16x128xf32>
    %112 = arith.subf %110, %111 : vector<16x128xf32>
    %113 = arith.select %109, %107, %112 : vector<16x128xi1>, vector<16x128xf32>
    %114 = arith.truncf %113 : vector<16x128xf32> to vector<16x128xbf16>
    %cst_43 = arith.constant dense<0.000000e+00> : vector<16x128xf32>
    %115 = tpu.matmul %114, %13, %cst_43 {dimension_numbers = #tpu.dot_dimension_numbers<[1], [0], [0], [1], [0, 0, 1, 1], [], []>} : vector<16x128xbf16>, vector<128x128xbf16>, vector<16x128xf32> -> vector<16x128xf32>
    %116 = arith.addf %115, %18 : vector<16x128xf32>
    %117 = vector.broadcast %cst_17 : f32 to vector<16x128xf32>
    %118 = arith.mulf %117, %116 : vector<16x128xf32>
    %119 = arith.addf %83, %118 : vector<16x128xf32>
    %cst_44 = arith.constant 0.000000e+00 : f32
    %120 = vector.broadcast %cst_44 : f32 to vector<16x128xf32>
    %121 = arith.cmpf ogt, %119, %120 : vector<16x128xf32>
    %122 = math.exp %119 : vector<16x128xf32>
    %cst_45 = arith.constant 1.000000e+00 : f32
    %123 = vector.broadcast %cst_45 : f32 to vector<16x128xf32>
    %124 = arith.subf %122, %123 : vector<16x128xf32>
    %125 = arith.select %121, %119, %124 : vector<16x128xi1>, vector<16x128xf32>
    %cst_46 = arith.constant 2.000000e+00 : f32
    %126 = vector.broadcast %cst_46 : f32 to vector<16x128xf32>
    %127 = arith.mulf %126, %101 : vector<16x128xf32>
    %128 = arith.addf %89, %127 : vector<16x128xf32>
    %cst_47 = arith.constant 2.000000e+00 : f32
    %129 = vector.broadcast %cst_47 : f32 to vector<16x128xf32>
    %130 = arith.mulf %129, %113 : vector<16x128xf32>
    %131 = arith.addf %128, %130 : vector<16x128xf32>
    %132 = arith.addf %131, %125 : vector<16x128xf32>
    %133 = arith.truncf %132 : vector<16x128xf32> to vector<16x128xbf16>
    %cst_48 = arith.constant dense<0.000000e+00> : vector<16x128xf32>
    %134 = tpu.matmul %133, %12, %cst_48 {dimension_numbers = #tpu.dot_dimension_numbers<[1], [0], [0], [1], [0, 0, 1, 1], [], []>} : vector<16x128xbf16>, vector<128x128xbf16>, vector<16x128xf32> -> vector<16x128xf32>
    %135 = vector.broadcast %cst_18 : f32 to vector<16x128xf32>
    %136 = arith.mulf %135, %134 : vector<16x128xf32>
    %137 = arith.addf %80, %136 : vector<16x128xf32>
    %138 = arith.addf %137, %22 : vector<16x128xf32>
    %c2_i32 = arith.constant 2 : i32
    %139 = arith.truncf %138 : vector<16x128xf32> to vector<16x128xbf16>
    %cst_49 = arith.constant dense<0.000000e+00> : vector<16x128xf32>
    %140 = tpu.matmul %139, %11, %cst_49 {dimension_numbers = #tpu.dot_dimension_numbers<[1], [0], [0], [1], [0, 0, 1, 1], [], []>} : vector<16x128xbf16>, vector<128x128xbf16>, vector<16x128xf32> -> vector<16x128xf32>
    %141 = arith.addf %140, %16 : vector<16x128xf32>
    %cst_50 = arith.constant 0.000000e+00 : f32
    %142 = vector.broadcast %cst_50 : f32 to vector<16x128xf32>
    %143 = arith.cmpf ogt, %141, %142 : vector<16x128xf32>
    %144 = math.exp %141 : vector<16x128xf32>
    %cst_51 = arith.constant 1.000000e+00 : f32
    %145 = vector.broadcast %cst_51 : f32 to vector<16x128xf32>
    %146 = arith.subf %144, %145 : vector<16x128xf32>
    %147 = arith.select %143, %141, %146 : vector<16x128xi1>, vector<16x128xf32>
    %148 = arith.truncf %147 : vector<16x128xf32> to vector<16x128xbf16>
    %cst_52 = arith.constant dense<0.000000e+00> : vector<16x128xf32>
    %149 = tpu.matmul %148, %13, %cst_52 {dimension_numbers = #tpu.dot_dimension_numbers<[1], [0], [0], [1], [0, 0, 1, 1], [], []>} : vector<16x128xbf16>, vector<128x128xbf16>, vector<16x128xf32> -> vector<16x128xf32>
    %150 = arith.addf %149, %18 : vector<16x128xf32>
    %151 = vector.broadcast %cst_16 : f32 to vector<16x128xf32>
    %152 = arith.mulf %151, %150 : vector<16x128xf32>
    %153 = arith.addf %141, %152 : vector<16x128xf32>
    %cst_53 = arith.constant 0.000000e+00 : f32
    %154 = vector.broadcast %cst_53 : f32 to vector<16x128xf32>
    %155 = arith.cmpf ogt, %153, %154 : vector<16x128xf32>
    %156 = math.exp %153 : vector<16x128xf32>
    %cst_54 = arith.constant 1.000000e+00 : f32
    %157 = vector.broadcast %cst_54 : f32 to vector<16x128xf32>
    %158 = arith.subf %156, %157 : vector<16x128xf32>
    %159 = arith.select %155, %153, %158 : vector<16x128xi1>, vector<16x128xf32>
    %160 = arith.truncf %159 : vector<16x128xf32> to vector<16x128xbf16>
    %cst_55 = arith.constant dense<0.000000e+00> : vector<16x128xf32>
    %161 = tpu.matmul %160, %13, %cst_55 {dimension_numbers = #tpu.dot_dimension_numbers<[1], [0], [0], [1], [0, 0, 1, 1], [], []>} : vector<16x128xbf16>, vector<128x128xbf16>, vector<16x128xf32> -> vector<16x128xf32>
    %162 = arith.addf %161, %18 : vector<16x128xf32>
    %163 = vector.broadcast %cst_16 : f32 to vector<16x128xf32>
    %164 = arith.mulf %163, %162 : vector<16x128xf32>
    %165 = arith.addf %141, %164 : vector<16x128xf32>
    %cst_56 = arith.constant 0.000000e+00 : f32
    %166 = vector.broadcast %cst_56 : f32 to vector<16x128xf32>
    %167 = arith.cmpf ogt, %165, %166 : vector<16x128xf32>
    %168 = math.exp %165 : vector<16x128xf32>
    %cst_57 = arith.constant 1.000000e+00 : f32
    %169 = vector.broadcast %cst_57 : f32 to vector<16x128xf32>
    %170 = arith.subf %168, %169 : vector<16x128xf32>
    %171 = arith.select %167, %165, %170 : vector<16x128xi1>, vector<16x128xf32>
    %172 = arith.truncf %171 : vector<16x128xf32> to vector<16x128xbf16>
    %cst_58 = arith.constant dense<0.000000e+00> : vector<16x128xf32>
    %173 = tpu.matmul %172, %13, %cst_58 {dimension_numbers = #tpu.dot_dimension_numbers<[1], [0], [0], [1], [0, 0, 1, 1], [], []>} : vector<16x128xbf16>, vector<128x128xbf16>, vector<16x128xf32> -> vector<16x128xf32>
    %174 = arith.addf %173, %18 : vector<16x128xf32>
    %175 = vector.broadcast %cst_17 : f32 to vector<16x128xf32>
    %176 = arith.mulf %175, %174 : vector<16x128xf32>
    %177 = arith.addf %141, %176 : vector<16x128xf32>
    %cst_59 = arith.constant 0.000000e+00 : f32
    %178 = vector.broadcast %cst_59 : f32 to vector<16x128xf32>
    %179 = arith.cmpf ogt, %177, %178 : vector<16x128xf32>
    %180 = math.exp %177 : vector<16x128xf32>
    %cst_60 = arith.constant 1.000000e+00 : f32
    %181 = vector.broadcast %cst_60 : f32 to vector<16x128xf32>
    %182 = arith.subf %180, %181 : vector<16x128xf32>
    %183 = arith.select %179, %177, %182 : vector<16x128xi1>, vector<16x128xf32>
    %cst_61 = arith.constant 2.000000e+00 : f32
    %184 = vector.broadcast %cst_61 : f32 to vector<16x128xf32>
    %185 = arith.mulf %184, %159 : vector<16x128xf32>
    %186 = arith.addf %147, %185 : vector<16x128xf32>
    %cst_62 = arith.constant 2.000000e+00 : f32
    %187 = vector.broadcast %cst_62 : f32 to vector<16x128xf32>
    %188 = arith.mulf %187, %171 : vector<16x128xf32>
    %189 = arith.addf %186, %188 : vector<16x128xf32>
    %190 = arith.addf %189, %183 : vector<16x128xf32>
    %191 = arith.truncf %190 : vector<16x128xf32> to vector<16x128xbf16>
    %cst_63 = arith.constant dense<0.000000e+00> : vector<16x128xf32>
    %192 = tpu.matmul %191, %12, %cst_63 {dimension_numbers = #tpu.dot_dimension_numbers<[1], [0], [0], [1], [0, 0, 1, 1], [], []>} : vector<16x128xbf16>, vector<128x128xbf16>, vector<16x128xf32> -> vector<16x128xf32>
    %193 = vector.broadcast %cst_18 : f32 to vector<16x128xf32>
    %194 = arith.mulf %193, %192 : vector<16x128xf32>
    %195 = arith.addf %138, %194 : vector<16x128xf32>
    %196 = arith.addf %195, %22 : vector<16x128xf32>
    %c3_i32 = arith.constant 3 : i32
    %197 = arith.truncf %196 : vector<16x128xf32> to vector<16x128xbf16>
    %cst_64 = arith.constant dense<0.000000e+00> : vector<16x128xf32>
    %198 = tpu.matmul %197, %11, %cst_64 {dimension_numbers = #tpu.dot_dimension_numbers<[1], [0], [0], [1], [0, 0, 1, 1], [], []>} : vector<16x128xbf16>, vector<128x128xbf16>, vector<16x128xf32> -> vector<16x128xf32>
    %199 = arith.addf %198, %16 : vector<16x128xf32>
    %cst_65 = arith.constant 0.000000e+00 : f32
    %200 = vector.broadcast %cst_65 : f32 to vector<16x128xf32>
    %201 = arith.cmpf ogt, %199, %200 : vector<16x128xf32>
    %202 = math.exp %199 : vector<16x128xf32>
    %cst_66 = arith.constant 1.000000e+00 : f32
    %203 = vector.broadcast %cst_66 : f32 to vector<16x128xf32>
    %204 = arith.subf %202, %203 : vector<16x128xf32>
    %205 = arith.select %201, %199, %204 : vector<16x128xi1>, vector<16x128xf32>
    %206 = arith.truncf %205 : vector<16x128xf32> to vector<16x128xbf16>
    %cst_67 = arith.constant dense<0.000000e+00> : vector<16x128xf32>
    %207 = tpu.matmul %206, %13, %cst_67 {dimension_numbers = #tpu.dot_dimension_numbers<[1], [0], [0], [1], [0, 0, 1, 1], [], []>} : vector<16x128xbf16>, vector<128x128xbf16>, vector<16x128xf32> -> vector<16x128xf32>
    %208 = arith.addf %207, %18 : vector<16x128xf32>
    %209 = vector.broadcast %cst_16 : f32 to vector<16x128xf32>
    %210 = arith.mulf %209, %208 : vector<16x128xf32>
    %211 = arith.addf %199, %210 : vector<16x128xf32>
    %cst_68 = arith.constant 0.000000e+00 : f32
    %212 = vector.broadcast %cst_68 : f32 to vector<16x128xf32>
    %213 = arith.cmpf ogt, %211, %212 : vector<16x128xf32>
    %214 = math.exp %211 : vector<16x128xf32>
    %cst_69 = arith.constant 1.000000e+00 : f32
    %215 = vector.broadcast %cst_69 : f32 to vector<16x128xf32>
    %216 = arith.subf %214, %215 : vector<16x128xf32>
    %217 = arith.select %213, %211, %216 : vector<16x128xi1>, vector<16x128xf32>
    %218 = arith.truncf %217 : vector<16x128xf32> to vector<16x128xbf16>
    %cst_70 = arith.constant dense<0.000000e+00> : vector<16x128xf32>
    %219 = tpu.matmul %218, %13, %cst_70 {dimension_numbers = #tpu.dot_dimension_numbers<[1], [0], [0], [1], [0, 0, 1, 1], [], []>} : vector<16x128xbf16>, vector<128x128xbf16>, vector<16x128xf32> -> vector<16x128xf32>
    %220 = arith.addf %219, %18 : vector<16x128xf32>
    %221 = vector.broadcast %cst_16 : f32 to vector<16x128xf32>
    %222 = arith.mulf %221, %220 : vector<16x128xf32>
    %223 = arith.addf %199, %222 : vector<16x128xf32>
    %cst_71 = arith.constant 0.000000e+00 : f32
    %224 = vector.broadcast %cst_71 : f32 to vector<16x128xf32>
    %225 = arith.cmpf ogt, %223, %224 : vector<16x128xf32>
    %226 = math.exp %223 : vector<16x128xf32>
    %cst_72 = arith.constant 1.000000e+00 : f32
    %227 = vector.broadcast %cst_72 : f32 to vector<16x128xf32>
    %228 = arith.subf %226, %227 : vector<16x128xf32>
    %229 = arith.select %225, %223, %228 : vector<16x128xi1>, vector<16x128xf32>
    %230 = arith.truncf %229 : vector<16x128xf32> to vector<16x128xbf16>
    %cst_73 = arith.constant dense<0.000000e+00> : vector<16x128xf32>
    %231 = tpu.matmul %230, %13, %cst_73 {dimension_numbers = #tpu.dot_dimension_numbers<[1], [0], [0], [1], [0, 0, 1, 1], [], []>} : vector<16x128xbf16>, vector<128x128xbf16>, vector<16x128xf32> -> vector<16x128xf32>
    %232 = arith.addf %231, %18 : vector<16x128xf32>
    %233 = vector.broadcast %cst_17 : f32 to vector<16x128xf32>
    %234 = arith.mulf %233, %232 : vector<16x128xf32>
    %235 = arith.addf %199, %234 : vector<16x128xf32>
    %cst_74 = arith.constant 0.000000e+00 : f32
    %236 = vector.broadcast %cst_74 : f32 to vector<16x128xf32>
    %237 = arith.cmpf ogt, %235, %236 : vector<16x128xf32>
    %238 = math.exp %235 : vector<16x128xf32>
    %cst_75 = arith.constant 1.000000e+00 : f32
    %239 = vector.broadcast %cst_75 : f32 to vector<16x128xf32>
    %240 = arith.subf %238, %239 : vector<16x128xf32>
    %241 = arith.select %237, %235, %240 : vector<16x128xi1>, vector<16x128xf32>
    %cst_76 = arith.constant 2.000000e+00 : f32
    %242 = vector.broadcast %cst_76 : f32 to vector<16x128xf32>
    %243 = arith.mulf %242, %217 : vector<16x128xf32>
    %244 = arith.addf %205, %243 : vector<16x128xf32>
    %cst_77 = arith.constant 2.000000e+00 : f32
    %245 = vector.broadcast %cst_77 : f32 to vector<16x128xf32>
    %246 = arith.mulf %245, %229 : vector<16x128xf32>
    %247 = arith.addf %244, %246 : vector<16x128xf32>
    %248 = arith.addf %247, %241 : vector<16x128xf32>
    %249 = arith.truncf %248 : vector<16x128xf32> to vector<16x128xbf16>
    %cst_78 = arith.constant dense<0.000000e+00> : vector<16x128xf32>
    %250 = tpu.matmul %249, %12, %cst_78 {dimension_numbers = #tpu.dot_dimension_numbers<[1], [0], [0], [1], [0, 0, 1, 1], [], []>} : vector<16x128xbf16>, vector<128x128xbf16>, vector<16x128xf32> -> vector<16x128xf32>
    %251 = vector.broadcast %cst_18 : f32 to vector<16x128xf32>
    %252 = arith.mulf %251, %250 : vector<16x128xf32>
    %253 = arith.addf %196, %252 : vector<16x128xf32>
    %254 = arith.addf %253, %22 : vector<16x128xf32>
    %c4_i32 = arith.constant 4 : i32
    %255 = arith.truncf %254 : vector<16x128xf32> to vector<16x128xbf16>
    %cst_79 = arith.constant dense<0.000000e+00> : vector<16x128xf32>
    %256 = tpu.matmul %255, %11, %cst_79 {dimension_numbers = #tpu.dot_dimension_numbers<[1], [0], [0], [1], [0, 0, 1, 1], [], []>} : vector<16x128xbf16>, vector<128x128xbf16>, vector<16x128xf32> -> vector<16x128xf32>
    %257 = arith.addf %256, %16 : vector<16x128xf32>
    %cst_80 = arith.constant 0.000000e+00 : f32
    %258 = vector.broadcast %cst_80 : f32 to vector<16x128xf32>
    %259 = arith.cmpf ogt, %257, %258 : vector<16x128xf32>
    %260 = math.exp %257 : vector<16x128xf32>
    %cst_81 = arith.constant 1.000000e+00 : f32
    %261 = vector.broadcast %cst_81 : f32 to vector<16x128xf32>
    %262 = arith.subf %260, %261 : vector<16x128xf32>
    %263 = arith.select %259, %257, %262 : vector<16x128xi1>, vector<16x128xf32>
    %264 = arith.truncf %263 : vector<16x128xf32> to vector<16x128xbf16>
    %cst_82 = arith.constant dense<0.000000e+00> : vector<16x128xf32>
    %265 = tpu.matmul %264, %13, %cst_82 {dimension_numbers = #tpu.dot_dimension_numbers<[1], [0], [0], [1], [0, 0, 1, 1], [], []>} : vector<16x128xbf16>, vector<128x128xbf16>, vector<16x128xf32> -> vector<16x128xf32>
    %266 = arith.addf %265, %18 : vector<16x128xf32>
    %267 = vector.broadcast %cst_16 : f32 to vector<16x128xf32>
    %268 = arith.mulf %267, %266 : vector<16x128xf32>
    %269 = arith.addf %257, %268 : vector<16x128xf32>
    %cst_83 = arith.constant 0.000000e+00 : f32
    %270 = vector.broadcast %cst_83 : f32 to vector<16x128xf32>
    %271 = arith.cmpf ogt, %269, %270 : vector<16x128xf32>
    %272 = math.exp %269 : vector<16x128xf32>
    %cst_84 = arith.constant 1.000000e+00 : f32
    %273 = vector.broadcast %cst_84 : f32 to vector<16x128xf32>
    %274 = arith.subf %272, %273 : vector<16x128xf32>
    %275 = arith.select %271, %269, %274 : vector<16x128xi1>, vector<16x128xf32>
    %276 = arith.truncf %275 : vector<16x128xf32> to vector<16x128xbf16>
    %cst_85 = arith.constant dense<0.000000e+00> : vector<16x128xf32>
    %277 = tpu.matmul %276, %13, %cst_85 {dimension_numbers = #tpu.dot_dimension_numbers<[1], [0], [0], [1], [0, 0, 1, 1], [], []>} : vector<16x128xbf16>, vector<128x128xbf16>, vector<16x128xf32> -> vector<16x128xf32>
    %278 = arith.addf %277, %18 : vector<16x128xf32>
    %279 = vector.broadcast %cst_16 : f32 to vector<16x128xf32>
    %280 = arith.mulf %279, %278 : vector<16x128xf32>
    %281 = arith.addf %257, %280 : vector<16x128xf32>
    %cst_86 = arith.constant 0.000000e+00 : f32
    %282 = vector.broadcast %cst_86 : f32 to vector<16x128xf32>
    %283 = arith.cmpf ogt, %281, %282 : vector<16x128xf32>
    %284 = math.exp %281 : vector<16x128xf32>
    %cst_87 = arith.constant 1.000000e+00 : f32
    %285 = vector.broadcast %cst_87 : f32 to vector<16x128xf32>
    %286 = arith.subf %284, %285 : vector<16x128xf32>
    %287 = arith.select %283, %281, %286 : vector<16x128xi1>, vector<16x128xf32>
    %288 = arith.truncf %287 : vector<16x128xf32> to vector<16x128xbf16>
    %cst_88 = arith.constant dense<0.000000e+00> : vector<16x128xf32>
    %289 = tpu.matmul %288, %13, %cst_88 {dimension_numbers = #tpu.dot_dimension_numbers<[1], [0], [0], [1], [0, 0, 1, 1], [], []>} : vector<16x128xbf16>, vector<128x128xbf16>, vector<16x128xf32> -> vector<16x128xf32>
    %290 = arith.addf %289, %18 : vector<16x128xf32>
    %291 = vector.broadcast %cst_17 : f32 to vector<16x128xf32>
    %292 = arith.mulf %291, %290 : vector<16x128xf32>
    %293 = arith.addf %257, %292 : vector<16x128xf32>
    %cst_89 = arith.constant 0.000000e+00 : f32
    %294 = vector.broadcast %cst_89 : f32 to vector<16x128xf32>
    %295 = arith.cmpf ogt, %293, %294 : vector<16x128xf32>
    %296 = math.exp %293 : vector<16x128xf32>
    %cst_90 = arith.constant 1.000000e+00 : f32
    %297 = vector.broadcast %cst_90 : f32 to vector<16x128xf32>
    %298 = arith.subf %296, %297 : vector<16x128xf32>
    %299 = arith.select %295, %293, %298 : vector<16x128xi1>, vector<16x128xf32>
    %cst_91 = arith.constant 2.000000e+00 : f32
    %300 = vector.broadcast %cst_91 : f32 to vector<16x128xf32>
    %301 = arith.mulf %300, %275 : vector<16x128xf32>
    %302 = arith.addf %263, %301 : vector<16x128xf32>
    %cst_92 = arith.constant 2.000000e+00 : f32
    %303 = vector.broadcast %cst_92 : f32 to vector<16x128xf32>
    %304 = arith.mulf %303, %287 : vector<16x128xf32>
    %305 = arith.addf %302, %304 : vector<16x128xf32>
    %306 = arith.addf %305, %299 : vector<16x128xf32>
    %307 = arith.truncf %306 : vector<16x128xf32> to vector<16x128xbf16>
    %cst_93 = arith.constant dense<0.000000e+00> : vector<16x128xf32>
    %308 = tpu.matmul %307, %12, %cst_93 {dimension_numbers = #tpu.dot_dimension_numbers<[1], [0], [0], [1], [0, 0, 1, 1], [], []>} : vector<16x128xbf16>, vector<128x128xbf16>, vector<16x128xf32> -> vector<16x128xf32>
    %309 = vector.broadcast %cst_18 : f32 to vector<16x128xf32>
    %310 = arith.mulf %309, %308 : vector<16x128xf32>
    %311 = arith.addf %254, %310 : vector<16x128xf32>
    %312 = arith.addf %311, %22 : vector<16x128xf32>
    %c5_i32 = arith.constant 5 : i32
    %313 = arith.truncf %312 : vector<16x128xf32> to vector<16x128xbf16>
    %cst_94 = arith.constant dense<0.000000e+00> : vector<16x128xf32>
    %314 = tpu.matmul %313, %11, %cst_94 {dimension_numbers = #tpu.dot_dimension_numbers<[1], [0], [0], [1], [0, 0, 1, 1], [], []>} : vector<16x128xbf16>, vector<128x128xbf16>, vector<16x128xf32> -> vector<16x128xf32>
    %315 = arith.addf %314, %16 : vector<16x128xf32>
    %cst_95 = arith.constant 0.000000e+00 : f32
    %316 = vector.broadcast %cst_95 : f32 to vector<16x128xf32>
    %317 = arith.cmpf ogt, %315, %316 : vector<16x128xf32>
    %318 = math.exp %315 : vector<16x128xf32>
    %cst_96 = arith.constant 1.000000e+00 : f32
    %319 = vector.broadcast %cst_96 : f32 to vector<16x128xf32>
    %320 = arith.subf %318, %319 : vector<16x128xf32>
    %321 = arith.select %317, %315, %320 : vector<16x128xi1>, vector<16x128xf32>
    %322 = arith.truncf %321 : vector<16x128xf32> to vector<16x128xbf16>
    %cst_97 = arith.constant dense<0.000000e+00> : vector<16x128xf32>
    %323 = tpu.matmul %322, %13, %cst_97 {dimension_numbers = #tpu.dot_dimension_numbers<[1], [0], [0], [1], [0, 0, 1, 1], [], []>} : vector<16x128xbf16>, vector<128x128xbf16>, vector<16x128xf32> -> vector<16x128xf32>
    %324 = arith.addf %323, %18 : vector<16x128xf32>
    %325 = vector.broadcast %cst_16 : f32 to vector<16x128xf32>
    %326 = arith.mulf %325, %324 : vector<16x128xf32>
    %327 = arith.addf %315, %326 : vector<16x128xf32>
    %cst_98 = arith.constant 0.000000e+00 : f32
    %328 = vector.broadcast %cst_98 : f32 to vector<16x128xf32>
    %329 = arith.cmpf ogt, %327, %328 : vector<16x128xf32>
    %330 = math.exp %327 : vector<16x128xf32>
    %cst_99 = arith.constant 1.000000e+00 : f32
    %331 = vector.broadcast %cst_99 : f32 to vector<16x128xf32>
    %332 = arith.subf %330, %331 : vector<16x128xf32>
    %333 = arith.select %329, %327, %332 : vector<16x128xi1>, vector<16x128xf32>
    %334 = arith.truncf %333 : vector<16x128xf32> to vector<16x128xbf16>
    %cst_100 = arith.constant dense<0.000000e+00> : vector<16x128xf32>
    %335 = tpu.matmul %334, %13, %cst_100 {dimension_numbers = #tpu.dot_dimension_numbers<[1], [0], [0], [1], [0, 0, 1, 1], [], []>} : vector<16x128xbf16>, vector<128x128xbf16>, vector<16x128xf32> -> vector<16x128xf32>
    %336 = arith.addf %335, %18 : vector<16x128xf32>
    %337 = vector.broadcast %cst_16 : f32 to vector<16x128xf32>
    %338 = arith.mulf %337, %336 : vector<16x128xf32>
    %339 = arith.addf %315, %338 : vector<16x128xf32>
    %cst_101 = arith.constant 0.000000e+00 : f32
    %340 = vector.broadcast %cst_101 : f32 to vector<16x128xf32>
    %341 = arith.cmpf ogt, %339, %340 : vector<16x128xf32>
    %342 = math.exp %339 : vector<16x128xf32>
    %cst_102 = arith.constant 1.000000e+00 : f32
    %343 = vector.broadcast %cst_102 : f32 to vector<16x128xf32>
    %344 = arith.subf %342, %343 : vector<16x128xf32>
    %345 = arith.select %341, %339, %344 : vector<16x128xi1>, vector<16x128xf32>
    %346 = arith.truncf %345 : vector<16x128xf32> to vector<16x128xbf16>
    %cst_103 = arith.constant dense<0.000000e+00> : vector<16x128xf32>
    %347 = tpu.matmul %346, %13, %cst_103 {dimension_numbers = #tpu.dot_dimension_numbers<[1], [0], [0], [1], [0, 0, 1, 1], [], []>} : vector<16x128xbf16>, vector<128x128xbf16>, vector<16x128xf32> -> vector<16x128xf32>
    %348 = arith.addf %347, %18 : vector<16x128xf32>
    %349 = vector.broadcast %cst_17 : f32 to vector<16x128xf32>
    %350 = arith.mulf %349, %348 : vector<16x128xf32>
    %351 = arith.addf %315, %350 : vector<16x128xf32>
    %cst_104 = arith.constant 0.000000e+00 : f32
    %352 = vector.broadcast %cst_104 : f32 to vector<16x128xf32>
    %353 = arith.cmpf ogt, %351, %352 : vector<16x128xf32>
    %354 = math.exp %351 : vector<16x128xf32>
    %cst_105 = arith.constant 1.000000e+00 : f32
    %355 = vector.broadcast %cst_105 : f32 to vector<16x128xf32>
    %356 = arith.subf %354, %355 : vector<16x128xf32>
    %357 = arith.select %353, %351, %356 : vector<16x128xi1>, vector<16x128xf32>
    %cst_106 = arith.constant 2.000000e+00 : f32
    %358 = vector.broadcast %cst_106 : f32 to vector<16x128xf32>
    %359 = arith.mulf %358, %333 : vector<16x128xf32>
    %360 = arith.addf %321, %359 : vector<16x128xf32>
    %cst_107 = arith.constant 2.000000e+00 : f32
    %361 = vector.broadcast %cst_107 : f32 to vector<16x128xf32>
    %362 = arith.mulf %361, %345 : vector<16x128xf32>
    %363 = arith.addf %360, %362 : vector<16x128xf32>
    %364 = arith.addf %363, %357 : vector<16x128xf32>
    %365 = arith.truncf %364 : vector<16x128xf32> to vector<16x128xbf16>
    %cst_108 = arith.constant dense<0.000000e+00> : vector<16x128xf32>
    %366 = tpu.matmul %365, %12, %cst_108 {dimension_numbers = #tpu.dot_dimension_numbers<[1], [0], [0], [1], [0, 0, 1, 1], [], []>} : vector<16x128xbf16>, vector<128x128xbf16>, vector<16x128xf32> -> vector<16x128xf32>
    %367 = vector.broadcast %cst_18 : f32 to vector<16x128xf32>
    %368 = arith.mulf %367, %366 : vector<16x128xf32>
    %369 = arith.addf %312, %368 : vector<16x128xf32>
    %370 = arith.addf %369, %22 : vector<16x128xf32>
    %c6_i32 = arith.constant 6 : i32
    %371 = arith.truncf %370 : vector<16x128xf32> to vector<16x128xbf16>
    %cst_109 = arith.constant dense<0.000000e+00> : vector<16x128xf32>
    %372 = tpu.matmul %371, %11, %cst_109 {dimension_numbers = #tpu.dot_dimension_numbers<[1], [0], [0], [1], [0, 0, 1, 1], [], []>} : vector<16x128xbf16>, vector<128x128xbf16>, vector<16x128xf32> -> vector<16x128xf32>
    %373 = arith.addf %372, %16 : vector<16x128xf32>
    %cst_110 = arith.constant 0.000000e+00 : f32
    %374 = vector.broadcast %cst_110 : f32 to vector<16x128xf32>
    %375 = arith.cmpf ogt, %373, %374 : vector<16x128xf32>
    %376 = math.exp %373 : vector<16x128xf32>
    %cst_111 = arith.constant 1.000000e+00 : f32
    %377 = vector.broadcast %cst_111 : f32 to vector<16x128xf32>
    %378 = arith.subf %376, %377 : vector<16x128xf32>
    %379 = arith.select %375, %373, %378 : vector<16x128xi1>, vector<16x128xf32>
    %380 = arith.truncf %379 : vector<16x128xf32> to vector<16x128xbf16>
    %cst_112 = arith.constant dense<0.000000e+00> : vector<16x128xf32>
    %381 = tpu.matmul %380, %13, %cst_112 {dimension_numbers = #tpu.dot_dimension_numbers<[1], [0], [0], [1], [0, 0, 1, 1], [], []>} : vector<16x128xbf16>, vector<128x128xbf16>, vector<16x128xf32> -> vector<16x128xf32>
    %382 = arith.addf %381, %18 : vector<16x128xf32>
    %383 = vector.broadcast %cst_16 : f32 to vector<16x128xf32>
    %384 = arith.mulf %383, %382 : vector<16x128xf32>
    %385 = arith.addf %373, %384 : vector<16x128xf32>
    %cst_113 = arith.constant 0.000000e+00 : f32
    %386 = vector.broadcast %cst_113 : f32 to vector<16x128xf32>
    %387 = arith.cmpf ogt, %385, %386 : vector<16x128xf32>
    %388 = math.exp %385 : vector<16x128xf32>
    %cst_114 = arith.constant 1.000000e+00 : f32
    %389 = vector.broadcast %cst_114 : f32 to vector<16x128xf32>
    %390 = arith.subf %388, %389 : vector<16x128xf32>
    %391 = arith.select %387, %385, %390 : vector<16x128xi1>, vector<16x128xf32>
    %392 = arith.truncf %391 : vector<16x128xf32> to vector<16x128xbf16>
    %cst_115 = arith.constant dense<0.000000e+00> : vector<16x128xf32>
    %393 = tpu.matmul %392, %13, %cst_115 {dimension_numbers = #tpu.dot_dimension_numbers<[1], [0], [0], [1], [0, 0, 1, 1], [], []>} : vector<16x128xbf16>, vector<128x128xbf16>, vector<16x128xf32> -> vector<16x128xf32>
    %394 = arith.addf %393, %18 : vector<16x128xf32>
    %395 = vector.broadcast %cst_16 : f32 to vector<16x128xf32>
    %396 = arith.mulf %395, %394 : vector<16x128xf32>
    %397 = arith.addf %373, %396 : vector<16x128xf32>
    %cst_116 = arith.constant 0.000000e+00 : f32
    %398 = vector.broadcast %cst_116 : f32 to vector<16x128xf32>
    %399 = arith.cmpf ogt, %397, %398 : vector<16x128xf32>
    %400 = math.exp %397 : vector<16x128xf32>
    %cst_117 = arith.constant 1.000000e+00 : f32
    %401 = vector.broadcast %cst_117 : f32 to vector<16x128xf32>
    %402 = arith.subf %400, %401 : vector<16x128xf32>
    %403 = arith.select %399, %397, %402 : vector<16x128xi1>, vector<16x128xf32>
    %404 = arith.truncf %403 : vector<16x128xf32> to vector<16x128xbf16>
    %cst_118 = arith.constant dense<0.000000e+00> : vector<16x128xf32>
    %405 = tpu.matmul %404, %13, %cst_118 {dimension_numbers = #tpu.dot_dimension_numbers<[1], [0], [0], [1], [0, 0, 1, 1], [], []>} : vector<16x128xbf16>, vector<128x128xbf16>, vector<16x128xf32> -> vector<16x128xf32>
    %406 = arith.addf %405, %18 : vector<16x128xf32>
    %407 = vector.broadcast %cst_17 : f32 to vector<16x128xf32>
    %408 = arith.mulf %407, %406 : vector<16x128xf32>
    %409 = arith.addf %373, %408 : vector<16x128xf32>
    %cst_119 = arith.constant 0.000000e+00 : f32
    %410 = vector.broadcast %cst_119 : f32 to vector<16x128xf32>
    %411 = arith.cmpf ogt, %409, %410 : vector<16x128xf32>
    %412 = math.exp %409 : vector<16x128xf32>
    %cst_120 = arith.constant 1.000000e+00 : f32
    %413 = vector.broadcast %cst_120 : f32 to vector<16x128xf32>
    %414 = arith.subf %412, %413 : vector<16x128xf32>
    %415 = arith.select %411, %409, %414 : vector<16x128xi1>, vector<16x128xf32>
    %cst_121 = arith.constant 2.000000e+00 : f32
    %416 = vector.broadcast %cst_121 : f32 to vector<16x128xf32>
    %417 = arith.mulf %416, %391 : vector<16x128xf32>
    %418 = arith.addf %379, %417 : vector<16x128xf32>
    %cst_122 = arith.constant 2.000000e+00 : f32
    %419 = vector.broadcast %cst_122 : f32 to vector<16x128xf32>
    %420 = arith.mulf %419, %403 : vector<16x128xf32>
    %421 = arith.addf %418, %420 : vector<16x128xf32>
    %422 = arith.addf %421, %415 : vector<16x128xf32>
    %423 = arith.truncf %422 : vector<16x128xf32> to vector<16x128xbf16>
    %cst_123 = arith.constant dense<0.000000e+00> : vector<16x128xf32>
    %424 = tpu.matmul %423, %12, %cst_123 {dimension_numbers = #tpu.dot_dimension_numbers<[1], [0], [0], [1], [0, 0, 1, 1], [], []>} : vector<16x128xbf16>, vector<128x128xbf16>, vector<16x128xf32> -> vector<16x128xf32>
    %425 = vector.broadcast %cst_18 : f32 to vector<16x128xf32>
    %426 = arith.mulf %425, %424 : vector<16x128xf32>
    %427 = arith.addf %370, %426 : vector<16x128xf32>
    %428 = arith.addf %427, %22 : vector<16x128xf32>
    %c7_i32 = arith.constant 7 : i32
    %429 = arith.truncf %428 : vector<16x128xf32> to vector<16x128xbf16>
    %cst_124 = arith.constant dense<0.000000e+00> : vector<16x128xf32>
    %430 = tpu.matmul %429, %11, %cst_124 {dimension_numbers = #tpu.dot_dimension_numbers<[1], [0], [0], [1], [0, 0, 1, 1], [], []>} : vector<16x128xbf16>, vector<128x128xbf16>, vector<16x128xf32> -> vector<16x128xf32>
    %431 = arith.addf %430, %16 : vector<16x128xf32>
    %cst_125 = arith.constant 0.000000e+00 : f32
    %432 = vector.broadcast %cst_125 : f32 to vector<16x128xf32>
    %433 = arith.cmpf ogt, %431, %432 : vector<16x128xf32>
    %434 = math.exp %431 : vector<16x128xf32>
    %cst_126 = arith.constant 1.000000e+00 : f32
    %435 = vector.broadcast %cst_126 : f32 to vector<16x128xf32>
    %436 = arith.subf %434, %435 : vector<16x128xf32>
    %437 = arith.select %433, %431, %436 : vector<16x128xi1>, vector<16x128xf32>
    %438 = arith.truncf %437 : vector<16x128xf32> to vector<16x128xbf16>
    %cst_127 = arith.constant dense<0.000000e+00> : vector<16x128xf32>
    %439 = tpu.matmul %438, %13, %cst_127 {dimension_numbers = #tpu.dot_dimension_numbers<[1], [0], [0], [1], [0, 0, 1, 1], [], []>} : vector<16x128xbf16>, vector<128x128xbf16>, vector<16x128xf32> -> vector<16x128xf32>
    %440 = arith.addf %439, %18 : vector<16x128xf32>
    %441 = vector.broadcast %cst_16 : f32 to vector<16x128xf32>
    %442 = arith.mulf %441, %440 : vector<16x128xf32>
    %443 = arith.addf %431, %442 : vector<16x128xf32>
    %cst_128 = arith.constant 0.000000e+00 : f32
    %444 = vector.broadcast %cst_128 : f32 to vector<16x128xf32>
    %445 = arith.cmpf ogt, %443, %444 : vector<16x128xf32>
    %446 = math.exp %443 : vector<16x128xf32>
    %cst_129 = arith.constant 1.000000e+00 : f32
    %447 = vector.broadcast %cst_129 : f32 to vector<16x128xf32>
    %448 = arith.subf %446, %447 : vector<16x128xf32>
    %449 = arith.select %445, %443, %448 : vector<16x128xi1>, vector<16x128xf32>
    %450 = arith.truncf %449 : vector<16x128xf32> to vector<16x128xbf16>
    %cst_130 = arith.constant dense<0.000000e+00> : vector<16x128xf32>
    %451 = tpu.matmul %450, %13, %cst_130 {dimension_numbers = #tpu.dot_dimension_numbers<[1], [0], [0], [1], [0, 0, 1, 1], [], []>} : vector<16x128xbf16>, vector<128x128xbf16>, vector<16x128xf32> -> vector<16x128xf32>
    %452 = arith.addf %451, %18 : vector<16x128xf32>
    %453 = vector.broadcast %cst_16 : f32 to vector<16x128xf32>
    %454 = arith.mulf %453, %452 : vector<16x128xf32>
    %455 = arith.addf %431, %454 : vector<16x128xf32>
    %cst_131 = arith.constant 0.000000e+00 : f32
    %456 = vector.broadcast %cst_131 : f32 to vector<16x128xf32>
    %457 = arith.cmpf ogt, %455, %456 : vector<16x128xf32>
    %458 = math.exp %455 : vector<16x128xf32>
    %cst_132 = arith.constant 1.000000e+00 : f32
    %459 = vector.broadcast %cst_132 : f32 to vector<16x128xf32>
    %460 = arith.subf %458, %459 : vector<16x128xf32>
    %461 = arith.select %457, %455, %460 : vector<16x128xi1>, vector<16x128xf32>
    %462 = arith.truncf %461 : vector<16x128xf32> to vector<16x128xbf16>
    %cst_133 = arith.constant dense<0.000000e+00> : vector<16x128xf32>
    %463 = tpu.matmul %462, %13, %cst_133 {dimension_numbers = #tpu.dot_dimension_numbers<[1], [0], [0], [1], [0, 0, 1, 1], [], []>} : vector<16x128xbf16>, vector<128x128xbf16>, vector<16x128xf32> -> vector<16x128xf32>
    %464 = arith.addf %463, %18 : vector<16x128xf32>
    %465 = vector.broadcast %cst_17 : f32 to vector<16x128xf32>
    %466 = arith.mulf %465, %464 : vector<16x128xf32>
    %467 = arith.addf %431, %466 : vector<16x128xf32>
    %cst_134 = arith.constant 0.000000e+00 : f32
    %468 = vector.broadcast %cst_134 : f32 to vector<16x128xf32>
    %469 = arith.cmpf ogt, %467, %468 : vector<16x128xf32>
    %470 = math.exp %467 : vector<16x128xf32>
    %cst_135 = arith.constant 1.000000e+00 : f32
    %471 = vector.broadcast %cst_135 : f32 to vector<16x128xf32>
    %472 = arith.subf %470, %471 : vector<16x128xf32>
    %473 = arith.select %469, %467, %472 : vector<16x128xi1>, vector<16x128xf32>
    %cst_136 = arith.constant 2.000000e+00 : f32
    %474 = vector.broadcast %cst_136 : f32 to vector<16x128xf32>
    %475 = arith.mulf %474, %449 : vector<16x128xf32>
    %476 = arith.addf %437, %475 : vector<16x128xf32>
    %cst_137 = arith.constant 2.000000e+00 : f32
    %477 = vector.broadcast %cst_137 : f32 to vector<16x128xf32>
    %478 = arith.mulf %477, %461 : vector<16x128xf32>
    %479 = arith.addf %476, %478 : vector<16x128xf32>
    %480 = arith.addf %479, %473 : vector<16x128xf32>
    %481 = arith.truncf %480 : vector<16x128xf32> to vector<16x128xbf16>
    %cst_138 = arith.constant dense<0.000000e+00> : vector<16x128xf32>
    %482 = tpu.matmul %481, %12, %cst_138 {dimension_numbers = #tpu.dot_dimension_numbers<[1], [0], [0], [1], [0, 0, 1, 1], [], []>} : vector<16x128xbf16>, vector<128x128xbf16>, vector<16x128xf32> -> vector<16x128xf32>
    %483 = vector.broadcast %cst_18 : f32 to vector<16x128xf32>
    %484 = arith.mulf %483, %482 : vector<16x128xf32>
    %485 = arith.addf %428, %484 : vector<16x128xf32>
    %486 = arith.addf %485, %22 : vector<16x128xf32>
    %c0_139 = arith.constant 0 : index
    %c0_140 = arith.constant 0 : index
    %487 = vector.load %arg9[%c0_139, %c0_140] : memref<2x16xf32, #tpu.memory_space<vmem>>, vector<2x16xf32>
    %cst_141 = arith.constant dense<0.000000e+00> : vector<2x128xf32>
    %488 = tpu.matmul %487, %486, %cst_141 {dimension_numbers = #tpu.dot_dimension_numbers<[1], [0], [0], [1], [0, 0, 1, 1], [], []>} : vector<2x16xf32>, vector<16x128xf32>, vector<2x128xf32> -> vector<2x128xf32>
    %c0_142 = arith.constant 0 : index
    %c0_143 = arith.constant 0 : index
    %489 = vector.load %arg7[%c0_142, %c0_143] : memref<128x128xf32, #tpu.memory_space<vmem>>, vector<128x128xf32>
    %cst_144 = arith.constant dense<0.000000e+00> : vector<2x128xf32>
    %490 = tpu.matmul %488, %489, %cst_144 {dimension_numbers = #tpu.dot_dimension_numbers<[1], [0], [0], [1], [0, 0, 1, 1], [], []>} : vector<2x128xf32>, vector<128x128xf32>, vector<2x128xf32> -> vector<2x128xf32>
    %c0_145 = arith.constant 0 : index
    %c0_146 = arith.constant 0 : index
    %491 = vector.load %arg8[%c0_145, %c0_146] : memref<1x128xf32, #tpu.memory_space<vmem>>, vector<1x128xf32>
    %492 = vector.broadcast %491 : vector<1x128xf32> to vector<2x128xf32>
    %493 = arith.addf %490, %492 : vector<2x128xf32>
    %494 = tpu.iota {dimensions = array<i32: 1>} : vector<2x128xi32>
    %c2_i32_147 = arith.constant 2 : i32
    %495 = vector.broadcast %c2_i32_147 : i32 to vector<2x128xi32>
    %496 = arith.cmpi slt, %494, %495 : vector<2x128xi32>
    %cst_148 = arith.constant 0xFF800000 : f32
    %497 = vector.broadcast %cst_148 : f32 to vector<2x128xf32>
    %498 = arith.select %496, %493, %497 : vector<2x128xi1>, vector<2x128xf32>
    %cst_149 = arith.constant dense<0xFF800000> : vector<2xf32>
    %499 = vector.multi_reduction <maximumf>, %498, %cst_149 [1] : vector<2x128xf32> to vector<2xf32>
    %500 = vector.shape_cast %499 : vector<2xf32> to vector<2x1xf32>
    %501 = vector.broadcast %500 : vector<2x1xf32> to vector<2x128xf32>
    %502 = arith.subf %498, %501 : vector<2x128xf32>
    %503 = math.exp %502 : vector<2x128xf32>
    %cst_150 = arith.constant dense<0.000000e+00> : vector<2xf32>
    %504 = vector.multi_reduction <add>, %503, %cst_150 [1] : vector<2x128xf32> to vector<2xf32>
    %505 = vector.shape_cast %504 : vector<2xf32> to vector<2x1xf32>
    %506 = vector.broadcast %505 : vector<2x1xf32> to vector<2x128xf32>
    %507 = arith.divf %503, %506 : vector<2x128xf32>
    %c0_151 = arith.constant 0 : index
    %c0_152 = arith.constant 0 : index
    %508 = vector.load %arg10[%c0_151, %c0_152] : memref<2x128xf32, #tpu.memory_space<vmem>>, vector<2x128xf32>
    tpu.vector_store %arg10[%c0_151, %c0_152], %507 {strides = array<i32>} : memref<2x128xf32, #tpu.memory_space<vmem>>, vector<2x128xf32>,
    return
  }
}

</mosaic_0001>

<bundles_post_ra>
// kernel: tpu_custom_call.1
= control target key start
LH: loop header
LB: loop body
LE: loop exit
PB: predicated region body
PF: predicated region fallthrough
CT: control target
= control target key end

     0   :  { %15 = vsyncpa [#allocation3], 0  ;;  %s6019_s0 = inlined_call_operand.hbm [shape: f32[16,16], index: 0, kind: input, shape index: {}]   ;;  %s6020_s1 = inlined_call_operand.hbm [shape: f32[16,128], index: 1, kind: input, shape index: {}]   ;;  %s6021_s2 = inlined_call_operand.vmem [shape: f32[1,128], index: 2, kind: input, shape index: {}]   ;;  %s6022_s3 = inlined_call_operand.hbm [shape: f32[128,128], index: 3, kind: input, shape index: {}]   ;;  %s6023_s4 = inlined_call_operand.vmem [shape: f32[1,128], index: 4, kind: input, shape index: {}]   ;;  %s6024_s5 = inlined_call_operand.hbm [shape: f32[128,128], index: 5, kind: input, shape index: {}]   ;;  %s6025_s6 = inlined_call_operand.vmem [shape: f32[1,128], index: 6, kind: input, shape index: {}]   ;;  %s6026_s7 = inlined_call_operand.hbm [shape: f32[128,128], index: 7, kind: input, shape index: {}]   ;;  %s6027_s8 = inlined_call_operand.vmem [shape: f32[1,128], index: 8, kind: input, shape index: {}]   ;;  %s6028_s9 = inlined_call_operand.vmem [shape: f32[2,16], index: 9, kind: input, shape index: {}]   ;;  %s6029_s10 = inlined_call_operand.hbm [shape: f32[2,128], index: 10, kind: output, shape index: {}]  }
   0x1   :  { %16 = vsyncpa [#allocation6], 0 }
   0x2   :  { %17 = vsyncpa [#allocation9], 0 }
   0x3   :  { %18 = vsyncpa [#allocation4], 0  ;;  %s4628_s13 = smov [#allocation5]   ;;  %s4629_s15 = smov [#allocation8]  }
   0x4   :  { %s36_s14 = sshll.u32 %s4628_s13, 4  ;;  %s64_s16 = sshll.u32 %s4629_s15, 4  ;;  %s37_s14 = int_to_ptr.vmem [resolvable:$true] %s36_s14  ;;  %s65_s16 = int_to_ptr.vmem [resolvable:$true] %s64_s16 }
   0x5   :  { %s4508_s17 = scalar_lea.vmem %s37_s14, 256  ;;  %p4513_p1 = scmp.lt.s32.totalorder %s37_s14, %s37_s14 }
   0x6   :  { %p4509_p0 = scmp.ne.s32.totalorder %s37_s14, %s4508_s17  ;;  %p4514_p2 = scmp.lt.s32.totalorder %s4508_s17, %s4508_s17 }
   0x8   :  { %p4515_p3 = por %p4514_p2, %p4513_p1 }
   0xa   :  { %p4516_p4 = pnand %p4515_p3, %p4509_p0 }
   0xc   :  { %4519 = shalt.err (!%p4516_p4)
}
   0xd   :  { %s4630_s18 = smov 128   ;;  %s4631_s19 = smov 8  }
   0xe   :  { %42 = dma.hbm_to_vmem [thread:$0]  %s6020_s1, 256, %s37_s14, [#allocation6], %s4630_s18, %s4630_s18, %s4631_s19  }
   0xf   :  { %s4528_s22 = scalar_lea.vmem %s65_s16, 2048  ;;  %p4533_p6 = scmp.lt.s32.totalorder %s65_s16, %s65_s16 }
  0x10   :  { %p4529_p5 = scmp.ne.s32.totalorder %s65_s16, %s4528_s22  ;;  %p4534_p7 = scmp.lt.s32.totalorder %s4528_s22, %s4528_s22 }
  0x12   :  { %p4535_p8 = por %p4534_p7, %p4533_p6 }
  0x14   :  { %p4536_p9 = pnand %p4535_p8, %p4529_p5 }
  0x16   :  { %4539 = shalt.err (!%p4536_p9)
}
  0x17   :  { %70 = dma.hbm_to_vmem [thread:$0]  %s6024_s5, 2048, %s65_s16, [#allocation9], %s4630_s18, %s4630_s18, %s4631_s19  }
  0x18   :  { %s4632_s25 = smov [#allocation2]   ;;  %s4633_s27 = smov [#allocation7]  }
  0x19   :  { %s24_s26 = sshll.u32 %s4632_s25, 4  ;;  %s50_s28 = sshll.u32 %s4633_s27, 4  ;;  %s25_s26 = int_to_ptr.vmem [resolvable:$true] %s24_s26  ;;  %s51_s28 = int_to_ptr.vmem [resolvable:$true] %s50_s28 }
  0x1a   :  { %s4548_s1 = scalar_lea.vmem %s25_s26, 256  ;;  %p4553_p11 = scmp.lt.s32.totalorder %s25_s26, %s25_s26 }
  0x1b   :  { %p4549_p10 = scmp.ne.s32.totalorder %s25_s26, %s4548_s1  ;;  %p4554_p12 = scmp.lt.s32.totalorder %s4548_s1, %s4548_s1 }
  0x1d   :  { %p4555_p13 = por %p4554_p12, %p4553_p11 }
  0x1f   :  { %p4556_p0 = pnand %p4555_p13, %p4549_p10 }
  0x21   :  { %4559 = shalt.err (!%p4556_p0)
}
  0x22   :  { %30 = dma.hbm_to_vmem [thread:$0]  %s6019_s0, 256, %s25_s26, [#allocation3], %s4630_s18, %s4630_s18, %s4631_s19  }
  0x23   :  { %s4568_s5 = scalar_lea.vmem %s51_s28, 2048  ;;  %p4573_p2 = scmp.lt.s32.totalorder %s51_s28, %s51_s28 }
  0x24   :  { %p4569_p1 = scmp.ne.s32.totalorder %s51_s28, %s4568_s5  ;;  %p4574_p3 = scmp.lt.s32.totalorder %s4568_s5, %s4568_s5 }
  0x26   :  { %p4575_p4 = por %p4574_p3, %p4573_p2 }
  0x28   :  { %p4576_p5 = pnand %p4575_p4, %p4569_p1 }
  0x2a   :  { %4579 = shalt.err (!%p4576_p5)
}
  0x2b   :  { %56 = dma.hbm_to_vmem [thread:$0]  %s6022_s3, 2048, %s51_s28, [#allocation6], %s4630_s18, %s4630_s18, %s4631_s19  }
  0x2c   :  { %s4634_s13 = smov [#allocation10]  }
  0x2d   :  { %s78_s14 = sshll.u32 %s4634_s13, 4  ;;  %s79_s14 = int_to_ptr.vmem [resolvable:$true] %s78_s14 }
  0x2e   :  { %s4588_s15 = scalar_lea.vmem %s79_s14, 2048  ;;  %p4593_p7 = scmp.lt.s32.totalorder %s79_s14, %s79_s14 }
  0x2f   :  { %p4589_p6 = scmp.ne.s32.totalorder %s79_s14, %s4588_s15  ;;  %p4594_p8 = scmp.lt.s32.totalorder %s4588_s15, %s4588_s15 }
  0x31   :  { %p4595_p9 = por %p4594_p8, %p4593_p7 }
  0x33   :  { %p4596_p10 = pnand %p4595_p9, %p4589_p6 }
  0x35   :  { %4599 = shalt.err (!%p4596_p10)
}
  0x36   :  { %84 = dma.hbm_to_vmem [thread:$0]  %s6026_s7, 2048, %s79_s14, [#allocation9], %s4630_s18, %s4630_s18, %s4631_s19  }
  0x37   :  { %4620 = dma.done.wait [#allocation3], 256  }
  0x38   :  { %4621 = vsyncadd [#allocation3], 4294967040 }
  0x39   :  { %4622 = dma.done.wait [#allocation6], 2304  }
  0x3a   :  { %4623 = vsyncadd [#allocation6], 4294964992 }
  0x3b   :  { %4624 = dma.done.wait [#allocation9], 4096  }
  0x3c   :  { %4625 = vsyncadd [#allocation9], 4294963200  ;;  %v4635_v0 = vmov 0.0   ;;  %vm116_vm0 = vcmask 130048   ;;  %v108_v1 = vld [vmem:[#allocation5 + $0x8] sm:$0xff]  ;;  %v107_v2 = vld [vmem:[#allocation5] sm:$0xff] }
  0x3d   :  { %3479 = vmatprep.subr.mxu0 %v4635_v0  ;;  %v105_v3 = vld [vmem:[#allocation2] sm:$0xff]  ;;  %3416 = vmatprep.subr.mxu1 %v108_v1  ;;  %v4725_v4 = vld [vmem:[#allocation7 + $0x78] sm:$0xff]  ;;  %v106_v5 = vld [vmem:[#allocation2 + $0x8] sm:$0xff]  ;;  %vm4636_vm1 = vmmov 0  }
  0x3e   :  { %3420 = vmatprep.mubr.msk.f32.mxu1 %vm116_vm0, %v105_v3  ;;  %3417 = vmatpush3.msra.mxu1 %v108_v1  ;;  %v4728_v6 = vld [vmem:[#allocation7 + $0x70] sm:$0xff]  ;;  %v4735_v7 = vld [vmem:[#allocation7 + $0x68] sm:$0xff]  ;;  %v4737_v8 = vld [vmem:[#allocation7 + $0x60] sm:$0xff] }
  0x3f   :  { %3480 = vmatpush3.msra.mxu0 %v4725_v4  ;;  %3418 = vmatprep.subr.mxu1 %v107_v2  ;;  %v214_v9 = vld [vmem:[#allocation8] sm:$0xff]  ;;  %v4741_v10 = vld [vmem:[#allocation8 + $0x8] sm:$0xff]  ;;  %v4743_v11 = vld [vmem:[#allocation8 + $0x10] sm:$0xff]  ;;  %v4839_v45 = vpack.c.bf16 %v4725_v4, %v4728_v6  ;;  %v4846_v46 = vpack.c.bf16 %v4735_v7, %v4737_v8 }
  0x40   :  { %3481 = vmatprep.subr.mxu0 %v4635_v0  ;;  %3419 = vmatpush3.msra.mxu1 %v107_v2  ;;  %v4745_v12 = vld [vmem:[#allocation8 + $0x18] sm:$0xff]  ;;  %v4751_v14 = vpack.c.bf16 %v4741_v10, %v214_v9  ;;  %v4757_v16 = vld [vmem:[#allocation8 + $0x20] sm:$0xff]  ;;  %v4759_v17 = vld [vmem:[#allocation8 + $0x28] sm:$0xff] }
  0x41   :  { %3482 = vmatpush3.msra.mxu0 %v4728_v6  ;;  %3421 = vmatmul.mubr.msk.f32.vlgmr.msra.gmra.mxu1 %vm116_vm0, %v106_v5  ;;  %v4748_v13 = vld [vmem:[#allocation7 + $0x58] sm:$0xff]  ;;  %v4755_v15 = vpack.c.bf16 %v4745_v12, %v4743_v11  ;;  %v4761_v18 = vld [vmem:[#allocation8 + $0x30] sm:$0xff]  ;;  %v4767_v19 = vpack.c.bf16 %v4759_v17, %v4757_v16  ;;  %v4771_v21 = vld [vmem:[#allocation8 + $0x40] sm:$0xff] }
  0x42   :  { %3423 = vmatprep.subr.mxu1 %v4725_v4  ;;  %3483 = vmatprep.subr.mxu0 %v4635_v0  ;;  %v4769_v20 = vld [vmem:[#allocation8 + $0x38] sm:$0xff]  ;;  %v4773_v22 = vld [vmem:[#allocation8 + $0x48] sm:$0xff]  ;;  %v4785_v25 = vld [vmem:[#allocation8 + $0x50] sm:$0xff] }
  0x43   :  { %3424 = vmatpush3.msra.mxu1 %v4725_v4  ;;  %3455 = vmatprep.mubr.f32.mxu1 %v214_v9  ;;  %v4779_v23 = vpack.c.bf16 %v4769_v20, %v4761_v18  ;;  %v4783_v24 = vpack.c.bf16 %v4773_v22, %v4771_v21  ;;  %v4787_v26 = vld [vmem:[#allocation8 + $0x58] sm:$0xff]  ;;  %v4789_v27 = vld [vmem:[#allocation8 + $0x60] sm:$0xff]  ;;  %v4797_v29 = vld [vmem:[#allocation8 + $0x68] sm:$0xff] }
  0x44   :  { %3425 = vmatprep.subr.mxu1 %v4728_v6  ;;  %3484 = vmatpush3.msra.mxu0 %v4735_v7  ;;  %v4795_v28 = vpack.c.bf16 %v4787_v26, %v4785_v25  ;;  %v4799_v30 = vld [vmem:[#allocation8 + $0x70] sm:$0xff]  ;;  %v4801_v31 = vld [vmem:[#allocation8 + $0x78] sm:$0xff]  ;;  %v4809_v33 = vpack.c.bf16 %v4797_v29, %v4789_v27  ;;  %v4819_v35 = vld [vmem:[#allocation7 + $0x48] sm:$0xff] }
  0x45   :  { %3426 = vmatpush3.msra.mxu1 %v4728_v6  ;;  %3485 = vmatprep.subr.mxu0 %v4635_v0  ;;  %v4805_v32 = vld [vmem:[#allocation7 + $0x50] sm:$0xff]  ;;  %v4813_v34 = vpack.c.bf16 %v4801_v31, %v4799_v30  ;;  %v206_v36 = vld [vmem:[#allocation7 + $0x40] sm:$0xff]  ;;  %v205_v37 = vld [vmem:[#allocation7 + $0x38] sm:$0xff] }
  0x46   :  { %3427 = vmatprep.subr.mxu1 %v4735_v7  ;;  %3486 = vmatpush3.msra.mxu0 %v4737_v8  ;;  %v204_v38 = vld [vmem:[#allocation7 + $0x30] sm:$0xff]  ;;  %v203_v39 = vld [vmem:[#allocation7 + $0x28] sm:$0xff]  ;;  %v202_v40 = vld [vmem:[#allocation7 + $0x20] sm:$0xff]  ;;  %v4854_v47 = vpack.c.bf16 %v4748_v13, %v4805_v32  ;;  %v4861_v48 = vpack.c.bf16 %v4819_v35, %v206_v36 }
  0x47   :  { %3428 = vmatpush3.msra.mxu1 %v4735_v7  ;;  %3487 = vmatprep.subr.mxu0 %v4635_v0  ;;  %v201_v41 = vld [vmem:[#allocation7 + $0x18] sm:$0xff]  ;;  %v200_v42 = vld [vmem:[#allocation7 + $0x10] sm:$0xff]  ;;  %v199_v43 = vld [vmem:[#allocation7 + $0x8] sm:$0xff]  ;;  %v4867_v49 = vpack.c.bf16 %v205_v37, %v204_v38  ;;  %v4873_v50 = vpack.c.bf16 %v203_v39, %v202_v40 }
  0x48   :  { %3429 = vmatprep.subr.mxu1 %v4737_v8  ;;  %3488 = vmatpush3.msra.mxu0 %v4748_v13  ;;  %v198_v44 = vld [vmem:[#allocation7] sm:$0xff]  ;;  %v4879_v51 = vpack.c.bf16 %v201_v41, %v200_v42 }
  0x49   :  { %3430 = vmatpush3.msra.mxu1 %v4737_v8  ;;  %3489 = vmatprep.subr.mxu0 %v4635_v0  ;;  %v4885_v52 = vpack.c.bf16 %v199_v43, %v198_v44  ;;  %v4900_v53 = vld [vmem:[%s6025_s6] sm:$0x1] }
  0x4a   :  { %3431 = vmatprep.subr.mxu1 %v4748_v13  ;;  %3490 = vmatpush3.msra.mxu0 %v4805_v32  ;;  %v2913_v55 = vld [vmem:[%s6021_s2] ss:$0 sm:$0xff] }
  0x4b   :  { %3432 = vmatpush3.msra.mxu1 %v4748_v13  ;;  %3491 = vmatprep.subr.mxu0 %v4635_v0 }
  0x4c   :  { %3433 = vmatprep.subr.mxu1 %v4805_v32  ;;  %3492 = vmatpush3.msra.mxu0 %v4819_v35 }
  0x4d   :  { %3434 = vmatpush3.msra.mxu1 %v4805_v32  ;;  %3493 = vmatprep.subr.mxu0 %v4635_v0 }
  0x4e   :  { %3435 = vmatprep.subr.mxu1 %v4819_v35  ;;  %3494 = vmatpush3.msra.mxu0 %v206_v36 }
  0x4f   :  { %3436 = vmatpush3.msra.mxu1 %v4819_v35  ;;  %3495 = vmatprep.subr.mxu0 %v4635_v0 }
  0x50   :  { %3437 = vmatprep.subr.mxu1 %v206_v36  ;;  %3496 = vmatpush3.msra.mxu0 %v205_v37 }
  0x51   :  { %3438 = vmatpush3.msra.mxu1 %v206_v36  ;;  %3497 = vmatprep.subr.mxu0 %v4635_v0 }
  0x52   :  { %3439 = vmatprep.subr.mxu1 %v205_v37  ;;  %3498 = vmatpush3.msra.mxu0 %v204_v38 }
  0x53   :  { %3440 = vmatpush3.msra.mxu1 %v205_v37  ;;  %3499 = vmatprep.subr.mxu0 %v4635_v0 }
  0x54   :  { %3441 = vmatprep.subr.mxu1 %v204_v38  ;;  %3500 = vmatpush3.msra.mxu0 %v203_v39 }
  0x55   :  { %3442 = vmatpush3.msra.mxu1 %v204_v38  ;;  %3501 = vmatprep.subr.mxu0 %v4635_v0 }
  0x56   :  { %3443 = vmatprep.subr.mxu1 %v203_v39  ;;  %3502 = vmatpush3.msra.mxu0 %v202_v40 }
  0x57   :  { %3444 = vmatpush3.msra.mxu1 %v203_v39  ;;  %3503 = vmatprep.subr.mxu0 %v4635_v0 }
  0x58   :  { %3445 = vmatprep.subr.mxu1 %v202_v40  ;;  %3504 = vmatpush3.msra.mxu0 %v201_v41 }
  0x59   :  { %3446 = vmatpush3.msra.mxu1 %v202_v40  ;;  %3505 = vmatprep.subr.mxu0 %v4635_v0 }
  0x5a   :  { %3447 = vmatprep.subr.mxu1 %v201_v41  ;;  %3506 = vmatpush3.msra.mxu0 %v200_v42 }
  0x5b   :  { %3448 = vmatpush3.msra.mxu1 %v201_v41  ;;  %3507 = vmatprep.subr.mxu0 %v4635_v0 }
  0x5c   :  { %3449 = vmatprep.subr.mxu1 %v200_v42  ;;  %3508 = vmatpush3.msra.mxu0 %v199_v43 }
  0x5d   :  { %3450 = vmatpush3.msra.mxu1 %v200_v42  ;;  %3509 = vmatprep.subr.mxu0 %v4635_v0 }
  0x5e   :  { %3451 = vmatprep.subr.mxu1 %v199_v43  ;;  %3510 = vmatpush3.msra.mxu0 %v198_v44 }
  0x5f   :  { %3452 = vmatpush3.msra.mxu1 %v199_v43  ;;  %3534 = vmatprep.subr.bf16.mxu0 %v4635_v0 }
  0x60   :  { %3453 = vmatprep.subr.mxu1 %v198_v44  ;;  %3511 = vmatprep.mubr.msk.f32.mxu0 %vm4636_vm1, %v4635_v0 }
  0x61   :  { %3454 = vmatpush3.msra.mxu1 %v198_v44  ;;  %3512 = vmatmul.mubr.f32.vlgmr.msra.gmra.mxu0 %v4900_v53 }
  0x62   :  { %3456 = vmatmul.mubr.f32.vlgmr.msra.gmra.mxu1 %v4741_v10  ;;  %3514 = vmatprep.subr.bf16.mxu1 %v4635_v0 }
  0x63   :  { %3458 = vmatprep.mubr.f32.mxu1 %v4743_v11  ;;  %3515 = vmatpush3.bf16.msra.mxu1 %v4839_v45 }
  0x64   :  { %3516 = vmatprep.subr.bf16.mxu1 %v4635_v0  ;;  %3550 = vmatprep.mubr.msk.bf16.mxu0 %vm4636_vm1, %v4635_v0 }
  0x66   :  { %3459 = vmatmul.mubr.f32.gmra.mxu1 %v4745_v12 }
  0x67   :  { %3461 = vmatprep.mubr.f32.mxu1 %v4757_v16  ;;  %3517 = vmatpush3.bf16.msra.mxu1 %v4846_v46 }
  0x68   :  { %3518 = vmatprep.subr.bf16.mxu1 %v4635_v0 }
  0x6a   :  { %3462 = vmatmul.mubr.f32.gmra.mxu1 %v4759_v17 }
  0x6b   :  { %3464 = vmatprep.mubr.f32.mxu1 %v4761_v18  ;;  %3519 = vmatpush3.bf16.msra.mxu1 %v4854_v47 }
  0x6c   :  { %3520 = vmatprep.subr.bf16.mxu1 %v4635_v0 }
  0x6e   :  { %3465 = vmatmul.mubr.f32.gmra.mxu1 %v4769_v20 }
  0x6f   :  { %3467 = vmatprep.mubr.f32.mxu1 %v4771_v21  ;;  %3521 = vmatpush3.bf16.msra.mxu1 %v4861_v48 }
  0x70   :  { %3522 = vmatprep.subr.bf16.mxu1 %v4635_v0 }
  0x72   :  { %3468 = vmatmul.mubr.f32.gmra.mxu1 %v4773_v22 }
  0x73   :  { %3470 = vmatprep.mubr.f32.mxu1 %v4785_v25  ;;  %3523 = vmatpush3.bf16.msra.mxu1 %v4867_v49 }
  0x74   :  { %3524 = vmatprep.subr.bf16.mxu1 %v4635_v0 }
  0x76   :  { %3471 = vmatmul.mubr.f32.gmra.mxu1 %v4787_v26 }
  0x77   :  { %3473 = vmatprep.mubr.f32.mxu1 %v4789_v27  ;;  %3525 = vmatpush3.bf16.msra.mxu1 %v4873_v50 }
  0x78   :  { %3526 = vmatprep.subr.bf16.mxu1 %v4635_v0 }
  0x7a   :  { %3474 = vmatmul.mubr.f32.gmra.mxu1 %v4797_v29  ;;  %v4967_v29 = vld [vmem:[%s6023_s4] ss:$0 sm:$0xff] }
  0x7b   :  { %3476 = vmatprep.mubr.f32.mxu1 %v4799_v30  ;;  %3527 = vmatpush3.bf16.msra.mxu1 %v4879_v51 }
  0x7c   :  { %3528 = vmatprep.subr.bf16.mxu1 %v4635_v0 }
  0x7e   :  { %3477 = vmatmul.mubr.f32.gmra.mxu1 %v4801_v31 }
  0x7f   :  { %3529 = vmatpush3.bf16.msra.mxu1 %v4885_v52  ;;  %3530 = vmatprep.mubr.msk.bf16.mxu1 %vm4636_vm1, %v4635_v0 }
  0x80   :  { %3554 = vmatprep.subr.bf16.mxu1 %v4635_v0 }
 0x101   :  { %v3422_v54 = vpop.f32.mrf.mxu1 }
 0x102   :  { %v4908_v57 = vadd.f32 %v3422_v54, %v2913_v55 }
 0x103   :  { %v189_v56 = vpop.f32.mrf.mxu1 }
 0x104   :  { %v4910_v58 = vadd.f32 %v2913_v55, %v189_v56  ;;  %v477_v56 = vlaneseq }
 0x106   :  { %v488_v59 = vpack.c.bf16 %v4908_v57, %v4910_v58 }
 0x108   :  { %3531 = vmatmul.mubr.bf16.vlgmr.msra.gmra.mxu1 %v488_v59  ;;  %v5006_v59 = vshrl.u32 %v477_v56, 7 }
 0x109   :  { %3570 = vmatprep.mubr.msk.bf16.mxu1 %vm4636_vm1, %v4635_v0 }
 0x121   :  { %v442_v26 = vpop.f32.mrf.mxu0 }
 0x122   :  { %v3457_v60 = vpop.f32.mrf.mxu1 }
 0x123   :  { %v3513_v27 = vpop.f32.mrf.mxu0 }
 0x124   :  { %v297_v61 = vpop.f32.mrf.mxu1 }
 0x125   :  { %v4954_v25 = vpack.c.bf16 %v3457_v60, %v297_v61  ;;  %v479_v60 = vsub.s32 0, %v5006_v59 }
 0x126   :  { %v3460_v62 = vpop.f32.mrf.mxu1 }
 0x127   :  { %v5011_v61 = vrot.slane %v442_v26, %v479_v60 }
 0x128   :  { %v307_v63 = vpop.f32.mrf.mxu1 }
 0x129   :  { %v4948_v22 = vpack.c.bf16 %v3460_v62, %v307_v63 }
 0x12a   :  { %v3463_v1 = vpop.f32.mrf.mxu1 }
 0x12c   :  { %v317_v2 = vpop.f32.mrf.mxu1 }
 0x12d   :  { %v4942_v21 = vpack.c.bf16 %v3463_v1, %v317_v2 }
 0x12e   :  { %v3466_v3 = vpop.f32.mrf.mxu1 }
 0x130   :  { %v327_v4 = vpop.f32.mrf.mxu1 }
 0x131   :  { %v4936_v20 = vpack.c.bf16 %v3466_v3, %v327_v4 }
 0x132   :  { %v3469_v5 = vpop.f32.mrf.mxu1 }
 0x134   :  { %v337_v6 = vpop.f32.mrf.mxu1 }
 0x135   :  { %v4930_v18 = vpack.c.bf16 %v3469_v5, %v337_v6 }
 0x136   :  { %v3472_v7 = vpop.f32.mrf.mxu1 }
 0x138   :  { %v347_v8 = vpop.f32.mrf.mxu1 }
 0x139   :  { %v4924_v17 = vpack.c.bf16 %v3472_v7, %v347_v8 }
 0x13a   :  { %v3475_v9 = vpop.f32.mrf.mxu1 }
 0x13c   :  { %v357_v10 = vpop.f32.mrf.mxu1 }
 0x13d   :  { %v4918_v16 = vpack.c.bf16 %v3475_v9, %v357_v10 }
 0x13e   :  { %v3478_v11 = vpop.f32.mrf.mxu1 }
 0x140   :  { %v367_v12 = vpop.f32.mrf.mxu1 }
 0x141   :  { %v4916_v13 = vpack.c.bf16 %v3478_v11, %v367_v12 }
 0x143   :  { %3535 = vmatpush3.bf16.msra.mxu0 %v4916_v13  ;;  %3555 = vmatpush3.bf16.msra.mxu1 %v4916_v13 }
 0x144   :  { %3536 = vmatprep.subr.bf16.mxu0 %v4635_v0  ;;  %3556 = vmatprep.subr.bf16.mxu1 %v4635_v0 }
 0x147   :  { %3537 = vmatpush3.bf16.msra.mxu0 %v4918_v16  ;;  %3557 = vmatpush3.bf16.msra.mxu1 %v4918_v16 }
 0x148   :  { %3538 = vmatprep.subr.bf16.mxu0 %v4635_v0  ;;  %3558 = vmatprep.subr.bf16.mxu1 %v4635_v0 }
 0x14b   :  { %3539 = vmatpush3.bf16.msra.mxu0 %v4924_v17  ;;  %3559 = vmatpush3.bf16.msra.mxu1 %v4924_v17 }
 0x14c   :  { %3540 = vmatprep.subr.bf16.mxu0 %v4635_v0  ;;  %3560 = vmatprep.subr.bf16.mxu1 %v4635_v0 }
 0x14f   :  { %3541 = vmatpush3.bf16.msra.mxu0 %v4930_v18  ;;  %3561 = vmatpush3.bf16.msra.mxu1 %v4930_v18 }
 0x150   :  { %3542 = vmatprep.subr.bf16.mxu0 %v4635_v0  ;;  %3562 = vmatprep.subr.bf16.mxu1 %v4635_v0 }
 0x153   :  { %3543 = vmatpush3.bf16.msra.mxu0 %v4936_v20  ;;  %3563 = vmatpush3.bf16.msra.mxu1 %v4936_v20 }
 0x154   :  { %3544 = vmatprep.subr.bf16.mxu0 %v4635_v0  ;;  %3564 = vmatprep.subr.bf16.mxu1 %v4635_v0 }
 0x157   :  { %3545 = vmatpush3.bf16.msra.mxu0 %v4942_v21  ;;  %3565 = vmatpush3.bf16.msra.mxu1 %v4942_v21 }
 0x158   :  { %3546 = vmatprep.subr.bf16.mxu0 %v4635_v0  ;;  %3566 = vmatprep.subr.bf16.mxu1 %v4635_v0 }
 0x15b   :  { %3547 = vmatpush3.bf16.msra.mxu0 %v4948_v22  ;;  %3567 = vmatpush3.bf16.msra.mxu1 %v4948_v22 }
 0x15c   :  { %3548 = vmatprep.subr.bf16.mxu0 %v4635_v0  ;;  %3568 = vmatprep.subr.bf16.mxu1 %v4635_v0 }
 0x15f   :  { %3549 = vmatpush3.bf16.msra.mxu0 %v4954_v25  ;;  %3569 = vmatpush3.bf16.msra.mxu1 %v4954_v25 }
 0x160   :  { %3574 = vmatprep.subr.bf16.mxu0 %v4635_v0  ;;  %3594 = vmatprep.subr.bf16.mxu1 %v4635_v0 }
 0x1c8   :  { %v523_v30 = vpop.f32.mrf.mxu1 }
 0x1c9   :  { %v4970_v31 = vadd.f32 %v4967_v29, %v523_v30 }
 0x1ca   :  { %v3532_v32 = vpop.f32.mrf.mxu1 }
 0x1cb   :  { %v532_v35 = vmul.f32 1.442695, %v4970_v31  ;;  %vm530_vm2 = vcmp.gt.f32.partialorder %v4970_v31, 0.0 }
 0x1cc   :  { %v526_v36 = vpop.f32.mrf.mxu1 }
 0x1cd   :  { %v4974_v37 = vadd.f32 %v4967_v29, %v526_v36  ;;  %4366 = vpow2.f32 %v532_v35 }
 0x1ce   :  { %v3533_v38 = vpop.f32.mrf.mxu1 }
 0x1cf   :  { %v534_v39 = vmul.f32 1.442695, %v4974_v37  ;;  %vm531_vm3 = vcmp.gt.f32.partialorder %v4974_v37, 0.0 }
 0x1d1   :  { %4368 = vpow2.f32 %v534_v39 }
 0x1da   :  { %v4367_v40 = vpop.eup %4366 }
 0x1db   :  { %v2917_v41 = vadd.f32 -1.0, %v4367_v40 }
 0x1dd   :  { %v4980_v44 = vsel %vm530_vm2, %v4970_v31, %v2917_v41 }
 0x1de   :  { %v4369_v42 = vpop.eup %4368 }
 0x1df   :  { %v2918_v43 = vadd.f32 -1.0, %v4369_v42 }
 0x1e1   :  { %v4983_v54 = vsel %vm531_vm3, %v4974_v37, %v2918_v43 }
 0x1e2   :  { %v540_v55 = vpack.c.bf16 %v4983_v54, %v4980_v44 }
 0x1e4   :  { %3551 = vmatmul.mubr.bf16.vlgmr.msra.gmra.mxu0 %v540_v55 }
 0x1e5   :  { %3575 = vmatpush3.bf16.msra.mxu0 %v4916_v13  ;;  %3590 = vmatprep.mubr.msk.bf16.mxu0 %vm4636_vm1, %v4635_v0 }
 0x1e6   :  { %3576 = vmatprep.subr.bf16.mxu0 %v4635_v0 }
 0x1e9   :  { %3577 = vmatpush3.bf16.msra.mxu0 %v4918_v16 }
 0x1ea   :  { %3578 = vmatprep.subr.bf16.mxu0 %v4635_v0 }
 0x1ed   :  { %3579 = vmatpush3.bf16.msra.mxu0 %v4924_v17 }
 0x1ee   :  { %3580 = vmatprep.subr.bf16.mxu0 %v4635_v0 }
 0x1f1   :  { %3581 = vmatpush3.bf16.msra.mxu0 %v4930_v18 }
 0x1f2   :  { %3582 = vmatprep.subr.bf16.mxu0 %v4635_v0 }
 0x1f5   :  { %3583 = vmatpush3.bf16.msra.mxu0 %v4936_v20 }
 0x1f6   :  { %3584 = vmatprep.subr.bf16.mxu0 %v4635_v0 }
 0x1f9   :  { %3585 = vmatpush3.bf16.msra.mxu0 %v4942_v21 }
 0x1fa   :  { %3586 = vmatprep.subr.bf16.mxu0 %v4635_v0 }
 0x1fd   :  { %3587 = vmatpush3.bf16.msra.mxu0 %v4948_v22 }
 0x1fe   :  { %3588 = vmatprep.subr.bf16.mxu0 %v4635_v0 }
 0x201   :  { %3589 = vmatpush3.bf16.msra.mxu0 %v4954_v25 }
 0x202   :  { %3614 = vmatprep.subr.bf16.mxu0 %v4635_v0 }
 0x2a4   :  { %v575_v62 = vpop.f32.mrf.mxu0 }
 0x2a5   :  { %v576_v63 = vadd.f32 %v575_v62, %v5011_v61 }
 0x2a6   :  { %v3552_v1 = vpop.f32.mrf.mxu0 }
 0x2a7   :  { %v582_v2 = vmul.f32 0.0625, %v576_v63 }
 0x2a8   :  { %v578_v3 = vpop.f32.mrf.mxu0 }
 0x2a9   :  { %v584_v4 = vadd.f32 %v582_v2, %v4970_v31  ;;  %v579_v5 = vadd.f32 %v578_v3, %v5011_v61 }
 0x2aa   :  { %v3553_v6 = vpop.f32.mrf.mxu0 }
 0x2ab   :  { %v588_v7 = vmul.f32 1.442695, %v584_v4  ;;  %v583_v8 = vmul.f32 0.0625, %v579_v5  ;;  %vm586_vm4 = vcmp.gt.f32.partialorder %v584_v4, 0.0 }
 0x2ad   :  { %4370 = vpow2.f32 %v588_v7  ;;  %v585_v9 = vadd.f32 %v583_v8, %v4974_v37 }
 0x2af   :  { %v590_v10 = vmul.f32 1.442695, %v585_v9  ;;  %vm587_vm5 = vcmp.gt.f32.partialorder %v585_v9, 0.0 }
 0x2b1   :  { %4372 = vpow2.f32 %v590_v10 }
 0x2ba   :  { %v4371_v11 = vpop.eup %4370 }
 0x2bb   :  { %v2919_v12 = vadd.f32 -1.0, %v4371_v11 }
 0x2bd   :  { %v594_v30 = vsel %vm586_vm4, %v584_v4, %v2919_v12 }
 0x2be   :  { %v4373_v26 = vpop.eup %4372  ;;  %v708_v4 = vmul.f32 2.0, %v594_v30 }
 0x2bf   :  { %v2920_v27 = vadd.f32 -1.0, %v4373_v26 }
 0x2c0   :  { %v710_v8 = vadd.f32 %v708_v4, %v4980_v44 }
 0x2c1   :  { %v595_v32 = vsel %vm587_vm5, %v585_v9, %v2920_v27 }
 0x2c2   :  { %v596_v35 = vpack.c.bf16 %v595_v32, %v594_v30  ;;  %v709_v9 = vmul.f32 2.0, %v595_v32 }
 0x2c4   :  { %3571 = vmatmul.mubr.bf16.vlgmr.msra.gmra.mxu1 %v596_v35  ;;  %v711_v27 = vadd.f32 %v709_v9, %v4983_v54  ;;  %v485_v9 = vrot.slane %v4900_v53, %v479_v60 }
 0x2c5   :  { %3595 = vmatpush3.bf16.msra.mxu1 %v4813_v34  ;;  %3610 = vmatprep.mubr.msk.bf16.mxu1 %vm4636_vm1, %v4635_v0 }
 0x2c6   :  { %3596 = vmatprep.subr.bf16.mxu1 %v4635_v0 }
 0x2c9   :  { %3597 = vmatpush3.bf16.msra.mxu1 %v4809_v33 }
 0x2ca   :  { %3598 = vmatprep.subr.bf16.mxu1 %v4635_v0 }
 0x2cd   :  { %3599 = vmatpush3.bf16.msra.mxu1 %v4795_v28 }
 0x2ce   :  { %3600 = vmatprep.subr.bf16.mxu1 %v4635_v0 }
 0x2d1   :  { %3601 = vmatpush3.bf16.msra.mxu1 %v4783_v24 }
 0x2d2   :  { %3602 = vmatprep.subr.bf16.mxu1 %v4635_v0 }
 0x2d5   :  { %3603 = vmatpush3.bf16.msra.mxu1 %v4779_v23 }
 0x2d6   :  { %3604 = vmatprep.subr.bf16.mxu1 %v4635_v0 }
 0x2d9   :  { %3605 = vmatpush3.bf16.msra.mxu1 %v4767_v19 }
 0x2da   :  { %3606 = vmatprep.subr.bf16.mxu1 %v4635_v0 }
 0x2dd   :  { %3607 = vmatpush3.bf16.msra.mxu1 %v4755_v15 }
 0x2de   :  { %3608 = vmatprep.subr.bf16.mxu1 %v4635_v0 }
 0x2e1   :  { %3609 = vmatpush3.bf16.msra.mxu1 %v4751_v14 }
 0x2e2   :  { %3634 = vmatprep.subr.bf16.mxu1 %v4635_v0 }
 0x384   :  { %v631_v36 = vpop.f32.mrf.mxu1 }
 0x385   :  { %v632_v38 = vadd.f32 %v631_v36, %v5011_v61 }
 0x386   :  { %v3572_v39 = vpop.f32.mrf.mxu1 }
 0x387   :  { %v638_v40 = vmul.f32 0.0625, %v632_v38 }
 0x388   :  { %v634_v41 = vpop.f32.mrf.mxu1 }
 0x389   :  { %v640_v42 = vadd.f32 %v638_v40, %v4970_v31  ;;  %v635_v43 = vadd.f32 %v634_v41, %v5011_v61 }
 0x38a   :  { %v3573_v55 = vpop.f32.mrf.mxu1 }
 0x38b   :  { %v644_v62 = vmul.f32 1.442695, %v640_v42  ;;  %v639_v63 = vmul.f32 0.0625, %v635_v43  ;;  %vm642_vm6 = vcmp.gt.f32.partialorder %v640_v42, 0.0 }
 0x38d   :  { %4374 = vpow2.f32 %v644_v62  ;;  %v641_v1 = vadd.f32 %v639_v63, %v4974_v37 }
 0x38f   :  { %v646_v2 = vmul.f32 1.442695, %v641_v1  ;;  %vm643_vm7 = vcmp.gt.f32.partialorder %v641_v1, 0.0 }
 0x391   :  { %4376 = vpow2.f32 %v646_v2 }
 0x39a   :  { %v4375_v3 = vpop.eup %4374 }
 0x39b   :  { %v2921_v5 = vadd.f32 -1.0, %v4375_v3 }
 0x39d   :  { %v650_v6 = vsel %vm642_vm6, %v640_v42, %v2921_v5 }
 0x39e   :  { %v4377_v7 = vpop.eup %4376  ;;  %v712_v10 = vmul.f32 2.0, %v650_v6 }
 0x39f   :  { %v2922_v11 = vadd.f32 -1.0, %v4377_v7 }
 0x3a0   :  { %v714_v12 = vadd.f32 %v712_v10, %v710_v8 }
 0x3a1   :  { %v651_v26 = vsel %vm643_vm7, %v641_v1, %v2922_v11 }
 0x3a2   :  { %v713_v35 = vmul.f32 2.0, %v651_v26  ;;  %v652_v36 = vpack.c.bf16 %v651_v26, %v650_v6  ;;  %v5084_v26 = vmul.f32 0.125, %v485_v9 }
 0x3a4   :  { %3591 = vmatmul.mubr.bf16.vlgmr.msra.gmra.mxu0 %v652_v36  ;;  %v715_v38 = vadd.f32 %v713_v35, %v711_v27 }
 0x3a5   :  { %3615 = vmatpush3.bf16.msra.mxu0 %v4839_v45  ;;  %3630 = vmatprep.mubr.msk.bf16.mxu0 %vm4636_vm1, %v4635_v0 }
 0x3a6   :  { %3616 = vmatprep.subr.bf16.mxu0 %v4635_v0 }
 0x3a9   :  { %3617 = vmatpush3.bf16.msra.mxu0 %v4846_v46 }
 0x3aa   :  { %3618 = vmatprep.subr.bf16.mxu0 %v4635_v0 }
 0x3ad   :  { %3619 = vmatpush3.bf16.msra.mxu0 %v4854_v47 }
 0x3ae   :  { %3620 = vmatprep.subr.bf16.mxu0 %v4635_v0 }
 0x3b1   :  { %3621 = vmatpush3.bf16.msra.mxu0 %v4861_v48 }
 0x3b2   :  { %3622 = vmatprep.subr.bf16.mxu0 %v4635_v0 }
 0x3b5   :  { %3623 = vmatpush3.bf16.msra.mxu0 %v4867_v49 }
 0x3b6   :  { %3624 = vmatprep.subr.bf16.mxu0 %v4635_v0 }
 0x3b9   :  { %3625 = vmatpush3.bf16.msra.mxu0 %v4873_v50 }
 0x3ba   :  { %3626 = vmatprep.subr.bf16.mxu0 %v4635_v0 }
 0x3bd   :  { %3627 = vmatpush3.bf16.msra.mxu0 %v4879_v51 }
 0x3be   :  { %3628 = vmatprep.subr.bf16.mxu0 %v4635_v0 }
 0x3c1   :  { %3629 = vmatpush3.bf16.msra.mxu0 %v4885_v52 }
 0x3c2   :  { %3654 = vmatprep.subr.bf16.mxu0 %v4635_v0 }
 0x464   :  { %v687_v44 = vpop.f32.mrf.mxu0 }
 0x465   :  { %v688_v54 = vadd.f32 %v687_v44, %v5011_v61 }
 0x466   :  { %v3592_v30 = vpop.f32.mrf.mxu0 }
 0x467   :  { %v694_v32 = vmul.f32 0.125, %v688_v54 }
 0x468   :  { %v690_v39 = vpop.f32.mrf.mxu0 }
 0x469   :  { %v696_v40 = vadd.f32 %v694_v32, %v4970_v31  ;;  %v691_v41 = vadd.f32 %v690_v39, %v5011_v61 }
 0x46a   :  { %v3593_v42 = vpop.f32.mrf.mxu0 }
 0x46b   :  { %v700_v43 = vmul.f32 1.442695, %v696_v40  ;;  %v695_v55 = vmul.f32 0.125, %v691_v41  ;;  %vm698_vm8 = vcmp.gt.f32.partialorder %v696_v40, 0.0 }
 0x46d   :  { %4378 = vpow2.f32 %v700_v43  ;;  %v697_v62 = vadd.f32 %v695_v55, %v4974_v37 }
 0x46f   :  { %v702_v63 = vmul.f32 1.442695, %v697_v62  ;;  %vm699_vm9 = vcmp.gt.f32.partialorder %v697_v62, 0.0 }
 0x471   :  { %4380 = vpow2.f32 %v702_v63 }
 0x47a   :  { %v4379_v1 = vpop.eup %4378 }
 0x47b   :  { %v2923_v2 = vadd.f32 -1.0, %v4379_v1 }
 0x47d   :  { %v706_v4 = vsel %vm698_vm8, %v696_v40, %v2923_v2 }
 0x47e   :  { %v4381_v3 = vpop.eup %4380  ;;  %v716_v7 = vadd.f32 %v714_v12, %v706_v4 }
 0x47f   :  { %v2924_v5 = vadd.f32 -1.0, %v4381_v3 }
 0x481   :  { %v707_v6 = vsel %vm699_vm9, %v697_v62, %v2924_v5 }
 0x482   :  { %v717_v31 = vadd.f32 %v715_v38, %v707_v6 }
 0x484   :  { %v718_v8 = vpack.c.bf16 %v717_v31, %v716_v7 }
 0x486   :  { %3611 = vmatmul.mubr.bf16.vlgmr.msra.gmra.mxu1 %v718_v8 }
 0x487   :  { %3635 = vmatpush3.bf16.msra.mxu1 %v4916_v13  ;;  %3650 = vmatprep.mubr.msk.bf16.mxu1 %vm4636_vm1, %v4635_v0 }
 0x488   :  { %3636 = vmatprep.subr.bf16.mxu1 %v4635_v0 }
 0x48b   :  { %3637 = vmatpush3.bf16.msra.mxu1 %v4918_v16 }
 0x48c   :  { %3638 = vmatprep.subr.bf16.mxu1 %v4635_v0 }
 0x48f   :  { %3639 = vmatpush3.bf16.msra.mxu1 %v4924_v17 }
 0x490   :  { %3640 = vmatprep.subr.bf16.mxu1 %v4635_v0 }
 0x493   :  { %3641 = vmatpush3.bf16.msra.mxu1 %v4930_v18 }
 0x494   :  { %3642 = vmatprep.subr.bf16.mxu1 %v4635_v0 }
 0x497   :  { %3643 = vmatpush3.bf16.msra.mxu1 %v4936_v20 }
 0x498   :  { %3644 = vmatprep.subr.bf16.mxu1 %v4635_v0 }
 0x49b   :  { %3645 = vmatpush3.bf16.msra.mxu1 %v4942_v21 }
 0x49c   :  { %3646 = vmatprep.subr.bf16.mxu1 %v4635_v0 }
 0x49f   :  { %3647 = vmatpush3.bf16.msra.mxu1 %v4948_v22 }
 0x4a0   :  { %3648 = vmatprep.subr.bf16.mxu1 %v4635_v0 }
 0x4a3   :  { %3649 = vmatpush3.bf16.msra.mxu1 %v4954_v25 }
 0x4a4   :  { %3674 = vmatprep.subr.bf16.mxu1 %v4635_v0 }
 0x546   :  { %v753_v37 = vpop.f32.mrf.mxu1 }
 0x547   :  { %v760_v10 = vmul.f32 0.020833334, %v753_v37 }
 0x548   :  { %v3612_v11 = vpop.f32.mrf.mxu1 }
 0x549   :  { %v762_v27 = vadd.f32 %v760_v10, %v4910_v58 }
 0x54a   :  { %v756_v12 = vpop.f32.mrf.mxu1 }
 0x54b   :  { %v761_v35 = vmul.f32 0.020833334, %v756_v12  ;;  %v5089_v44 = vadd.f32 %v762_v27, %v5084_v26 }
 0x54c   :  { %v3613_v36 = vpop.f32.mrf.mxu1 }
 0x54d   :  { %v763_v38 = vadd.f32 %v761_v35, %v4908_v57 }
 0x54f   :  { %v5092_v54 = vadd.f32 %v763_v38, %v5084_v26 }
 0x551   :  { %v766_v53 = vpack.c.bf16 %v5092_v54, %v5089_v44 }
 0x553   :  { %3631 = vmatmul.mubr.bf16.vlgmr.msra.gmra.mxu0 %v766_v53 }
 0x554   :  { %3655 = vmatpush3.bf16.msra.mxu0 %v4916_v13  ;;  %3670 = vmatprep.mubr.msk.bf16.mxu0 %vm4636_vm1, %v4635_v0 }
 0x555   :  { %3656 = vmatprep.subr.bf16.mxu0 %v4635_v0 }
 0x558   :  { %3657 = vmatpush3.bf16.msra.mxu0 %v4918_v16 }
 0x559   :  { %3658 = vmatprep.subr.bf16.mxu0 %v4635_v0 }
 0x55c   :  { %3659 = vmatpush3.bf16.msra.mxu0 %v4924_v17 }
 0x55d   :  { %3660 = vmatprep.subr.bf16.mxu0 %v4635_v0 }
 0x560   :  { %3661 = vmatpush3.bf16.msra.mxu0 %v4930_v18 }
 0x561   :  { %3662 = vmatprep.subr.bf16.mxu0 %v4635_v0 }
 0x564   :  { %3663 = vmatpush3.bf16.msra.mxu0 %v4936_v20 }
 0x565   :  { %3664 = vmatprep.subr.bf16.mxu0 %v4635_v0 }
 0x568   :  { %3665 = vmatpush3.bf16.msra.mxu0 %v4942_v21 }
 0x569   :  { %3666 = vmatprep.subr.bf16.mxu0 %v4635_v0 }
 0x56c   :  { %3667 = vmatpush3.bf16.msra.mxu0 %v4948_v22 }
 0x56d   :  { %3668 = vmatprep.subr.bf16.mxu0 %v4635_v0 }
 0x570   :  { %3669 = vmatpush3.bf16.msra.mxu0 %v4954_v25 }
 0x571   :  { %3694 = vmatprep.subr.bf16.mxu0 %v4635_v0 }
 0x613   :  { %v801_v57 = vpop.f32.mrf.mxu0 }
 0x614   :  { %v5115_v58 = vadd.f32 %v4967_v29, %v801_v57 }
 0x615   :  { %v3632_v59 = vpop.f32.mrf.mxu0 }
 0x616   :  { %v810_v60 = vmul.f32 1.442695, %v5115_v58  ;;  %vm808_vm10 = vcmp.gt.f32.partialorder %v5115_v58, 0.0 }
 0x617   :  { %v804_v30 = vpop.f32.mrf.mxu0 }
 0x618   :  { %v5119_v32 = vadd.f32 %v4967_v29, %v804_v30  ;;  %4382 = vpow2.f32 %v810_v60 }
 0x619   :  { %v3633_v39 = vpop.f32.mrf.mxu0 }
 0x61a   :  { %v812_v40 = vmul.f32 1.442695, %v5119_v32  ;;  %vm809_vm11 = vcmp.gt.f32.partialorder %v5119_v32, 0.0 }
 0x61c   :  { %4384 = vpow2.f32 %v812_v40 }
 0x625   :  { %v4383_v41 = vpop.eup %4382 }
 0x626   :  { %v2925_v42 = vadd.f32 -1.0, %v4383_v41 }
 0x628   :  { %v5125_v62 = vsel %vm808_vm10, %v5115_v58, %v2925_v42 }
 0x629   :  { %v4385_v43 = vpop.eup %4384 }
 0x62a   :  { %v2926_v55 = vadd.f32 -1.0, %v4385_v43 }
 0x62c   :  { %v5128_v63 = vsel %vm809_vm11, %v5119_v32, %v2926_v55 }
 0x62d   :  { %v818_v1 = vpack.c.bf16 %v5128_v63, %v5125_v62 }
 0x62f   :  { %3651 = vmatmul.mubr.bf16.vlgmr.msra.gmra.mxu1 %v818_v1 }
 0x630   :  { %3675 = vmatpush3.bf16.msra.mxu1 %v4916_v13  ;;  %3690 = vmatprep.mubr.msk.bf16.mxu1 %vm4636_vm1, %v4635_v0 }
 0x631   :  { %3676 = vmatprep.subr.bf16.mxu1 %v4635_v0 }
 0x634   :  { %3677 = vmatpush3.bf16.msra.mxu1 %v4918_v16 }
 0x635   :  { %3678 = vmatprep.subr.bf16.mxu1 %v4635_v0 }
 0x638   :  { %3679 = vmatpush3.bf16.msra.mxu1 %v4924_v17 }
 0x639   :  { %3680 = vmatprep.subr.bf16.mxu1 %v4635_v0 }
 0x63c   :  { %3681 = vmatpush3.bf16.msra.mxu1 %v4930_v18 }
 0x63d   :  { %3682 = vmatprep.subr.bf16.mxu1 %v4635_v0 }
 0x640   :  { %3683 = vmatpush3.bf16.msra.mxu1 %v4936_v20 }
 0x641   :  { %3684 = vmatprep.subr.bf16.mxu1 %v4635_v0 }
 0x644   :  { %3685 = vmatpush3.bf16.msra.mxu1 %v4942_v21 }
 0x645   :  { %3686 = vmatprep.subr.bf16.mxu1 %v4635_v0 }
 0x648   :  { %3687 = vmatpush3.bf16.msra.mxu1 %v4948_v22 }
 0x649   :  { %3688 = vmatprep.subr.bf16.mxu1 %v4635_v0 }
 0x64c   :  { %3689 = vmatpush3.bf16.msra.mxu1 %v4954_v25 }
 0x64d   :  { %3714 = vmatprep.subr.bf16.mxu1 %v4635_v0 }
 0x6ef   :  { %v853_v2 = vpop.f32.mrf.mxu1 }
 0x6f0   :  { %v854_v3 = vadd.f32 %v853_v2, %v5011_v61 }
 0x6f1   :  { %v3652_v4 = vpop.f32.mrf.mxu1 }
 0x6f2   :  { %v860_v5 = vmul.f32 0.0625, %v854_v3 }
 0x6f3   :  { %v856_v6 = vpop.f32.mrf.mxu1 }
 0x6f4   :  { %v862_v7 = vadd.f32 %v860_v5, %v5115_v58  ;;  %v857_v31 = vadd.f32 %v856_v6, %v5011_v61 }
 0x6f5   :  { %v3653_v8 = vpop.f32.mrf.mxu1 }
 0x6f6   :  { %v866_v37 = vmul.f32 1.442695, %v862_v7  ;;  %v861_v9 = vmul.f32 0.0625, %v857_v31  ;;  %vm864_vm12 = vcmp.gt.f32.partialorder %v862_v7, 0.0 }
 0x6f8   :  { %4386 = vpow2.f32 %v866_v37  ;;  %v863_v10 = vadd.f32 %v861_v9, %v5119_v32 }
 0x6fa   :  { %v868_v11 = vmul.f32 1.442695, %v863_v10  ;;  %vm865_vm13 = vcmp.gt.f32.partialorder %v863_v10, 0.0 }
 0x6fc   :  { %4388 = vpow2.f32 %v868_v11 }
 0x705   :  { %v4387_v12 = vpop.eup %4386 }
 0x706   :  { %v2927_v27 = vadd.f32 -1.0, %v4387_v12 }
 0x708   :  { %v872_v38 = vsel %vm864_vm12, %v862_v7, %v2927_v27 }
 0x709   :  { %v4389_v35 = vpop.eup %4388  ;;  %v986_v5 = vmul.f32 2.0, %v872_v38 }
 0x70a   :  { %v2928_v36 = vadd.f32 -1.0, %v4389_v35 }
 0x70b   :  { %v988_v8 = vadd.f32 %v986_v5, %v5125_v62 }
 0x70c   :  { %v873_v53 = vsel %vm865_vm13, %v863_v10, %v2928_v36 }
 0x70d   :  { %v874_v57 = vpack.c.bf16 %v873_v53, %v872_v38  ;;  %v987_v37 = vmul.f32 2.0, %v873_v53 }
 0x70f   :  { %3671 = vmatmul.mubr.bf16.vlgmr.msra.gmra.mxu0 %v874_v57  ;;  %v989_v27 = vadd.f32 %v987_v37, %v5128_v63 }
 0x710   :  { %3695 = vmatpush3.bf16.msra.mxu0 %v4813_v34  ;;  %3710 = vmatprep.mubr.msk.bf16.mxu0 %vm4636_vm1, %v4635_v0 }
 0x711   :  { %3696 = vmatprep.subr.bf16.mxu0 %v4635_v0 }
 0x714   :  { %3697 = vmatpush3.bf16.msra.mxu0 %v4809_v33 }
 0x715   :  { %3698 = vmatprep.subr.bf16.mxu0 %v4635_v0 }
 0x718   :  { %3699 = vmatpush3.bf16.msra.mxu0 %v4795_v28 }
 0x719   :  { %3700 = vmatprep.subr.bf16.mxu0 %v4635_v0 }
 0x71c   :  { %3701 = vmatpush3.bf16.msra.mxu0 %v4783_v24 }
 0x71d   :  { %3702 = vmatprep.subr.bf16.mxu0 %v4635_v0 }
 0x720   :  { %3703 = vmatpush3.bf16.msra.mxu0 %v4779_v23 }
 0x721   :  { %3704 = vmatprep.subr.bf16.mxu0 %v4635_v0 }
 0x724   :  { %3705 = vmatpush3.bf16.msra.mxu0 %v4767_v19 }
 0x725   :  { %3706 = vmatprep.subr.bf16.mxu0 %v4635_v0 }
 0x728   :  { %3707 = vmatpush3.bf16.msra.mxu0 %v4755_v15 }
 0x729   :  { %3708 = vmatprep.subr.bf16.mxu0 %v4635_v0 }
 0x72c   :  { %3709 = vmatpush3.bf16.msra.mxu0 %v4751_v14 }
 0x72d   :  { %3734 = vmatprep.subr.bf16.mxu0 %v4635_v0 }
 0x7cf   :  { %v909_v59 = vpop.f32.mrf.mxu0 }
 0x7d0   :  { %v910_v60 = vadd.f32 %v909_v59, %v5011_v61 }
 0x7d1   :  { %v3672_v30 = vpop.f32.mrf.mxu0 }
 0x7d2   :  { %v916_v39 = vmul.f32 0.0625, %v910_v60 }
 0x7d3   :  { %v912_v40 = vpop.f32.mrf.mxu0 }
 0x7d4   :  { %v918_v41 = vadd.f32 %v916_v39, %v5115_v58  ;;  %v913_v42 = vadd.f32 %v912_v40, %v5011_v61 }
 0x7d5   :  { %v3673_v43 = vpop.f32.mrf.mxu0 }
 0x7d6   :  { %v922_v55 = vmul.f32 1.442695, %v918_v41  ;;  %v917_v1 = vmul.f32 0.0625, %v913_v42  ;;  %vm920_vm14 = vcmp.gt.f32.partialorder %v918_v41, 0.0 }
 0x7d8   :  { %4390 = vpow2.f32 %v922_v55  ;;  %v919_v2 = vadd.f32 %v917_v1, %v5119_v32 }
 0x7da   :  { %v924_v3 = vmul.f32 1.442695, %v919_v2  ;;  %vm921_vm15 = vcmp.gt.f32.partialorder %v919_v2, 0.0 }
 0x7dc   :  { %4392 = vpow2.f32 %v924_v3 }
 0x7e5   :  { %v4391_v4 = vpop.eup %4390 }
 0x7e6   :  { %v2929_v6 = vadd.f32 -1.0, %v4391_v4 }
 0x7e8   :  { %v928_v7 = vsel %vm920_vm14, %v918_v41, %v2929_v6 }
 0x7e9   :  { %v4393_v31 = vpop.eup %4392  ;;  %v990_v9 = vmul.f32 2.0, %v928_v7 }
 0x7ea   :  { %v2930_v10 = vadd.f32 -1.0, %v4393_v31 }
 0x7eb   :  { %v992_v11 = vadd.f32 %v990_v9, %v988_v8 }
 0x7ec   :  { %v929_v12 = vsel %vm921_vm15, %v919_v2, %v2930_v10 }
 0x7ed   :  { %v991_v35 = vmul.f32 2.0, %v929_v12  ;;  %v930_v36 = vpack.c.bf16 %v929_v12, %v928_v7 }
 0x7ef   :  { %3691 = vmatmul.mubr.bf16.vlgmr.msra.gmra.mxu1 %v930_v36  ;;  %v993_v57 = vadd.f32 %v991_v35, %v989_v27 }
 0x7f0   :  { %3715 = vmatpush3.bf16.msra.mxu1 %v4839_v45  ;;  %3730 = vmatprep.mubr.msk.bf16.mxu1 %vm4636_vm1, %v4635_v0 }
 0x7f1   :  { %3716 = vmatprep.subr.bf16.mxu1 %v4635_v0 }
 0x7f4   :  { %3717 = vmatpush3.bf16.msra.mxu1 %v4846_v46 }
 0x7f5   :  { %3718 = vmatprep.subr.bf16.mxu1 %v4635_v0 }
 0x7f8   :  { %3719 = vmatpush3.bf16.msra.mxu1 %v4854_v47 }
 0x7f9   :  { %3720 = vmatprep.subr.bf16.mxu1 %v4635_v0 }
 0x7fc   :  { %3721 = vmatpush3.bf16.msra.mxu1 %v4861_v48 }
 0x7fd   :  { %3722 = vmatprep.subr.bf16.mxu1 %v4635_v0 }
 0x800   :  { %3723 = vmatpush3.bf16.msra.mxu1 %v4867_v49 }
 0x801   :  { %3724 = vmatprep.subr.bf16.mxu1 %v4635_v0 }
 0x804   :  { %3725 = vmatpush3.bf16.msra.mxu1 %v4873_v50 }
 0x805   :  { %3726 = vmatprep.subr.bf16.mxu1 %v4635_v0 }
 0x808   :  { %3727 = vmatpush3.bf16.msra.mxu1 %v4879_v51 }
 0x809   :  { %3728 = vmatprep.subr.bf16.mxu1 %v4635_v0 }
 0x80c   :  { %3729 = vmatpush3.bf16.msra.mxu1 %v4885_v52 }
 0x80d   :  { %3754 = vmatprep.subr.bf16.mxu1 %v4635_v0 }
 0x8af   :  { %v965_v62 = vpop.f32.mrf.mxu1 }
 0x8b0   :  { %v966_v63 = vadd.f32 %v965_v62, %v5011_v61 }
 0x8b1   :  { %v3692_v38 = vpop.f32.mrf.mxu1 }
 0x8b2   :  { %v972_v53 = vmul.f32 0.125, %v966_v63 }
 0x8b3   :  { %v968_v59 = vpop.f32.mrf.mxu1 }
 0x8b4   :  { %v974_v60 = vadd.f32 %v972_v53, %v5115_v58  ;;  %v969_v30 = vadd.f32 %v968_v59, %v5011_v61 }
 0x8b5   :  { %v3693_v39 = vpop.f32.mrf.mxu1 }
 0x8b6   :  { %v978_v40 = vmul.f32 1.442695, %v974_v60  ;;  %v973_v41 = vmul.f32 0.125, %v969_v30  ;;  %vm976_vm2 = vcmp.gt.f32.partialorder %v974_v60, 0.0 }
 0x8b8   :  { %4394 = vpow2.f32 %v978_v40  ;;  %v975_v42 = vadd.f32 %v973_v41, %v5119_v32 }
 0x8ba   :  { %v980_v43 = vmul.f32 1.442695, %v975_v42  ;;  %vm977_vm3 = vcmp.gt.f32.partialorder %v975_v42, 0.0 }
 0x8bc   :  { %4396 = vpow2.f32 %v980_v43 }
 0x8c5   :  { %v4395_v55 = vpop.eup %4394 }
 0x8c6   :  { %v2931_v1 = vadd.f32 -1.0, %v4395_v55 }
 0x8c8   :  { %v984_v3 = vsel %vm976_vm2, %v974_v60, %v2931_v1 }
 0x8c9   :  { %v4397_v2 = vpop.eup %4396  ;;  %v994_v6 = vadd.f32 %v992_v11, %v984_v3 }
 0x8ca   :  { %v2932_v4 = vadd.f32 -1.0, %v4397_v2 }
 0x8cc   :  { %v985_v5 = vsel %vm977_vm3, %v975_v42, %v2932_v4 }
 0x8cd   :  { %v995_v58 = vadd.f32 %v993_v57, %v985_v5 }
 0x8cf   :  { %v996_v7 = vpack.c.bf16 %v995_v58, %v994_v6 }
 0x8d1   :  { %3711 = vmatmul.mubr.bf16.vlgmr.msra.gmra.mxu0 %v996_v7 }
 0x8d2   :  { %3735 = vmatpush3.bf16.msra.mxu0 %v4916_v13  ;;  %3750 = vmatprep.mubr.msk.bf16.mxu0 %vm4636_vm1, %v4635_v0 }
 0x8d3   :  { %3736 = vmatprep.subr.bf16.mxu0 %v4635_v0 }
 0x8d6   :  { %3737 = vmatpush3.bf16.msra.mxu0 %v4918_v16 }
 0x8d7   :  { %3738 = vmatprep.subr.bf16.mxu0 %v4635_v0 }
 0x8da   :  { %3739 = vmatpush3.bf16.msra.mxu0 %v4924_v17 }
 0x8db   :  { %3740 = vmatprep.subr.bf16.mxu0 %v4635_v0 }
 0x8de   :  { %3741 = vmatpush3.bf16.msra.mxu0 %v4930_v18 }
 0x8df   :  { %3742 = vmatprep.subr.bf16.mxu0 %v4635_v0 }
 0x8e2   :  { %3743 = vmatpush3.bf16.msra.mxu0 %v4936_v20 }
 0x8e3   :  { %3744 = vmatprep.subr.bf16.mxu0 %v4635_v0 }
 0x8e6   :  { %3745 = vmatpush3.bf16.msra.mxu0 %v4942_v21 }
 0x8e7   :  { %3746 = vmatprep.subr.bf16.mxu0 %v4635_v0 }
 0x8ea   :  { %3747 = vmatpush3.bf16.msra.mxu0 %v4948_v22 }
 0x8eb   :  { %3748 = vmatprep.subr.bf16.mxu0 %v4635_v0 }
 0x8ee   :  { %3749 = vmatpush3.bf16.msra.mxu0 %v4954_v25 }
 0x8ef   :  { %3774 = vmatprep.subr.bf16.mxu0 %v4635_v0 }
 0x991   :  { %v1031_v32 = vpop.f32.mrf.mxu0 }
 0x992   :  { %v1038_v31 = vmul.f32 0.020833334, %v1031_v32 }
 0x993   :  { %v3712_v8 = vpop.f32.mrf.mxu0 }
 0x994   :  { %v1040_v9 = vadd.f32 %v1038_v31, %v5089_v44 }
 0x995   :  { %v1034_v37 = vpop.f32.mrf.mxu0 }
 0x996   :  { %v1039_v10 = vmul.f32 0.020833334, %v1034_v37  ;;  %v5221_v27 = vadd.f32 %v1040_v9, %v5084_v26 }
 0x997   :  { %v3713_v11 = vpop.f32.mrf.mxu0 }
 0x998   :  { %v1041_v12 = vadd.f32 %v1039_v10, %v5092_v54 }
 0x99a   :  { %v5224_v35 = vadd.f32 %v1041_v12, %v5084_v26 }
 0x99c   :  { %v1044_v36 = vpack.c.bf16 %v5224_v35, %v5221_v27 }
 0x99e   :  { %3731 = vmatmul.mubr.bf16.vlgmr.msra.gmra.mxu1 %v1044_v36 }
 0x99f   :  { %3755 = vmatpush3.bf16.msra.mxu1 %v4916_v13  ;;  %3770 = vmatprep.mubr.msk.bf16.mxu1 %vm4636_vm1, %v4635_v0 }
 0x9a0   :  { %3756 = vmatprep.subr.bf16.mxu1 %v4635_v0 }
 0x9a3   :  { %3757 = vmatpush3.bf16.msra.mxu1 %v4918_v16 }
 0x9a4   :  { %3758 = vmatprep.subr.bf16.mxu1 %v4635_v0 }
 0x9a7   :  { %3759 = vmatpush3.bf16.msra.mxu1 %v4924_v17 }
 0x9a8   :  { %3760 = vmatprep.subr.bf16.mxu1 %v4635_v0 }
 0x9ab   :  { %3761 = vmatpush3.bf16.msra.mxu1 %v4930_v18 }
 0x9ac   :  { %3762 = vmatprep.subr.bf16.mxu1 %v4635_v0 }
 0x9af   :  { %3763 = vmatpush3.bf16.msra.mxu1 %v4936_v20 }
 0x9b0   :  { %3764 = vmatprep.subr.bf16.mxu1 %v4635_v0 }
 0x9b3   :  { %3765 = vmatpush3.bf16.msra.mxu1 %v4942_v21 }
 0x9b4   :  { %3766 = vmatprep.subr.bf16.mxu1 %v4635_v0 }
 0x9b7   :  { %3767 = vmatpush3.bf16.msra.mxu1 %v4948_v22 }
 0x9b8   :  { %3768 = vmatprep.subr.bf16.mxu1 %v4635_v0 }
 0x9bb   :  { %3769 = vmatpush3.bf16.msra.mxu1 %v4954_v25 }
 0x9bc   :  { %3794 = vmatprep.subr.bf16.mxu1 %v4635_v0 }
 0xa5e   :  { %v1079_v44 = vpop.f32.mrf.mxu1 }
 0xa5f   :  { %v5247_v54 = vadd.f32 %v4967_v29, %v1079_v44 }
 0xa60   :  { %v3732_v57 = vpop.f32.mrf.mxu1 }
 0xa61   :  { %v1088_v62 = vmul.f32 1.442695, %v5247_v54  ;;  %vm1086_vm4 = vcmp.gt.f32.partialorder %v5247_v54, 0.0 }
 0xa62   :  { %v1082_v63 = vpop.f32.mrf.mxu1 }
 0xa63   :  { %v5251_v38 = vadd.f32 %v4967_v29, %v1082_v63  ;;  %4398 = vpow2.f32 %v1088_v62 }
 0xa64   :  { %v3733_v53 = vpop.f32.mrf.mxu1 }
 0xa65   :  { %v1090_v59 = vmul.f32 1.442695, %v5251_v38  ;;  %vm1087_vm5 = vcmp.gt.f32.partialorder %v5251_v38, 0.0 }
 0xa67   :  { %4400 = vpow2.f32 %v1090_v59 }
 0xa70   :  { %v4399_v60 = vpop.eup %4398 }
 0xa71   :  { %v2933_v30 = vadd.f32 -1.0, %v4399_v60 }
 0xa73   :  { %v5257_v41 = vsel %vm1086_vm4, %v5247_v54, %v2933_v30 }
 0xa74   :  { %v4401_v39 = vpop.eup %4400 }
 0xa75   :  { %v2934_v40 = vadd.f32 -1.0, %v4401_v39 }
 0xa77   :  { %v5260_v42 = vsel %vm1087_vm5, %v5251_v38, %v2934_v40 }
 0xa78   :  { %v1096_v29 = vpack.c.bf16 %v5260_v42, %v5257_v41 }
 0xa7a   :  { %3751 = vmatmul.mubr.bf16.vlgmr.msra.gmra.mxu0 %v1096_v29 }
 0xa7b   :  { %3775 = vmatpush3.bf16.msra.mxu0 %v4916_v13  ;;  %3790 = vmatprep.mubr.msk.bf16.mxu0 %vm4636_vm1, %v4635_v0 }
 0xa7c   :  { %3776 = vmatprep.subr.bf16.mxu0 %v4635_v0 }
 0xa7f   :  { %3777 = vmatpush3.bf16.msra.mxu0 %v4918_v16 }
 0xa80   :  { %3778 = vmatprep.subr.bf16.mxu0 %v4635_v0 }
 0xa83   :  { %3779 = vmatpush3.bf16.msra.mxu0 %v4924_v17 }
 0xa84   :  { %3780 = vmatprep.subr.bf16.mxu0 %v4635_v0 }
 0xa87   :  { %3781 = vmatpush3.bf16.msra.mxu0 %v4930_v18 }
 0xa88   :  { %3782 = vmatprep.subr.bf16.mxu0 %v4635_v0 }
 0xa8b   :  { %3783 = vmatpush3.bf16.msra.mxu0 %v4936_v20 }
 0xa8c   :  { %3784 = vmatprep.subr.bf16.mxu0 %v4635_v0 }
 0xa8f   :  { %3785 = vmatpush3.bf16.msra.mxu0 %v4942_v21 }
 0xa90   :  { %3786 = vmatprep.subr.bf16.mxu0 %v4635_v0 }
 0xa93   :  { %3787 = vmatpush3.bf16.msra.mxu0 %v4948_v22 }
 0xa94   :  { %3788 = vmatprep.subr.bf16.mxu0 %v4635_v0 }
 0xa97   :  { %3789 = vmatpush3.bf16.msra.mxu0 %v4954_v25 }
 0xa98   :  { %3814 = vmatprep.subr.bf16.mxu0 %v4635_v0 }
 0xb3a   :  { %v1131_v43 = vpop.f32.mrf.mxu0 }
 0xb3b   :  { %v1132_v55 = vadd.f32 %v1131_v43, %v5011_v61 }
 0xb3c   :  { %v3752_v1 = vpop.f32.mrf.mxu0 }
 0xb3d   :  { %v1138_v2 = vmul.f32 0.0625, %v1132_v55 }
 0xb3e   :  { %v1134_v3 = vpop.f32.mrf.mxu0 }
 0xb3f   :  { %v1140_v4 = vadd.f32 %v1138_v2, %v5247_v54  ;;  %v1135_v5 = vadd.f32 %v1134_v3, %v5011_v61 }
 0xb40   :  { %v3753_v6 = vpop.f32.mrf.mxu0 }
 0xb41   :  { %v1144_v58 = vmul.f32 1.442695, %v1140_v4  ;;  %v1139_v7 = vmul.f32 0.0625, %v1135_v5  ;;  %vm1142_vm6 = vcmp.gt.f32.partialorder %v1140_v4, 0.0 }
 0xb43   :  { %4402 = vpow2.f32 %v1144_v58  ;;  %v1141_v32 = vadd.f32 %v1139_v7, %v5251_v38 }
 0xb45   :  { %v1146_v31 = vmul.f32 1.442695, %v1141_v32  ;;  %vm1143_vm7 = vcmp.gt.f32.partialorder %v1141_v32, 0.0 }
 0xb47   :  { %4404 = vpow2.f32 %v1146_v31 }
 0xb50   :  { %v4403_v8 = vpop.eup %4402 }
 0xb51   :  { %v2935_v37 = vadd.f32 -1.0, %v4403_v8 }
 0xb53   :  { %v1150_v11 = vsel %vm1142_vm6, %v1140_v4, %v2935_v37 }
 0xb54   :  { %v4405_v9 = vpop.eup %4404  ;;  %v1264_v1 = vmul.f32 2.0, %v1150_v11 }
 0xb55   :  { %v2936_v10 = vadd.f32 -1.0, %v4405_v9 }
 0xb56   :  { %v1266_v5 = vadd.f32 %v1264_v1, %v5257_v41 }
 0xb57   :  { %v1151_v12 = vsel %vm1143_vm7, %v1141_v32, %v2936_v10 }
 0xb58   :  { %v1152_v36 = vpack.c.bf16 %v1151_v12, %v1150_v11  ;;  %v1265_v6 = vmul.f32 2.0, %v1151_v12 }
 0xb5a   :  { %3771 = vmatmul.mubr.bf16.vlgmr.msra.gmra.mxu1 %v1152_v36  ;;  %v1267_v8 = vadd.f32 %v1265_v6, %v5260_v42 }
 0xb5b   :  { %3795 = vmatpush3.bf16.msra.mxu1 %v4813_v34  ;;  %3810 = vmatprep.mubr.msk.bf16.mxu1 %vm4636_vm1, %v4635_v0 }
 0xb5c   :  { %3796 = vmatprep.subr.bf16.mxu1 %v4635_v0 }
 0xb5f   :  { %3797 = vmatpush3.bf16.msra.mxu1 %v4809_v33 }
 0xb60   :  { %3798 = vmatprep.subr.bf16.mxu1 %v4635_v0 }
 0xb63   :  { %3799 = vmatpush3.bf16.msra.mxu1 %v4795_v28 }
 0xb64   :  { %3800 = vmatprep.subr.bf16.mxu1 %v4635_v0 }
 0xb67   :  { %3801 = vmatpush3.bf16.msra.mxu1 %v4783_v24 }
 0xb68   :  { %3802 = vmatprep.subr.bf16.mxu1 %v4635_v0 }
 0xb6b   :  { %3803 = vmatpush3.bf16.msra.mxu1 %v4779_v23 }
 0xb6c   :  { %3804 = vmatprep.subr.bf16.mxu1 %v4635_v0 }
 0xb6f   :  { %3805 = vmatpush3.bf16.msra.mxu1 %v4767_v19 }
 0xb70   :  { %3806 = vmatprep.subr.bf16.mxu1 %v4635_v0 }
 0xb73   :  { %3807 = vmatpush3.bf16.msra.mxu1 %v4755_v15 }
 0xb74   :  { %3808 = vmatprep.subr.bf16.mxu1 %v4635_v0 }
 0xb77   :  { %3809 = vmatpush3.bf16.msra.mxu1 %v4751_v14 }
 0xb78   :  { %3834 = vmatprep.subr.bf16.mxu1 %v4635_v0 }
 0xc1a   :  { %v1187_v44 = vpop.f32.mrf.mxu1 }
 0xc1b   :  { %v1188_v57 = vadd.f32 %v1187_v44, %v5011_v61 }
 0xc1c   :  { %v3772_v62 = vpop.f32.mrf.mxu1 }
 0xc1d   :  { %v1194_v63 = vmul.f32 0.0625, %v1188_v57 }
 0xc1e   :  { %v1190_v53 = vpop.f32.mrf.mxu1 }
 0xc1f   :  { %v1196_v59 = vadd.f32 %v1194_v63, %v5247_v54  ;;  %v1191_v60 = vadd.f32 %v1190_v53, %v5011_v61 }
 0xc20   :  { %v3773_v30 = vpop.f32.mrf.mxu1 }
 0xc21   :  { %v1200_v39 = vmul.f32 1.442695, %v1196_v59  ;;  %v1195_v40 = vmul.f32 0.0625, %v1191_v60  ;;  %vm1198_vm8 = vcmp.gt.f32.partialorder %v1196_v59, 0.0 }
 0xc23   :  { %4406 = vpow2.f32 %v1200_v39  ;;  %v1197_v29 = vadd.f32 %v1195_v40, %v5251_v38 }
 0xc25   :  { %v1202_v43 = vmul.f32 1.442695, %v1197_v29  ;;  %vm1199_vm9 = vcmp.gt.f32.partialorder %v1197_v29, 0.0 }
 0xc27   :  { %4408 = vpow2.f32 %v1202_v43 }
 0xc30   :  { %v4407_v55 = vpop.eup %4406 }
 0xc31   :  { %v2937_v2 = vadd.f32 -1.0, %v4407_v55 }
 0xc33   :  { %v1206_v3 = vsel %vm1198_vm8, %v1196_v59, %v2937_v2 }
 0xc34   :  { %v4409_v4 = vpop.eup %4408  ;;  %v1268_v58 = vmul.f32 2.0, %v1206_v3 }
 0xc35   :  { %v2938_v7 = vadd.f32 -1.0, %v4409_v4 }
 0xc36   :  { %v1270_v32 = vadd.f32 %v1268_v58, %v1266_v5 }
 0xc37   :  { %v1207_v31 = vsel %vm1199_vm9, %v1197_v29, %v2938_v7 }
 0xc38   :  { %v1269_v37 = vmul.f32 2.0, %v1207_v31  ;;  %v1208_v9 = vpack.c.bf16 %v1207_v31, %v1206_v3 }
 0xc3a   :  { %3791 = vmatmul.mubr.bf16.vlgmr.msra.gmra.mxu0 %v1208_v9  ;;  %v1271_v10 = vadd.f32 %v1269_v37, %v1267_v8 }
 0xc3b   :  { %3815 = vmatpush3.bf16.msra.mxu0 %v4839_v45  ;;  %3830 = vmatprep.mubr.msk.bf16.mxu0 %vm4636_vm1, %v4635_v0 }
 0xc3c   :  { %3816 = vmatprep.subr.bf16.mxu0 %v4635_v0 }
 0xc3f   :  { %3817 = vmatpush3.bf16.msra.mxu0 %v4846_v46 }
 0xc40   :  { %3818 = vmatprep.subr.bf16.mxu0 %v4635_v0 }
 0xc43   :  { %3819 = vmatpush3.bf16.msra.mxu0 %v4854_v47 }
 0xc44   :  { %3820 = vmatprep.subr.bf16.mxu0 %v4635_v0 }
 0xc47   :  { %3821 = vmatpush3.bf16.msra.mxu0 %v4861_v48 }
 0xc48   :  { %3822 = vmatprep.subr.bf16.mxu0 %v4635_v0 }
 0xc4b   :  { %3823 = vmatpush3.bf16.msra.mxu0 %v4867_v49 }
 0xc4c   :  { %3824 = vmatprep.subr.bf16.mxu0 %v4635_v0 }
 0xc4f   :  { %3825 = vmatpush3.bf16.msra.mxu0 %v4873_v50 }
 0xc50   :  { %3826 = vmatprep.subr.bf16.mxu0 %v4635_v0 }
 0xc53   :  { %3827 = vmatpush3.bf16.msra.mxu0 %v4879_v51 }
 0xc54   :  { %3828 = vmatprep.subr.bf16.mxu0 %v4635_v0 }
 0xc57   :  { %3829 = vmatpush3.bf16.msra.mxu0 %v4885_v52 }
 0xc58   :  { %3854 = vmatprep.subr.bf16.mxu0 %v4635_v0 }
 0xcfa   :  { %v1243_v41 = vpop.f32.mrf.mxu0 }
 0xcfb   :  { %v1244_v42 = vadd.f32 %v1243_v41, %v5011_v61 }
 0xcfc   :  { %v3792_v11 = vpop.f32.mrf.mxu0 }
 0xcfd   :  { %v1250_v12 = vmul.f32 0.125, %v1244_v42 }
 0xcfe   :  { %v1246_v36 = vpop.f32.mrf.mxu0 }
 0xcff   :  { %v1252_v44 = vadd.f32 %v1250_v12, %v5247_v54  ;;  %v1247_v57 = vadd.f32 %v1246_v36, %v5011_v61 }
 0xd00   :  { %v3793_v62 = vpop.f32.mrf.mxu0 }
 0xd01   :  { %v1256_v63 = vmul.f32 1.442695, %v1252_v44  ;;  %v1251_v53 = vmul.f32 0.125, %v1247_v57  ;;  %vm1254_vm10 = vcmp.gt.f32.partialorder %v1252_v44, 0.0 }
 0xd03   :  { %4410 = vpow2.f32 %v1256_v63  ;;  %v1253_v59 = vadd.f32 %v1251_v53, %v5251_v38 }
 0xd05   :  { %v1258_v60 = vmul.f32 1.442695, %v1253_v59  ;;  %vm1255_vm11 = vcmp.gt.f32.partialorder %v1253_v59, 0.0 }
 0xd07   :  { %4412 = vpow2.f32 %v1258_v60 }
 0xd10   :  { %v4411_v30 = vpop.eup %4410 }
 0xd11   :  { %v2939_v39 = vadd.f32 -1.0, %v4411_v30 }
 0xd13   :  { %v1262_v29 = vsel %vm1254_vm10, %v1252_v44, %v2939_v39 }
 0xd14   :  { %v4413_v40 = vpop.eup %4412  ;;  %v1272_v1 = vadd.f32 %v1270_v32, %v1262_v29 }
 0xd15   :  { %v2940_v43 = vadd.f32 -1.0, %v4413_v40 }
 0xd17   :  { %v1263_v55 = vsel %vm1255_vm11, %v1253_v59, %v2940_v43 }
 0xd18   :  { %v1273_v54 = vadd.f32 %v1271_v10, %v1263_v55 }
 0xd1a   :  { %v1274_v2 = vpack.c.bf16 %v1273_v54, %v1272_v1 }
 0xd1c   :  { %3811 = vmatmul.mubr.bf16.vlgmr.msra.gmra.mxu1 %v1274_v2 }
 0xd1d   :  { %3835 = vmatpush3.bf16.msra.mxu1 %v4916_v13  ;;  %3850 = vmatprep.mubr.msk.bf16.mxu1 %vm4636_vm1, %v4635_v0 }
 0xd1e   :  { %3836 = vmatprep.subr.bf16.mxu1 %v4635_v0 }
 0xd21   :  { %3837 = vmatpush3.bf16.msra.mxu1 %v4918_v16 }
 0xd22   :  { %3838 = vmatprep.subr.bf16.mxu1 %v4635_v0 }
 0xd25   :  { %3839 = vmatpush3.bf16.msra.mxu1 %v4924_v17 }
 0xd26   :  { %3840 = vmatprep.subr.bf16.mxu1 %v4635_v0 }
 0xd29   :  { %3841 = vmatpush3.bf16.msra.mxu1 %v4930_v18 }
 0xd2a   :  { %3842 = vmatprep.subr.bf16.mxu1 %v4635_v0 }
 0xd2d   :  { %3843 = vmatpush3.bf16.msra.mxu1 %v4936_v20 }
 0xd2e   :  { %3844 = vmatprep.subr.bf16.mxu1 %v4635_v0 }
 0xd31   :  { %3845 = vmatpush3.bf16.msra.mxu1 %v4942_v21 }
 0xd32   :  { %3846 = vmatprep.subr.bf16.mxu1 %v4635_v0 }
 0xd35   :  { %3847 = vmatpush3.bf16.msra.mxu1 %v4948_v22 }
 0xd36   :  { %3848 = vmatprep.subr.bf16.mxu1 %v4635_v0 }
 0xd39   :  { %3849 = vmatpush3.bf16.msra.mxu1 %v4954_v25 }
 0xd3a   :  { %3874 = vmatprep.subr.bf16.mxu1 %v4635_v0 }
 0xddc   :  { %v1309_v38 = vpop.f32.mrf.mxu1 }
 0xddd   :  { %v1316_v3 = vmul.f32 0.020833334, %v1309_v38 }
 0xdde   :  { %v3812_v4 = vpop.f32.mrf.mxu1 }
 0xddf   :  { %v1318_v6 = vadd.f32 %v1316_v3, %v5221_v27 }
 0xde0   :  { %v1312_v5 = vpop.f32.mrf.mxu1 }
 0xde1   :  { %v1317_v58 = vmul.f32 0.020833334, %v1312_v5  ;;  %v5353_v31 = vadd.f32 %v1318_v6, %v5084_v26 }
 0xde2   :  { %v3813_v7 = vpop.f32.mrf.mxu1 }
 0xde3   :  { %v1319_v32 = vadd.f32 %v1317_v58, %v5224_v35  ;;  %v5381_v35 = vld [vmem:[%s6023_s4] ss:$0 sm:$0xff] }
 0xde5   :  { %v5356_v8 = vadd.f32 %v1319_v32, %v5084_v26 }
 0xde7   :  { %v1322_v37 = vpack.c.bf16 %v5356_v8, %v5353_v31 }
 0xde9   :  { %3831 = vmatmul.mubr.bf16.vlgmr.msra.gmra.mxu0 %v1322_v37 }
 0xdea   :  { %3855 = vmatpush3.bf16.msra.mxu0 %v4916_v13  ;;  %3870 = vmatprep.mubr.msk.bf16.mxu0 %vm4636_vm1, %v4635_v0 }
 0xdeb   :  { %3856 = vmatprep.subr.bf16.mxu0 %v4635_v0 }
 0xdee   :  { %3857 = vmatpush3.bf16.msra.mxu0 %v4918_v16 }
 0xdef   :  { %3858 = vmatprep.subr.bf16.mxu0 %v4635_v0 }
 0xdf2   :  { %3859 = vmatpush3.bf16.msra.mxu0 %v4924_v17 }
 0xdf3   :  { %3860 = vmatprep.subr.bf16.mxu0 %v4635_v0 }
 0xdf6   :  { %3861 = vmatpush3.bf16.msra.mxu0 %v4930_v18 }
 0xdf7   :  { %3862 = vmatprep.subr.bf16.mxu0 %v4635_v0 }
 0xdfa   :  { %3863 = vmatpush3.bf16.msra.mxu0 %v4936_v20 }
 0xdfb   :  { %3864 = vmatprep.subr.bf16.mxu0 %v4635_v0 }
 0xdfe   :  { %3865 = vmatpush3.bf16.msra.mxu0 %v4942_v21 }
 0xdff   :  { %3866 = vmatprep.subr.bf16.mxu0 %v4635_v0 }
 0xe02   :  { %3867 = vmatpush3.bf16.msra.mxu0 %v4948_v22 }
 0xe03   :  { %3868 = vmatprep.subr.bf16.mxu0 %v4635_v0 }
 0xe06   :  { %3869 = vmatpush3.bf16.msra.mxu0 %v4954_v25 }
 0xe07   :  { %3894 = vmatprep.subr.bf16.mxu0 %v4635_v0 }
 0xea9   :  { %v1357_v27 = vpop.f32.mrf.mxu0 }
 0xeaa   :  { %v5384_v9 = vadd.f32 %v5381_v35, %v1357_v27 }
 0xeab   :  { %v3832_v10 = vpop.f32.mrf.mxu0 }
 0xeac   :  { %v1366_v41 = vmul.f32 1.442695, %v5384_v9  ;;  %vm1364_vm12 = vcmp.gt.f32.partialorder %v5384_v9, 0.0 }
 0xead   :  { %v1360_v42 = vpop.f32.mrf.mxu0 }
 0xeae   :  { %v5388_v11 = vadd.f32 %v5381_v35, %v1360_v42  ;;  %4414 = vpow2.f32 %v1366_v41 }
 0xeaf   :  { %v3833_v12 = vpop.f32.mrf.mxu0 }
 0xeb0   :  { %v1368_v36 = vmul.f32 1.442695, %v5388_v11  ;;  %vm1365_vm13 = vcmp.gt.f32.partialorder %v5388_v11, 0.0 }
 0xeb2   :  { %4416 = vpow2.f32 %v1368_v36 }
 0xebb   :  { %v4415_v44 = vpop.eup %4414 }
 0xebc   :  { %v2941_v57 = vadd.f32 -1.0, %v4415_v44 }
 0xebe   :  { %v5394_v53 = vsel %vm1364_vm12, %v5384_v9, %v2941_v57 }
 0xebf   :  { %v4417_v62 = vpop.eup %4416 }
 0xec0   :  { %v2942_v63 = vadd.f32 -1.0, %v4417_v62 }
 0xec2   :  { %v5397_v59 = vsel %vm1365_vm13, %v5388_v11, %v2942_v63 }
 0xec3   :  { %v1374_v60 = vpack.c.bf16 %v5397_v59, %v5394_v53 }
 0xec5   :  { %3851 = vmatmul.mubr.bf16.vlgmr.msra.gmra.mxu1 %v1374_v60 }
 0xec6   :  { %3875 = vmatpush3.bf16.msra.mxu1 %v4916_v13  ;;  %3890 = vmatprep.mubr.msk.bf16.mxu1 %vm4636_vm1, %v4635_v0 }
 0xec7   :  { %3876 = vmatprep.subr.bf16.mxu1 %v4635_v0 }
 0xeca   :  { %3877 = vmatpush3.bf16.msra.mxu1 %v4918_v16 }
 0xecb   :  { %3878 = vmatprep.subr.bf16.mxu1 %v4635_v0 }
 0xece   :  { %3879 = vmatpush3.bf16.msra.mxu1 %v4924_v17 }
 0xecf   :  { %3880 = vmatprep.subr.bf16.mxu1 %v4635_v0 }
 0xed2   :  { %3881 = vmatpush3.bf16.msra.mxu1 %v4930_v18 }
 0xed3   :  { %3882 = vmatprep.subr.bf16.mxu1 %v4635_v0 }
 0xed6   :  { %3883 = vmatpush3.bf16.msra.mxu1 %v4936_v20 }
 0xed7   :  { %3884 = vmatprep.subr.bf16.mxu1 %v4635_v0 }
 0xeda   :  { %3885 = vmatpush3.bf16.msra.mxu1 %v4942_v21 }
 0xedb   :  { %3886 = vmatprep.subr.bf16.mxu1 %v4635_v0 }
 0xede   :  { %3887 = vmatpush3.bf16.msra.mxu1 %v4948_v22 }
 0xedf   :  { %3888 = vmatprep.subr.bf16.mxu1 %v4635_v0 }
 0xee2   :  { %3889 = vmatpush3.bf16.msra.mxu1 %v4954_v25 }
 0xee3   :  { %3914 = vmatprep.subr.bf16.mxu1 %v4635_v0 }
 0xf85   :  { %v1409_v30 = vpop.f32.mrf.mxu1 }
 0xf86   :  { %v1410_v39 = vadd.f32 %v1409_v30, %v5011_v61 }
 0xf87   :  { %v3852_v40 = vpop.f32.mrf.mxu1 }
 0xf88   :  { %v1416_v29 = vmul.f32 0.0625, %v1410_v39 }
 0xf89   :  { %v1412_v43 = vpop.f32.mrf.mxu1 }
 0xf8a   :  { %v1418_v55 = vadd.f32 %v1416_v29, %v5384_v9  ;;  %v1413_v1 = vadd.f32 %v1412_v43, %v5011_v61 }
 0xf8b   :  { %v3853_v54 = vpop.f32.mrf.mxu1 }
 0xf8c   :  { %v1422_v2 = vmul.f32 1.442695, %v1418_v55  ;;  %v1417_v38 = vmul.f32 0.0625, %v1413_v1  ;;  %vm1420_vm14 = vcmp.gt.f32.partialorder %v1418_v55, 0.0 }
 0xf8e   :  { %4418 = vpow2.f32 %v1422_v2  ;;  %v1419_v3 = vadd.f32 %v1417_v38, %v5388_v11 }
 0xf90   :  { %v1424_v4 = vmul.f32 1.442695, %v1419_v3  ;;  %vm1421_vm15 = vcmp.gt.f32.partialorder %v1419_v3, 0.0 }
 0xf92   :  { %4420 = vpow2.f32 %v1424_v4 }
 0xf9b   :  { %v4419_v5 = vpop.eup %4418 }
 0xf9c   :  { %v2943_v6 = vadd.f32 -1.0, %v4419_v5 }
 0xf9e   :  { %v1428_v32 = vsel %vm1420_vm14, %v1418_v55, %v2943_v6 }
 0xf9f   :  { %v4421_v58 = vpop.eup %4420  ;;  %v1542_v29 = vmul.f32 2.0, %v1428_v32 }
 0xfa0   :  { %v2944_v7 = vadd.f32 -1.0, %v4421_v58 }
 0xfa1   :  { %v1544_v54 = vadd.f32 %v1542_v29, %v5394_v53 }
 0xfa2   :  { %v1429_v37 = vsel %vm1421_vm15, %v1419_v3, %v2944_v7 }
 0xfa3   :  { %v1430_v27 = vpack.c.bf16 %v1429_v37, %v1428_v32  ;;  %v1543_v2 = vmul.f32 2.0, %v1429_v37 }
 0xfa5   :  { %3871 = vmatmul.mubr.bf16.vlgmr.msra.gmra.mxu0 %v1430_v27  ;;  %v1545_v6 = vadd.f32 %v1543_v2, %v5397_v59 }
 0xfa6   :  { %3895 = vmatpush3.bf16.msra.mxu0 %v4813_v34  ;;  %3910 = vmatprep.mubr.msk.bf16.mxu0 %vm4636_vm1, %v4635_v0 }
 0xfa7   :  { %3896 = vmatprep.subr.bf16.mxu0 %v4635_v0 }
 0xfaa   :  { %3897 = vmatpush3.bf16.msra.mxu0 %v4809_v33 }
 0xfab   :  { %3898 = vmatprep.subr.bf16.mxu0 %v4635_v0 }
 0xfae   :  { %3899 = vmatpush3.bf16.msra.mxu0 %v4795_v28 }
 0xfaf   :  { %3900 = vmatprep.subr.bf16.mxu0 %v4635_v0 }
 0xfb2   :  { %3901 = vmatpush3.bf16.msra.mxu0 %v4783_v24 }
 0xfb3   :  { %3902 = vmatprep.subr.bf16.mxu0 %v4635_v0 }
 0xfb6   :  { %3903 = vmatpush3.bf16.msra.mxu0 %v4779_v23 }
 0xfb7   :  { %3904 = vmatprep.subr.bf16.mxu0 %v4635_v0 }
 0xfba   :  { %3905 = vmatpush3.bf16.msra.mxu0 %v4767_v19 }
 0xfbb   :  { %3906 = vmatprep.subr.bf16.mxu0 %v4635_v0 }
 0xfbe   :  { %3907 = vmatpush3.bf16.msra.mxu0 %v4755_v15 }
 0xfbf   :  { %3908 = vmatprep.subr.bf16.mxu0 %v4635_v0 }
 0xfc2   :  { %3909 = vmatpush3.bf16.msra.mxu0 %v4751_v14 }
 0xfc3   :  { %3934 = vmatprep.subr.bf16.mxu0 %v4635_v0 }
0x1065   :  { %v1465_v10 = vpop.f32.mrf.mxu0 }
0x1066   :  { %v1466_v41 = vadd.f32 %v1465_v10, %v5011_v61 }
0x1067   :  { %v3872_v42 = vpop.f32.mrf.mxu0 }
0x1068   :  { %v1472_v12 = vmul.f32 0.0625, %v1466_v41 }
0x1069   :  { %v1468_v36 = vpop.f32.mrf.mxu0 }
0x106a   :  { %v1474_v44 = vadd.f32 %v1472_v12, %v5384_v9  ;;  %v1469_v57 = vadd.f32 %v1468_v36, %v5011_v61 }
0x106b   :  { %v3873_v62 = vpop.f32.mrf.mxu0 }
0x106c   :  { %v1478_v63 = vmul.f32 1.442695, %v1474_v44  ;;  %v1473_v60 = vmul.f32 0.0625, %v1469_v57  ;;  %vm1476_vm2 = vcmp.gt.f32.partialorder %v1474_v44, 0.0 }
0x106e   :  { %4422 = vpow2.f32 %v1478_v63  ;;  %v1475_v30 = vadd.f32 %v1473_v60, %v5388_v11 }
0x1070   :  { %v1480_v39 = vmul.f32 1.442695, %v1475_v30  ;;  %vm1477_vm3 = vcmp.gt.f32.partialorder %v1475_v30, 0.0 }
0x1072   :  { %4424 = vpow2.f32 %v1480_v39 }
0x107b   :  { %v4423_v40 = vpop.eup %4422 }
0x107c   :  { %v2945_v43 = vadd.f32 -1.0, %v4423_v40 }
0x107e   :  { %v1484_v55 = vsel %vm1476_vm2, %v1474_v44, %v2945_v43 }
0x107f   :  { %v4425_v1 = vpop.eup %4424  ;;  %v1546_v38 = vmul.f32 2.0, %v1484_v55 }
0x1080   :  { %v2946_v3 = vadd.f32 -1.0, %v4425_v1 }
0x1081   :  { %v1548_v4 = vadd.f32 %v1546_v38, %v1544_v54 }
0x1082   :  { %v1485_v5 = vsel %vm1477_vm3, %v1475_v30, %v2946_v3 }
0x1083   :  { %v1547_v58 = vmul.f32 2.0, %v1485_v5  ;;  %v1486_v7 = vpack.c.bf16 %v1485_v5, %v1484_v55 }
0x1085   :  { %3891 = vmatmul.mubr.bf16.vlgmr.msra.gmra.mxu1 %v1486_v7  ;;  %v1549_v27 = vadd.f32 %v1547_v58, %v1545_v6 }
0x1086   :  { %3915 = vmatpush3.bf16.msra.mxu1 %v4839_v45  ;;  %3930 = vmatprep.mubr.msk.bf16.mxu1 %vm4636_vm1, %v4635_v0 }
0x1087   :  { %3916 = vmatprep.subr.bf16.mxu1 %v4635_v0 }
0x108a   :  { %3917 = vmatpush3.bf16.msra.mxu1 %v4846_v46 }
0x108b   :  { %3918 = vmatprep.subr.bf16.mxu1 %v4635_v0 }
0x108e   :  { %3919 = vmatpush3.bf16.msra.mxu1 %v4854_v47 }
0x108f   :  { %3920 = vmatprep.subr.bf16.mxu1 %v4635_v0 }
0x1092   :  { %3921 = vmatpush3.bf16.msra.mxu1 %v4861_v48 }
0x1093   :  { %3922 = vmatprep.subr.bf16.mxu1 %v4635_v0 }
0x1096   :  { %3923 = vmatpush3.bf16.msra.mxu1 %v4867_v49 }
0x1097   :  { %3924 = vmatprep.subr.bf16.mxu1 %v4635_v0 }
0x109a   :  { %3925 = vmatpush3.bf16.msra.mxu1 %v4873_v50 }
0x109b   :  { %3926 = vmatprep.subr.bf16.mxu1 %v4635_v0 }
0x109e   :  { %3927 = vmatpush3.bf16.msra.mxu1 %v4879_v51 }
0x109f   :  { %3928 = vmatprep.subr.bf16.mxu1 %v4635_v0 }
0x10a2   :  { %3929 = vmatpush3.bf16.msra.mxu1 %v4885_v52 }
0x10a3   :  { %3954 = vmatprep.subr.bf16.mxu1 %v4635_v0 }
0x1145   :  { %v1521_v53 = vpop.f32.mrf.mxu1 }
0x1146   :  { %v1522_v59 = vadd.f32 %v1521_v53, %v5011_v61 }
0x1147   :  { %v3892_v32 = vpop.f32.mrf.mxu1 }
0x1148   :  { %v1528_v37 = vmul.f32 0.125, %v1522_v59 }
0x1149   :  { %v1524_v10 = vpop.f32.mrf.mxu1 }
0x114a   :  { %v1530_v41 = vadd.f32 %v1528_v37, %v5384_v9  ;;  %v1525_v42 = vadd.f32 %v1524_v10, %v5011_v61 }
0x114b   :  { %v3893_v12 = vpop.f32.mrf.mxu1 }
0x114c   :  { %v1534_v36 = vmul.f32 1.442695, %v1530_v41  ;;  %v1529_v44 = vmul.f32 0.125, %v1525_v42  ;;  %vm1532_vm4 = vcmp.gt.f32.partialorder %v1530_v41, 0.0 }
0x114e   :  { %4426 = vpow2.f32 %v1534_v36  ;;  %v1531_v57 = vadd.f32 %v1529_v44, %v5388_v11 }
0x1150   :  { %v1536_v62 = vmul.f32 1.442695, %v1531_v57  ;;  %vm1533_vm5 = vcmp.gt.f32.partialorder %v1531_v57, 0.0 }
0x1152   :  { %4428 = vpow2.f32 %v1536_v62 }
0x115b   :  { %v4427_v63 = vpop.eup %4426 }
0x115c   :  { %v2947_v60 = vadd.f32 -1.0, %v4427_v63 }
0x115e   :  { %v1540_v39 = vsel %vm1532_vm4, %v1530_v41, %v2947_v60 }
0x115f   :  { %v4429_v30 = vpop.eup %4428  ;;  %v1550_v43 = vadd.f32 %v1548_v4, %v1540_v39 }
0x1160   :  { %v2948_v40 = vadd.f32 -1.0, %v4429_v30 }
0x1162   :  { %v1541_v29 = vsel %vm1533_vm5, %v1531_v57, %v2948_v40 }
0x1163   :  { %v1551_v9 = vadd.f32 %v1549_v27, %v1541_v29 }
0x1165   :  { %v1552_v55 = vpack.c.bf16 %v1551_v9, %v1550_v43 }
0x1167   :  { %3911 = vmatmul.mubr.bf16.vlgmr.msra.gmra.mxu0 %v1552_v55 }
0x1168   :  { %3935 = vmatpush3.bf16.msra.mxu0 %v4916_v13  ;;  %3950 = vmatprep.mubr.msk.bf16.mxu0 %vm4636_vm1, %v4635_v0 }
0x1169   :  { %3936 = vmatprep.subr.bf16.mxu0 %v4635_v0 }
0x116c   :  { %3937 = vmatpush3.bf16.msra.mxu0 %v4918_v16 }
0x116d   :  { %3938 = vmatprep.subr.bf16.mxu0 %v4635_v0 }
0x1170   :  { %3939 = vmatpush3.bf16.msra.mxu0 %v4924_v17 }
0x1171   :  { %3940 = vmatprep.subr.bf16.mxu0 %v4635_v0 }
0x1174   :  { %3941 = vmatpush3.bf16.msra.mxu0 %v4930_v18 }
0x1175   :  { %3942 = vmatprep.subr.bf16.mxu0 %v4635_v0 }
0x1178   :  { %3943 = vmatpush3.bf16.msra.mxu0 %v4936_v20 }
0x1179   :  { %3944 = vmatprep.subr.bf16.mxu0 %v4635_v0 }
0x117c   :  { %3945 = vmatpush3.bf16.msra.mxu0 %v4942_v21 }
0x117d   :  { %3946 = vmatprep.subr.bf16.mxu0 %v4635_v0 }
0x1180   :  { %3947 = vmatpush3.bf16.msra.mxu0 %v4948_v22 }
0x1181   :  { %3948 = vmatprep.subr.bf16.mxu0 %v4635_v0 }
0x1184   :  { %3949 = vmatpush3.bf16.msra.mxu0 %v4954_v25 }
0x1185   :  { %3974 = vmatprep.subr.bf16.mxu0 %v4635_v0 }
0x1227   :  { %v1587_v11 = vpop.f32.mrf.mxu0 }
0x1228   :  { %v1594_v1 = vmul.f32 0.020833334, %v1587_v11 }
0x1229   :  { %v3912_v54 = vpop.f32.mrf.mxu0 }
0x122a   :  { %v1596_v38 = vadd.f32 %v1594_v1, %v5353_v31 }
0x122b   :  { %v1590_v2 = vpop.f32.mrf.mxu0 }
0x122c   :  { %v1595_v3 = vmul.f32 0.020833334, %v1590_v2  ;;  %v5490_v6 = vadd.f32 %v1596_v38, %v5084_v26 }
0x122d   :  { %v3913_v4 = vpop.f32.mrf.mxu0 }
0x122e   :  { %v1597_v5 = vadd.f32 %v1595_v3, %v5356_v8 }
0x1230   :  { %v5493_v58 = vadd.f32 %v1597_v5, %v5084_v26 }
0x1232   :  { %v1600_v7 = vpack.c.bf16 %v5493_v58, %v5490_v6 }
0x1234   :  { %3931 = vmatmul.mubr.bf16.vlgmr.msra.gmra.mxu1 %v1600_v7 }
0x1235   :  { %3955 = vmatpush3.bf16.msra.mxu1 %v4916_v13  ;;  %3970 = vmatprep.mubr.msk.bf16.mxu1 %vm4636_vm1, %v4635_v0 }
0x1236   :  { %3956 = vmatprep.subr.bf16.mxu1 %v4635_v0 }
0x1239   :  { %3957 = vmatpush3.bf16.msra.mxu1 %v4918_v16 }
0x123a   :  { %3958 = vmatprep.subr.bf16.mxu1 %v4635_v0 }
0x123d   :  { %3959 = vmatpush3.bf16.msra.mxu1 %v4924_v17 }
0x123e   :  { %3960 = vmatprep.subr.bf16.mxu1 %v4635_v0 }
0x1241   :  { %3961 = vmatpush3.bf16.msra.mxu1 %v4930_v18 }
0x1242   :  { %3962 = vmatprep.subr.bf16.mxu1 %v4635_v0 }
0x1245   :  { %3963 = vmatpush3.bf16.msra.mxu1 %v4936_v20 }
0x1246   :  { %3964 = vmatprep.subr.bf16.mxu1 %v4635_v0 }
0x1249   :  { %3965 = vmatpush3.bf16.msra.mxu1 %v4942_v21 }
0x124a   :  { %3966 = vmatprep.subr.bf16.mxu1 %v4635_v0 }
0x124d   :  { %3967 = vmatpush3.bf16.msra.mxu1 %v4948_v22 }
0x124e   :  { %3968 = vmatprep.subr.bf16.mxu1 %v4635_v0 }
0x1251   :  { %3969 = vmatpush3.bf16.msra.mxu1 %v4954_v25 }
0x1252   :  { %3994 = vmatprep.subr.bf16.mxu1 %v4635_v0 }
0x12f4   :  { %v1635_v31 = vpop.f32.mrf.mxu1 }
0x12f5   :  { %v5516_v8 = vadd.f32 %v5381_v35, %v1635_v31 }
0x12f6   :  { %v3932_v27 = vpop.f32.mrf.mxu1 }
0x12f7   :  { %v1644_v53 = vmul.f32 1.442695, %v5516_v8  ;;  %vm1642_vm6 = vcmp.gt.f32.partialorder %v5516_v8, 0.0 }
0x12f8   :  { %v1638_v59 = vpop.f32.mrf.mxu1 }
0x12f9   :  { %v5520_v32 = vadd.f32 %v5381_v35, %v1638_v59  ;;  %4430 = vpow2.f32 %v1644_v53 }
0x12fa   :  { %v3933_v37 = vpop.f32.mrf.mxu1 }
0x12fb   :  { %v1646_v10 = vmul.f32 1.442695, %v5520_v32  ;;  %vm1643_vm7 = vcmp.gt.f32.partialorder %v5520_v32, 0.0 }
0x12fd   :  { %4432 = vpow2.f32 %v1646_v10 }
0x1306   :  { %v4431_v41 = vpop.eup %4430 }
0x1307   :  { %v2949_v42 = vadd.f32 -1.0, %v4431_v41 }
0x1309   :  { %v5526_v44 = vsel %vm1642_vm6, %v5516_v8, %v2949_v42 }
0x130a   :  { %v4433_v12 = vpop.eup %4432 }
0x130b   :  { %v2950_v36 = vadd.f32 -1.0, %v4433_v12 }
0x130d   :  { %v5529_v57 = vsel %vm1643_vm7, %v5520_v32, %v2950_v36 }
0x130e   :  { %v1652_v62 = vpack.c.bf16 %v5529_v57, %v5526_v44 }
0x1310   :  { %3951 = vmatmul.mubr.bf16.vlgmr.msra.gmra.mxu0 %v1652_v62 }
0x1311   :  { %3975 = vmatpush3.bf16.msra.mxu0 %v4916_v13  ;;  %3990 = vmatprep.mubr.msk.bf16.mxu0 %vm4636_vm1, %v4635_v0 }
0x1312   :  { %3976 = vmatprep.subr.bf16.mxu0 %v4635_v0 }
0x1315   :  { %3977 = vmatpush3.bf16.msra.mxu0 %v4918_v16 }
0x1316   :  { %3978 = vmatprep.subr.bf16.mxu0 %v4635_v0 }
0x1319   :  { %3979 = vmatpush3.bf16.msra.mxu0 %v4924_v17 }
0x131a   :  { %3980 = vmatprep.subr.bf16.mxu0 %v4635_v0 }
0x131d   :  { %3981 = vmatpush3.bf16.msra.mxu0 %v4930_v18 }
0x131e   :  { %3982 = vmatprep.subr.bf16.mxu0 %v4635_v0 }
0x1321   :  { %3983 = vmatpush3.bf16.msra.mxu0 %v4936_v20 }
0x1322   :  { %3984 = vmatprep.subr.bf16.mxu0 %v4635_v0 }
0x1325   :  { %3985 = vmatpush3.bf16.msra.mxu0 %v4942_v21 }
0x1326   :  { %3986 = vmatprep.subr.bf16.mxu0 %v4635_v0 }
0x1329   :  { %3987 = vmatpush3.bf16.msra.mxu0 %v4948_v22 }
0x132a   :  { %3988 = vmatprep.subr.bf16.mxu0 %v4635_v0 }
0x132d   :  { %3989 = vmatpush3.bf16.msra.mxu0 %v4954_v25 }
0x132e   :  { %4014 = vmatprep.subr.bf16.mxu0 %v4635_v0 }
0x13d0   :  { %v1687_v63 = vpop.f32.mrf.mxu0 }
0x13d1   :  { %v1688_v60 = vadd.f32 %v1687_v63, %v5011_v61 }
0x13d2   :  { %v3952_v30 = vpop.f32.mrf.mxu0 }
0x13d3   :  { %v1694_v39 = vmul.f32 0.0625, %v1688_v60 }
0x13d4   :  { %v1690_v40 = vpop.f32.mrf.mxu0 }
0x13d5   :  { %v1696_v29 = vadd.f32 %v1694_v39, %v5516_v8  ;;  %v1691_v43 = vadd.f32 %v1690_v40, %v5011_v61 }
0x13d6   :  { %v3953_v9 = vpop.f32.mrf.mxu0 }
0x13d7   :  { %v1700_v55 = vmul.f32 1.442695, %v1696_v29  ;;  %v1695_v11 = vmul.f32 0.0625, %v1691_v43  ;;  %vm1698_vm8 = vcmp.gt.f32.partialorder %v1696_v29, 0.0 }
0x13d9   :  { %4434 = vpow2.f32 %v1700_v55  ;;  %v1697_v1 = vadd.f32 %v1695_v11, %v5520_v32 }
0x13db   :  { %v1702_v54 = vmul.f32 1.442695, %v1697_v1  ;;  %vm1699_vm9 = vcmp.gt.f32.partialorder %v1697_v1, 0.0 }
0x13dd   :  { %4436 = vpow2.f32 %v1702_v54 }
0x13e6   :  { %v4435_v2 = vpop.eup %4434 }
0x13e7   :  { %v2951_v38 = vadd.f32 -1.0, %v4435_v2 }
0x13e9   :  { %v1706_v5 = vsel %vm1698_vm8, %v1696_v29, %v2951_v38 }
0x13ea   :  { %v4437_v3 = vpop.eup %4436  ;;  %v1820_v39 = vmul.f32 2.0, %v1706_v5 }
0x13eb   :  { %v2952_v4 = vadd.f32 -1.0, %v4437_v3 }
0x13ec   :  { %v1822_v9 = vadd.f32 %v1820_v39, %v5526_v44 }
0x13ed   :  { %v1707_v7 = vsel %vm1699_vm9, %v1697_v1, %v2952_v4 }
0x13ee   :  { %v1708_v31 = vpack.c.bf16 %v1707_v7, %v1706_v5  ;;  %v1821_v55 = vmul.f32 2.0, %v1707_v7 }
0x13f0   :  { %3971 = vmatmul.mubr.bf16.vlgmr.msra.gmra.mxu1 %v1708_v31  ;;  %v1823_v38 = vadd.f32 %v1821_v55, %v5529_v57 }
0x13f1   :  { %3995 = vmatpush3.bf16.msra.mxu1 %v4813_v34  ;;  %4010 = vmatprep.mubr.msk.bf16.mxu1 %vm4636_vm1, %v4635_v0 }
0x13f2   :  { %3996 = vmatprep.subr.bf16.mxu1 %v4635_v0 }
0x13f5   :  { %3997 = vmatpush3.bf16.msra.mxu1 %v4809_v33 }
0x13f6   :  { %3998 = vmatprep.subr.bf16.mxu1 %v4635_v0 }
0x13f9   :  { %3999 = vmatpush3.bf16.msra.mxu1 %v4795_v28 }
0x13fa   :  { %4000 = vmatprep.subr.bf16.mxu1 %v4635_v0 }
0x13fd   :  { %4001 = vmatpush3.bf16.msra.mxu1 %v4783_v24 }
0x13fe   :  { %4002 = vmatprep.subr.bf16.mxu1 %v4635_v0 }
0x1401   :  { %4003 = vmatpush3.bf16.msra.mxu1 %v4779_v23 }
0x1402   :  { %4004 = vmatprep.subr.bf16.mxu1 %v4635_v0 }
0x1405   :  { %4005 = vmatpush3.bf16.msra.mxu1 %v4767_v19 }
0x1406   :  { %4006 = vmatprep.subr.bf16.mxu1 %v4635_v0 }
0x1409   :  { %4007 = vmatpush3.bf16.msra.mxu1 %v4755_v15 }
0x140a   :  { %4008 = vmatprep.subr.bf16.mxu1 %v4635_v0 }
0x140d   :  { %4009 = vmatpush3.bf16.msra.mxu1 %v4751_v14 }
0x140e   :  { %4034 = vmatprep.subr.bf16.mxu1 %v4635_v0 }
0x14b0   :  { %v1743_v27 = vpop.f32.mrf.mxu1 }
0x14b1   :  { %v1744_v53 = vadd.f32 %v1743_v27, %v5011_v61 }
0x14b2   :  { %v3972_v59 = vpop.f32.mrf.mxu1 }
0x14b3   :  { %v1750_v37 = vmul.f32 0.0625, %v1744_v53 }
0x14b4   :  { %v1746_v10 = vpop.f32.mrf.mxu1 }
0x14b5   :  { %v1752_v41 = vadd.f32 %v1750_v37, %v5516_v8  ;;  %v1747_v42 = vadd.f32 %v1746_v10, %v5011_v61 }
0x14b6   :  { %v3973_v12 = vpop.f32.mrf.mxu1 }
0x14b7   :  { %v1756_v36 = vmul.f32 1.442695, %v1752_v41  ;;  %v1751_v62 = vmul.f32 0.0625, %v1747_v42  ;;  %vm1754_vm10 = vcmp.gt.f32.partialorder %v1752_v41, 0.0 }
0x14b9   :  { %4438 = vpow2.f32 %v1756_v36  ;;  %v1753_v63 = vadd.f32 %v1751_v62, %v5520_v32 }
0x14bb   :  { %v1758_v60 = vmul.f32 1.442695, %v1753_v63  ;;  %vm1755_vm11 = vcmp.gt.f32.partialorder %v1753_v63, 0.0 }
0x14bd   :  { %4440 = vpow2.f32 %v1758_v60 }
0x14c6   :  { %v4439_v30 = vpop.eup %4438 }
0x14c7   :  { %v2953_v40 = vadd.f32 -1.0, %v4439_v30 }
0x14c9   :  { %v1762_v29 = vsel %vm1754_vm10, %v1752_v41, %v2953_v40 }
0x14ca   :  { %v4441_v43 = vpop.eup %4440  ;;  %v1824_v11 = vmul.f32 2.0, %v1762_v29 }
0x14cb   :  { %v2954_v1 = vadd.f32 -1.0, %v4441_v43 }
0x14cc   :  { %v1826_v54 = vadd.f32 %v1824_v11, %v1822_v9 }
0x14cd   :  { %v1763_v2 = vsel %vm1755_vm11, %v1753_v63, %v2954_v1 }
0x14ce   :  { %v1825_v3 = vmul.f32 2.0, %v1763_v2  ;;  %v1764_v4 = vpack.c.bf16 %v1763_v2, %v1762_v29 }
0x14d0   :  { %3991 = vmatmul.mubr.bf16.vlgmr.msra.gmra.mxu0 %v1764_v4  ;;  %v1827_v31 = vadd.f32 %v1825_v3, %v1823_v38 }
0x14d1   :  { %4015 = vmatpush3.bf16.msra.mxu0 %v4839_v45  ;;  %4030 = vmatprep.mubr.msk.bf16.mxu0 %vm4636_vm1, %v4635_v0 }
0x14d2   :  { %4016 = vmatprep.subr.bf16.mxu0 %v4635_v0 }
0x14d5   :  { %4017 = vmatpush3.bf16.msra.mxu0 %v4846_v46 }
0x14d6   :  { %4018 = vmatprep.subr.bf16.mxu0 %v4635_v0 }
0x14d9   :  { %4019 = vmatpush3.bf16.msra.mxu0 %v4854_v47 }
0x14da   :  { %4020 = vmatprep.subr.bf16.mxu0 %v4635_v0 }
0x14dd   :  { %4021 = vmatpush3.bf16.msra.mxu0 %v4861_v48 }
0x14de   :  { %4022 = vmatprep.subr.bf16.mxu0 %v4635_v0 }
0x14e1   :  { %4023 = vmatpush3.bf16.msra.mxu0 %v4867_v49 }
0x14e2   :  { %4024 = vmatprep.subr.bf16.mxu0 %v4635_v0 }
0x14e5   :  { %4025 = vmatpush3.bf16.msra.mxu0 %v4873_v50 }
0x14e6   :  { %4026 = vmatprep.subr.bf16.mxu0 %v4635_v0 }
0x14e9   :  { %4027 = vmatpush3.bf16.msra.mxu0 %v4879_v51 }
0x14ea   :  { %4028 = vmatprep.subr.bf16.mxu0 %v4635_v0 }
0x14ed   :  { %4029 = vmatpush3.bf16.msra.mxu0 %v4885_v52 }
0x14ee   :  { %4054 = vmatprep.subr.bf16.mxu0 %v4635_v0 }
0x1590   :  { %v1799_v44 = vpop.f32.mrf.mxu0 }
0x1591   :  { %v1800_v57 = vadd.f32 %v1799_v44, %v5011_v61 }
0x1592   :  { %v3992_v5 = vpop.f32.mrf.mxu0 }
0x1593   :  { %v1806_v7 = vmul.f32 0.125, %v1800_v57 }
0x1594   :  { %v1802_v27 = vpop.f32.mrf.mxu0 }
0x1595   :  { %v1808_v53 = vadd.f32 %v1806_v7, %v5516_v8  ;;  %v1803_v59 = vadd.f32 %v1802_v27, %v5011_v61 }
0x1596   :  { %v3993_v37 = vpop.f32.mrf.mxu0 }
0x1597   :  { %v1812_v10 = vmul.f32 1.442695, %v1808_v53  ;;  %v1807_v41 = vmul.f32 0.125, %v1803_v59  ;;  %vm1810_vm12 = vcmp.gt.f32.partialorder %v1808_v53, 0.0 }
0x1599   :  { %4442 = vpow2.f32 %v1812_v10  ;;  %v1809_v42 = vadd.f32 %v1807_v41, %v5520_v32 }
0x159b   :  { %v1814_v12 = vmul.f32 1.442695, %v1809_v42  ;;  %vm1811_vm13 = vcmp.gt.f32.partialorder %v1809_v42, 0.0 }
0x159d   :  { %4444 = vpow2.f32 %v1814_v12 }
0x15a6   :  { %v4443_v36 = vpop.eup %4442 }
0x15a7   :  { %v2955_v62 = vadd.f32 -1.0, %v4443_v36 }
0x15a9   :  { %v1818_v60 = vsel %vm1810_vm12, %v1808_v53, %v2955_v62 }
0x15aa   :  { %v4445_v63 = vpop.eup %4444  ;;  %v1828_v40 = vadd.f32 %v1826_v54, %v1818_v60 }
0x15ab   :  { %v2956_v30 = vadd.f32 -1.0, %v4445_v63 }
0x15ad   :  { %v1819_v39 = vsel %vm1811_vm13, %v1809_v42, %v2956_v30 }
0x15ae   :  { %v1829_v8 = vadd.f32 %v1827_v31, %v1819_v39 }
0x15b0   :  { %v1830_v29 = vpack.c.bf16 %v1829_v8, %v1828_v40 }
0x15b2   :  { %4011 = vmatmul.mubr.bf16.vlgmr.msra.gmra.mxu1 %v1830_v29 }
0x15b3   :  { %4035 = vmatpush3.bf16.msra.mxu1 %v4916_v13  ;;  %4050 = vmatprep.mubr.msk.bf16.mxu1 %vm4636_vm1, %v4635_v0 }
0x15b4   :  { %4036 = vmatprep.subr.bf16.mxu1 %v4635_v0 }
0x15b7   :  { %4037 = vmatpush3.bf16.msra.mxu1 %v4918_v16 }
0x15b8   :  { %4038 = vmatprep.subr.bf16.mxu1 %v4635_v0 }
0x15bb   :  { %4039 = vmatpush3.bf16.msra.mxu1 %v4924_v17 }
0x15bc   :  { %4040 = vmatprep.subr.bf16.mxu1 %v4635_v0 }
0x15bf   :  { %4041 = vmatpush3.bf16.msra.mxu1 %v4930_v18 }
0x15c0   :  { %4042 = vmatprep.subr.bf16.mxu1 %v4635_v0 }
0x15c3   :  { %4043 = vmatpush3.bf16.msra.mxu1 %v4936_v20 }
0x15c4   :  { %4044 = vmatprep.subr.bf16.mxu1 %v4635_v0 }
0x15c7   :  { %4045 = vmatpush3.bf16.msra.mxu1 %v4942_v21 }
0x15c8   :  { %4046 = vmatprep.subr.bf16.mxu1 %v4635_v0 }
0x15cb   :  { %4047 = vmatpush3.bf16.msra.mxu1 %v4948_v22 }
0x15cc   :  { %4048 = vmatprep.subr.bf16.mxu1 %v4635_v0 }
0x15cf   :  { %4049 = vmatpush3.bf16.msra.mxu1 %v4954_v25 }
0x15d0   :  { %4074 = vmatprep.subr.bf16.mxu1 %v4635_v0 }
0x1672   :  { %v1865_v32 = vpop.f32.mrf.mxu1 }
0x1673   :  { %v1872_v43 = vmul.f32 0.020833334, %v1865_v32 }
0x1674   :  { %v4012_v9 = vpop.f32.mrf.mxu1 }
0x1675   :  { %v1874_v11 = vadd.f32 %v1872_v43, %v5490_v6 }
0x1676   :  { %v1868_v55 = vpop.f32.mrf.mxu1 }
0x1677   :  { %v1873_v1 = vmul.f32 0.020833334, %v1868_v55  ;;  %v5622_v38 = vadd.f32 %v1874_v11, %v5084_v26 }
0x1678   :  { %v4013_v54 = vpop.f32.mrf.mxu1 }
0x1679   :  { %v1875_v2 = vadd.f32 %v1873_v1, %v5493_v58 }
0x167b   :  { %v5625_v3 = vadd.f32 %v1875_v2, %v5084_v26 }
0x167d   :  { %v1878_v4 = vpack.c.bf16 %v5625_v3, %v5622_v38 }
0x167f   :  { %4031 = vmatmul.mubr.bf16.vlgmr.msra.gmra.mxu0 %v1878_v4 }
0x1680   :  { %4055 = vmatpush3.bf16.msra.mxu0 %v4916_v13  ;;  %4070 = vmatprep.mubr.msk.bf16.mxu0 %vm4636_vm1, %v4635_v0 }
0x1681   :  { %4056 = vmatprep.subr.bf16.mxu0 %v4635_v0 }
0x1684   :  { %4057 = vmatpush3.bf16.msra.mxu0 %v4918_v16 }
0x1685   :  { %4058 = vmatprep.subr.bf16.mxu0 %v4635_v0 }
0x1688   :  { %4059 = vmatpush3.bf16.msra.mxu0 %v4924_v17 }
0x1689   :  { %4060 = vmatprep.subr.bf16.mxu0 %v4635_v0 }
0x168c   :  { %4061 = vmatpush3.bf16.msra.mxu0 %v4930_v18 }
0x168d   :  { %4062 = vmatprep.subr.bf16.mxu0 %v4635_v0 }
0x1690   :  { %4063 = vmatpush3.bf16.msra.mxu0 %v4936_v20 }
0x1691   :  { %4064 = vmatprep.subr.bf16.mxu0 %v4635_v0 }
0x1694   :  { %4065 = vmatpush3.bf16.msra.mxu0 %v4942_v21 }
0x1695   :  { %4066 = vmatprep.subr.bf16.mxu0 %v4635_v0 }
0x1698   :  { %4067 = vmatpush3.bf16.msra.mxu0 %v4948_v22 }
0x1699   :  { %4068 = vmatprep.subr.bf16.mxu0 %v4635_v0 }
0x169c   :  { %4069 = vmatpush3.bf16.msra.mxu0 %v4954_v25 }
0x169d   :  { %4094 = vmatprep.subr.bf16.mxu0 %v4635_v0 }
0x173f   :  { %v1913_v6 = vpop.f32.mrf.mxu0 }
0x1740   :  { %v5648_v58 = vadd.f32 %v5381_v35, %v1913_v6 }
0x1741   :  { %v4032_v31 = vpop.f32.mrf.mxu0 }
0x1742   :  { %v1922_v44 = vmul.f32 1.442695, %v5648_v58  ;;  %vm1920_vm14 = vcmp.gt.f32.partialorder %v5648_v58, 0.0 }
0x1743   :  { %v1916_v57 = vpop.f32.mrf.mxu0 }
0x1744   :  { %v5652_v5 = vadd.f32 %v5381_v35, %v1916_v57  ;;  %4446 = vpow2.f32 %v1922_v44 }
0x1745   :  { %v4033_v7 = vpop.f32.mrf.mxu0 }
0x1746   :  { %v1924_v27 = vmul.f32 1.442695, %v5652_v5  ;;  %vm1921_vm15 = vcmp.gt.f32.partialorder %v5652_v5, 0.0 }
0x1748   :  { %4448 = vpow2.f32 %v1924_v27 }
0x1751   :  { %v4447_v53 = vpop.eup %4446 }
0x1752   :  { %v2957_v59 = vadd.f32 -1.0, %v4447_v53 }
0x1754   :  { %v5658_v41 = vsel %vm1920_vm14, %v5648_v58, %v2957_v59 }
0x1755   :  { %v4449_v37 = vpop.eup %4448 }
0x1756   :  { %v2958_v10 = vadd.f32 -1.0, %v4449_v37 }
0x1758   :  { %v5661_v42 = vsel %vm1921_vm15, %v5652_v5, %v2958_v10 }
0x1759   :  { %v1930_v35 = vpack.c.bf16 %v5661_v42, %v5658_v41 }
0x175b   :  { %4051 = vmatmul.mubr.bf16.vlgmr.msra.gmra.mxu1 %v1930_v35 }
0x175c   :  { %4075 = vmatpush3.bf16.msra.mxu1 %v4916_v13  ;;  %4090 = vmatprep.mubr.msk.bf16.mxu1 %vm4636_vm1, %v4635_v0 }
0x175d   :  { %4076 = vmatprep.subr.bf16.mxu1 %v4635_v0 }
0x1760   :  { %4077 = vmatpush3.bf16.msra.mxu1 %v4918_v16 }
0x1761   :  { %4078 = vmatprep.subr.bf16.mxu1 %v4635_v0 }
0x1764   :  { %4079 = vmatpush3.bf16.msra.mxu1 %v4924_v17 }
0x1765   :  { %4080 = vmatprep.subr.bf16.mxu1 %v4635_v0 }
0x1768   :  { %4081 = vmatpush3.bf16.msra.mxu1 %v4930_v18 }
0x1769   :  { %4082 = vmatprep.subr.bf16.mxu1 %v4635_v0 }
0x176c   :  { %4083 = vmatpush3.bf16.msra.mxu1 %v4936_v20 }
0x176d   :  { %4084 = vmatprep.subr.bf16.mxu1 %v4635_v0 }
0x1770   :  { %4085 = vmatpush3.bf16.msra.mxu1 %v4942_v21 }
0x1771   :  { %4086 = vmatprep.subr.bf16.mxu1 %v4635_v0 }
0x1774   :  { %4087 = vmatpush3.bf16.msra.mxu1 %v4948_v22 }
0x1775   :  { %4088 = vmatprep.subr.bf16.mxu1 %v4635_v0 }
0x1778   :  { %4089 = vmatpush3.bf16.msra.mxu1 %v4954_v25 }
0x1779   :  { %4114 = vmatprep.subr.bf16.mxu1 %v4635_v0 }
0x181b   :  { %v1965_v12 = vpop.f32.mrf.mxu1 }
0x181c   :  { %v1966_v36 = vadd.f32 %v1965_v12, %v5011_v61 }
0x181d   :  { %v4052_v62 = vpop.f32.mrf.mxu1 }
0x181e   :  { %v1972_v63 = vmul.f32 0.0625, %v1966_v36 }
0x181f   :  { %v1968_v60 = vpop.f32.mrf.mxu1 }
0x1820   :  { %v1974_v30 = vadd.f32 %v1972_v63, %v5648_v58  ;;  %v1969_v39 = vadd.f32 %v1968_v60, %v5011_v61 }
0x1821   :  { %v4053_v40 = vpop.f32.mrf.mxu1 }
0x1822   :  { %v1978_v8 = vmul.f32 1.442695, %v1974_v30  ;;  %v1973_v29 = vmul.f32 0.0625, %v1969_v39  ;;  %vm1976_vm2 = vcmp.gt.f32.partialorder %v1974_v30, 0.0 }
0x1824   :  { %4450 = vpow2.f32 %v1978_v8  ;;  %v1975_v32 = vadd.f32 %v1973_v29, %v5652_v5 }
0x1826   :  { %v1980_v43 = vmul.f32 1.442695, %v1975_v32  ;;  %vm1977_vm3 = vcmp.gt.f32.partialorder %v1975_v32, 0.0 }
0x1828   :  { %4452 = vpow2.f32 %v1980_v43 }
0x1831   :  { %v4451_v9 = vpop.eup %4450 }
0x1832   :  { %v2959_v55 = vadd.f32 -1.0, %v4451_v9 }
0x1834   :  { %v1984_v54 = vsel %vm1976_vm2, %v1974_v30, %v2959_v55 }
0x1835   :  { %v4453_v11 = vpop.eup %4452  ;;  %v2098_v62 = vmul.f32 2.0, %v1984_v54 }
0x1836   :  { %v2960_v1 = vadd.f32 -1.0, %v4453_v11 }
0x1837   :  { %v2100_v39 = vadd.f32 %v2098_v62, %v5658_v41 }
0x1838   :  { %v1985_v2 = vsel %vm1977_vm3, %v1975_v32, %v2960_v1 }
0x1839   :  { %v1986_v4 = vpack.c.bf16 %v1985_v2, %v1984_v54  ;;  %v2099_v40 = vmul.f32 2.0, %v1985_v2 }
0x183b   :  { %4071 = vmatmul.mubr.bf16.vlgmr.msra.gmra.mxu0 %v1986_v4  ;;  %v2101_v9 = vadd.f32 %v2099_v40, %v5661_v42 }
0x183c   :  { %4095 = vmatpush3.bf16.msra.mxu0 %v4813_v34  ;;  %4110 = vmatprep.mubr.msk.bf16.mxu0 %vm4636_vm1, %v4635_v0 }
0x183d   :  { %4096 = vmatprep.subr.bf16.mxu0 %v4635_v0 }
0x1840   :  { %4097 = vmatpush3.bf16.msra.mxu0 %v4809_v33 }
0x1841   :  { %4098 = vmatprep.subr.bf16.mxu0 %v4635_v0 }
0x1844   :  { %4099 = vmatpush3.bf16.msra.mxu0 %v4795_v28 }
0x1845   :  { %4100 = vmatprep.subr.bf16.mxu0 %v4635_v0 }
0x1848   :  { %4101 = vmatpush3.bf16.msra.mxu0 %v4783_v24 }
0x1849   :  { %4102 = vmatprep.subr.bf16.mxu0 %v4635_v0 }
0x184c   :  { %4103 = vmatpush3.bf16.msra.mxu0 %v4779_v23 }
0x184d   :  { %4104 = vmatprep.subr.bf16.mxu0 %v4635_v0 }
0x1850   :  { %4105 = vmatpush3.bf16.msra.mxu0 %v4767_v19 }
0x1851   :  { %4106 = vmatprep.subr.bf16.mxu0 %v4635_v0 }
0x1854   :  { %4107 = vmatpush3.bf16.msra.mxu0 %v4755_v15 }
0x1855   :  { %4108 = vmatprep.subr.bf16.mxu0 %v4635_v0 }
0x1858   :  { %4109 = vmatpush3.bf16.msra.mxu0 %v4751_v14 }
0x1859   :  { %4134 = vmatprep.subr.bf16.mxu0 %v4635_v0 }
0x18fb   :  { %v2021_v6 = vpop.f32.mrf.mxu0 }
0x18fc   :  { %v2022_v31 = vadd.f32 %v2021_v6, %v5011_v61 }
0x18fd   :  { %v4072_v44 = vpop.f32.mrf.mxu0 }
0x18fe   :  { %v2028_v57 = vmul.f32 0.0625, %v2022_v31 }
0x18ff   :  { %v2024_v7 = vpop.f32.mrf.mxu0 }
0x1900   :  { %v2030_v27 = vadd.f32 %v2028_v57, %v5648_v58  ;;  %v2025_v53 = vadd.f32 %v2024_v7, %v5011_v61 }
0x1901   :  { %v4073_v59 = vpop.f32.mrf.mxu0 }
0x1902   :  { %v2034_v37 = vmul.f32 1.442695, %v2030_v27  ;;  %v2029_v10 = vmul.f32 0.0625, %v2025_v53  ;;  %vm2032_vm4 = vcmp.gt.f32.partialorder %v2030_v27, 0.0 }
0x1904   :  { %4454 = vpow2.f32 %v2034_v37  ;;  %v2031_v35 = vadd.f32 %v2029_v10, %v5652_v5 }
0x1906   :  { %v2036_v12 = vmul.f32 1.442695, %v2031_v35  ;;  %vm2033_vm5 = vcmp.gt.f32.partialorder %v2031_v35, 0.0 }
0x1908   :  { %4456 = vpow2.f32 %v2036_v12 }
0x1911   :  { %v4455_v36 = vpop.eup %4454 }
0x1912   :  { %v2961_v63 = vadd.f32 -1.0, %v4455_v36 }
0x1914   :  { %v2040_v60 = vsel %vm2032_vm4, %v2030_v27, %v2961_v63 }
0x1915   :  { %v4457_v30 = vpop.eup %4456  ;;  %v2102_v8 = vmul.f32 2.0, %v2040_v60 }
0x1916   :  { %v2962_v29 = vadd.f32 -1.0, %v4457_v30 }
0x1917   :  { %v2104_v32 = vadd.f32 %v2102_v8, %v2100_v39 }
0x1918   :  { %v2041_v43 = vsel %vm2033_vm5, %v2031_v35, %v2962_v29 }
0x1919   :  { %v2103_v55 = vmul.f32 2.0, %v2041_v43  ;;  %v2042_v11 = vpack.c.bf16 %v2041_v43, %v2040_v60 }
0x191b   :  { %4091 = vmatmul.mubr.bf16.vlgmr.msra.gmra.mxu1 %v2042_v11  ;;  %v2105_v1 = vadd.f32 %v2103_v55, %v2101_v9 }
0x191c   :  { %4115 = vmatpush3.bf16.msra.mxu1 %v4839_v45  ;;  %4130 = vmatprep.mubr.msk.bf16.mxu1 %vm4636_vm1, %v4635_v0 }
0x191d   :  { %4116 = vmatprep.subr.bf16.mxu1 %v4635_v0 }
0x1920   :  { %4117 = vmatpush3.bf16.msra.mxu1 %v4846_v46 }
0x1921   :  { %4118 = vmatprep.subr.bf16.mxu1 %v4635_v0 }
0x1924   :  { %4119 = vmatpush3.bf16.msra.mxu1 %v4854_v47 }
0x1925   :  { %4120 = vmatprep.subr.bf16.mxu1 %v4635_v0 }
0x1928   :  { %4121 = vmatpush3.bf16.msra.mxu1 %v4861_v48 }
0x1929   :  { %4122 = vmatprep.subr.bf16.mxu1 %v4635_v0 }
0x192c   :  { %4123 = vmatpush3.bf16.msra.mxu1 %v4867_v49 }
0x192d   :  { %4124 = vmatprep.subr.bf16.mxu1 %v4635_v0 }
0x1930   :  { %4125 = vmatpush3.bf16.msra.mxu1 %v4873_v50 }
0x1931   :  { %4126 = vmatprep.subr.bf16.mxu1 %v4635_v0 }
0x1934   :  { %4127 = vmatpush3.bf16.msra.mxu1 %v4879_v51 }
0x1935   :  { %4128 = vmatprep.subr.bf16.mxu1 %v4635_v0 }
0x1938   :  { %4129 = vmatpush3.bf16.msra.mxu1 %v4885_v52 }
0x1939   :  { %4154 = vmatprep.subr.bf16.mxu1 %v4635_v0 }
0x19db   :  { %v2077_v41 = vpop.f32.mrf.mxu1 }
0x19dc   :  { %v2078_v42 = vadd.f32 %v2077_v41, %v5011_v61 }
0x19dd   :  { %v4092_v54 = vpop.f32.mrf.mxu1 }
0x19de   :  { %v2084_v2 = vmul.f32 0.125, %v2078_v42 }
0x19df   :  { %v2080_v4 = vpop.f32.mrf.mxu1 }
0x19e0   :  { %v2086_v6 = vadd.f32 %v2084_v2, %v5648_v58  ;;  %v2081_v31 = vadd.f32 %v2080_v4, %v5011_v61 }
0x19e1   :  { %v4093_v44 = vpop.f32.mrf.mxu1 }
0x19e2   :  { %v2090_v57 = vmul.f32 1.442695, %v2086_v6  ;;  %v2085_v7 = vmul.f32 0.125, %v2081_v31  ;;  %vm2088_vm6 = vcmp.gt.f32.partialorder %v2086_v6, 0.0 }
0x19e4   :  { %4458 = vpow2.f32 %v2090_v57  ;;  %v2087_v27 = vadd.f32 %v2085_v7, %v5652_v5 }
0x19e6   :  { %v2092_v53 = vmul.f32 1.442695, %v2087_v27  ;;  %vm2089_vm7 = vcmp.gt.f32.partialorder %v2087_v27, 0.0 }
0x19e8   :  { %4460 = vpow2.f32 %v2092_v53 }
0x19f1   :  { %v4459_v59 = vpop.eup %4458 }
0x19f2   :  { %v2963_v37 = vadd.f32 -1.0, %v4459_v59 }
0x19f4   :  { %v2096_v35 = vsel %vm2088_vm6, %v2086_v6, %v2963_v37 }
0x19f5   :  { %v4461_v10 = vpop.eup %4460  ;;  %v2106_v62 = vadd.f32 %v2104_v32, %v2096_v35 }
0x19f6   :  { %v2964_v12 = vadd.f32 -1.0, %v4461_v10 }
0x19f8   :  { %v2097_v36 = vsel %vm2089_vm7, %v2087_v27, %v2964_v12 }
0x19f9   :  { %v2107_v58 = vadd.f32 %v2105_v1, %v2097_v36 }
0x19fb   :  { %v2108_v63 = vpack.c.bf16 %v2107_v58, %v2106_v62 }
0x19fd   :  { %4111 = vmatmul.mubr.bf16.vlgmr.msra.gmra.mxu0 %v2108_v63 }
0x19fe   :  { %4135 = vmatpush3.bf16.msra.mxu0 %v4916_v13  ;;  %4150 = vmatprep.mubr.msk.bf16.mxu0 %vm4636_vm1, %v4635_v0 }
0x19ff   :  { %4136 = vmatprep.subr.bf16.mxu0 %v4635_v0 }
0x1a02   :  { %4137 = vmatpush3.bf16.msra.mxu0 %v4918_v16 }
0x1a03   :  { %4138 = vmatprep.subr.bf16.mxu0 %v4635_v0 }
0x1a06   :  { %4139 = vmatpush3.bf16.msra.mxu0 %v4924_v17 }
0x1a07   :  { %4140 = vmatprep.subr.bf16.mxu0 %v4635_v0 }
0x1a0a   :  { %4141 = vmatpush3.bf16.msra.mxu0 %v4930_v18 }
0x1a0b   :  { %4142 = vmatprep.subr.bf16.mxu0 %v4635_v0 }
0x1a0e   :  { %4143 = vmatpush3.bf16.msra.mxu0 %v4936_v20 }
0x1a0f   :  { %4144 = vmatprep.subr.bf16.mxu0 %v4635_v0 }
0x1a12   :  { %4145 = vmatpush3.bf16.msra.mxu0 %v4942_v21 }
0x1a13   :  { %4146 = vmatprep.subr.bf16.mxu0 %v4635_v0 }
0x1a16   :  { %4147 = vmatpush3.bf16.msra.mxu0 %v4948_v22 }
0x1a17   :  { %4148 = vmatprep.subr.bf16.mxu0 %v4635_v0 }
0x1a1a   :  { %4149 = vmatpush3.bf16.msra.mxu0 %v4954_v25 }
0x1a1b   :  { %4174 = vmatprep.subr.bf16.mxu0 %v4635_v0 }
0x1abd   :  { %v2143_v5 = vpop.f32.mrf.mxu0 }
0x1abe   :  { %v2150_v60 = vmul.f32 0.020833334, %v2143_v5 }
0x1abf   :  { %v4112_v30 = vpop.f32.mrf.mxu0 }
0x1ac0   :  { %v2152_v40 = vadd.f32 %v2150_v60, %v5622_v38 }
0x1ac1   :  { %v2146_v39 = vpop.f32.mrf.mxu0 }
0x1ac2   :  { %v2151_v8 = vmul.f32 0.020833334, %v2146_v39  ;;  %v5754_v43 = vadd.f32 %v2152_v40, %v5084_v26 }
0x1ac3   :  { %v4113_v29 = vpop.f32.mrf.mxu0 }
0x1ac4   :  { %v2153_v32 = vadd.f32 %v2151_v8, %v5625_v3  ;;  %v5782_v3 = vld [vmem:[%s6023_s4] ss:$0 sm:$0xff] }
0x1ac6   :  { %v5757_v9 = vadd.f32 %v2153_v32, %v5084_v26 }
0x1ac8   :  { %v2156_v55 = vpack.c.bf16 %v5757_v9, %v5754_v43 }
0x1aca   :  { %4131 = vmatmul.mubr.bf16.vlgmr.msra.gmra.mxu1 %v2156_v55 }
0x1acb   :  { %4155 = vmatpush3.bf16.msra.mxu1 %v4916_v13  ;;  %4170 = vmatprep.mubr.msk.bf16.mxu1 %vm4636_vm1, %v4635_v0 }
0x1acc   :  { %4156 = vmatprep.subr.bf16.mxu1 %v4635_v0 }
0x1acf   :  { %4157 = vmatpush3.bf16.msra.mxu1 %v4918_v16 }
0x1ad0   :  { %4158 = vmatprep.subr.bf16.mxu1 %v4635_v0 }
0x1ad3   :  { %4159 = vmatpush3.bf16.msra.mxu1 %v4924_v17 }
0x1ad4   :  { %4160 = vmatprep.subr.bf16.mxu1 %v4635_v0 }
0x1ad7   :  { %4161 = vmatpush3.bf16.msra.mxu1 %v4930_v18 }
0x1ad8   :  { %4162 = vmatprep.subr.bf16.mxu1 %v4635_v0 }
0x1adb   :  { %4163 = vmatpush3.bf16.msra.mxu1 %v4936_v20 }
0x1adc   :  { %4164 = vmatprep.subr.bf16.mxu1 %v4635_v0 }
0x1adf   :  { %4165 = vmatpush3.bf16.msra.mxu1 %v4942_v21 }
0x1ae0   :  { %4166 = vmatprep.subr.bf16.mxu1 %v4635_v0 }
0x1ae3   :  { %4167 = vmatpush3.bf16.msra.mxu1 %v4948_v22 }
0x1ae4   :  { %4168 = vmatprep.subr.bf16.mxu1 %v4635_v0 }
0x1ae7   :  { %4169 = vmatpush3.bf16.msra.mxu1 %v4954_v25 }
0x1ae8   :  { %4194 = vmatprep.subr.bf16.mxu1 %v4635_v0 }
0x1b8a   :  { %v2191_v38 = vpop.f32.mrf.mxu1 }
0x1b8b   :  { %v5785_v11 = vadd.f32 %v5782_v3, %v2191_v38 }
0x1b8c   :  { %v4132_v1 = vpop.f32.mrf.mxu1 }
0x1b8d   :  { %v2200_v41 = vmul.f32 1.442695, %v5785_v11  ;;  %vm2198_vm8 = vcmp.gt.f32.partialorder %v5785_v11, 0.0 }
0x1b8e   :  { %v2194_v42 = vpop.f32.mrf.mxu1 }
0x1b8f   :  { %v5789_v54 = vadd.f32 %v5782_v3, %v2194_v42  ;;  %4462 = vpow2.f32 %v2200_v41 }
0x1b90   :  { %v4133_v2 = vpop.f32.mrf.mxu1 }
0x1b91   :  { %v2202_v4 = vmul.f32 1.442695, %v5789_v54  ;;  %vm2199_vm9 = vcmp.gt.f32.partialorder %v5789_v54, 0.0 }
0x1b93   :  { %4464 = vpow2.f32 %v2202_v4 }
0x1b9c   :  { %v4463_v6 = vpop.eup %4462 }
0x1b9d   :  { %v2965_v31 = vadd.f32 -1.0, %v4463_v6 }
0x1b9f   :  { %v5795_v7 = vsel %vm2198_vm8, %v5785_v11, %v2965_v31 }
0x1ba0   :  { %v4465_v44 = vpop.eup %4464 }
0x1ba1   :  { %v2966_v57 = vadd.f32 -1.0, %v4465_v44 }
0x1ba3   :  { %v5798_v27 = vsel %vm2199_vm9, %v5789_v54, %v2966_v57 }
0x1ba4   :  { %v2208_v53 = vpack.c.bf16 %v5798_v27, %v5795_v7 }
0x1ba6   :  { %4151 = vmatmul.mubr.bf16.vlgmr.msra.gmra.mxu0 %v2208_v53 }
0x1ba7   :  { %4175 = vmatpush3.bf16.msra.mxu0 %v4916_v13  ;;  %4190 = vmatprep.mubr.msk.bf16.mxu0 %vm4636_vm1, %v4635_v0 }
0x1ba8   :  { %4176 = vmatprep.subr.bf16.mxu0 %v4635_v0 }
0x1bab   :  { %4177 = vmatpush3.bf16.msra.mxu0 %v4918_v16 }
0x1bac   :  { %4178 = vmatprep.subr.bf16.mxu0 %v4635_v0 }
0x1baf   :  { %4179 = vmatpush3.bf16.msra.mxu0 %v4924_v17 }
0x1bb0   :  { %4180 = vmatprep.subr.bf16.mxu0 %v4635_v0 }
0x1bb3   :  { %4181 = vmatpush3.bf16.msra.mxu0 %v4930_v18 }
0x1bb4   :  { %4182 = vmatprep.subr.bf16.mxu0 %v4635_v0 }
0x1bb7   :  { %4183 = vmatpush3.bf16.msra.mxu0 %v4936_v20 }
0x1bb8   :  { %4184 = vmatprep.subr.bf16.mxu0 %v4635_v0 }
0x1bbb   :  { %4185 = vmatpush3.bf16.msra.mxu0 %v4942_v21 }
0x1bbc   :  { %4186 = vmatprep.subr.bf16.mxu0 %v4635_v0 }
0x1bbf   :  { %4187 = vmatpush3.bf16.msra.mxu0 %v4948_v22 }
0x1bc0   :  { %4188 = vmatprep.subr.bf16.mxu0 %v4635_v0 }
0x1bc3   :  { %4189 = vmatpush3.bf16.msra.mxu0 %v4954_v25 }
0x1bc4   :  { %4214 = vmatprep.subr.bf16.mxu0 %v4635_v0 }
0x1c66   :  { %v2243_v59 = vpop.f32.mrf.mxu0 }
0x1c67   :  { %v2244_v37 = vadd.f32 %v2243_v59, %v5011_v61 }
0x1c68   :  { %v4152_v10 = vpop.f32.mrf.mxu0 }
0x1c69   :  { %v2250_v35 = vmul.f32 0.0625, %v2244_v37 }
0x1c6a   :  { %v2246_v12 = vpop.f32.mrf.mxu0 }
0x1c6b   :  { %v2252_v36 = vadd.f32 %v2250_v35, %v5785_v11  ;;  %v2247_v62 = vadd.f32 %v2246_v12, %v5011_v61 }
0x1c6c   :  { %v4153_v58 = vpop.f32.mrf.mxu0 }
0x1c6d   :  { %v2256_v63 = vmul.f32 1.442695, %v2252_v36  ;;  %v2251_v5 = vmul.f32 0.0625, %v2247_v62  ;;  %vm2254_vm10 = vcmp.gt.f32.partialorder %v2252_v36, 0.0 }
0x1c6f   :  { %4466 = vpow2.f32 %v2256_v63  ;;  %v2253_v60 = vadd.f32 %v2251_v5, %v5789_v54 }
0x1c71   :  { %v2258_v30 = vmul.f32 1.442695, %v2253_v60  ;;  %vm2255_vm11 = vcmp.gt.f32.partialorder %v2253_v60, 0.0 }
0x1c73   :  { %4468 = vpow2.f32 %v2258_v30 }
0x1c7c   :  { %v4467_v39 = vpop.eup %4466 }
0x1c7d   :  { %v2967_v40 = vadd.f32 -1.0, %v4467_v39 }
0x1c7f   :  { %v2262_v32 = vsel %vm2254_vm10, %v2252_v36, %v2967_v40  ;;  %vm2883_vm10 = vcmask 1041408  }
0x1c80   :  { %v4469_v8 = vpop.eup %4468  ;;  %v2376_v35 = vmul.f32 2.0, %v2262_v32 }
0x1c81   :  { %v2968_v29 = vadd.f32 -1.0, %v4469_v8 }
0x1c82   :  { %v2378_v58 = vadd.f32 %v2376_v35, %v5795_v7 }
0x1c83   :  { %v2263_v55 = vsel %vm2255_vm11, %v2253_v60, %v2968_v29 }
0x1c84   :  { %v2264_v38 = vpack.c.bf16 %v2263_v55, %v2262_v32  ;;  %v2377_v63 = vmul.f32 2.0, %v2263_v55 }
0x1c86   :  { %4171 = vmatmul.mubr.bf16.vlgmr.msra.gmra.mxu1 %v2264_v38  ;;  %v2379_v40 = vadd.f32 %v2377_v63, %v5798_v27 }
0x1c87   :  { %4195 = vmatpush3.bf16.msra.mxu1 %v4813_v34  ;;  %4210 = vmatprep.mubr.msk.bf16.mxu1 %vm4636_vm1, %v4635_v0 }
0x1c88   :  { %4196 = vmatprep.subr.bf16.mxu1 %v4635_v0 }
0x1c8b   :  { %4197 = vmatpush3.bf16.msra.mxu1 %v4809_v33 }
0x1c8c   :  { %4198 = vmatprep.subr.bf16.mxu1 %v4635_v0 }
0x1c8f   :  { %4199 = vmatpush3.bf16.msra.mxu1 %v4795_v28 }
0x1c90   :  { %4200 = vmatprep.subr.bf16.mxu1 %v4635_v0 }
0x1c93   :  { %4201 = vmatpush3.bf16.msra.mxu1 %v4783_v24 }
0x1c94   :  { %4202 = vmatprep.subr.bf16.mxu1 %v4635_v0 }
0x1c97   :  { %4203 = vmatpush3.bf16.msra.mxu1 %v4779_v23 }
0x1c98   :  { %4204 = vmatprep.subr.bf16.mxu1 %v4635_v0 }
0x1c9b   :  { %4205 = vmatpush3.bf16.msra.mxu1 %v4767_v19 }
0x1c9c   :  { %4206 = vmatprep.subr.bf16.mxu1 %v4635_v0 }
0x1c9f   :  { %4207 = vmatpush3.bf16.msra.mxu1 %v4755_v15 }
0x1ca0   :  { %4208 = vmatprep.subr.bf16.mxu1 %v4635_v0 }
0x1ca3   :  { %4209 = vmatpush3.bf16.msra.mxu1 %v4751_v14 }
0x1ca4   :  { %4234 = vmatprep.subr.bf16.mxu1 %v4635_v0 }
0x1d46   :  { %v2299_v1 = vpop.f32.mrf.mxu1 }
0x1d47   :  { %v2300_v41 = vadd.f32 %v2299_v1, %v5011_v61 }
0x1d48   :  { %v4172_v42 = vpop.f32.mrf.mxu1 }
0x1d49   :  { %v2306_v2 = vmul.f32 0.0625, %v2300_v41 }
0x1d4a   :  { %v2302_v4 = vpop.f32.mrf.mxu1 }
0x1d4b   :  { %v2308_v6 = vadd.f32 %v2306_v2, %v5785_v11  ;;  %v2303_v31 = vadd.f32 %v2302_v4, %v5011_v61 }
0x1d4c   :  { %v4173_v44 = vpop.f32.mrf.mxu1 }
0x1d4d   :  { %v2312_v57 = vmul.f32 1.442695, %v2308_v6  ;;  %v2307_v53 = vmul.f32 0.0625, %v2303_v31  ;;  %vm2310_vm12 = vcmp.gt.f32.partialorder %v2308_v6, 0.0 }
0x1d4f   :  { %4470 = vpow2.f32 %v2312_v57  ;;  %v2309_v59 = vadd.f32 %v2307_v53, %v5789_v54 }
0x1d51   :  { %v2314_v37 = vmul.f32 1.442695, %v2309_v59  ;;  %vm2311_vm13 = vcmp.gt.f32.partialorder %v2309_v59, 0.0 }
0x1d53   :  { %4472 = vpow2.f32 %v2314_v37 }
0x1d5c   :  { %v4471_v10 = vpop.eup %4470 }
0x1d5d   :  { %v2969_v12 = vadd.f32 -1.0, %v4471_v10 }
0x1d5f   :  { %v2318_v36 = vsel %vm2310_vm12, %v2308_v6, %v2969_v12 }
0x1d60   :  { %v4473_v62 = vpop.eup %4472  ;;  %v2380_v5 = vmul.f32 2.0, %v2318_v36 }
0x1d61   :  { %v2970_v60 = vadd.f32 -1.0, %v4473_v62 }
0x1d62   :  { %v2382_v30 = vadd.f32 %v2380_v5, %v2378_v58 }
0x1d63   :  { %v2319_v39 = vsel %vm2311_vm13, %v2309_v59, %v2970_v60 }
0x1d64   :  { %v2381_v8 = vmul.f32 2.0, %v2319_v39  ;;  %v2320_v29 = vpack.c.bf16 %v2319_v39, %v2318_v36 }
0x1d66   :  { %4191 = vmatmul.mubr.bf16.vlgmr.msra.gmra.mxu0 %v2320_v29  ;;  %v2383_v38 = vadd.f32 %v2381_v8, %v2379_v40 }
0x1d67   :  { %4215 = vmatpush3.bf16.msra.mxu0 %v4839_v45  ;;  %4230 = vmatprep.mubr.msk.bf16.mxu0 %vm4636_vm1, %v4635_v0 }
0x1d68   :  { %4216 = vmatprep.subr.bf16.mxu0 %v4635_v0 }
0x1d6b   :  { %4217 = vmatpush3.bf16.msra.mxu0 %v4846_v46 }
0x1d6c   :  { %4218 = vmatprep.subr.bf16.mxu0 %v4635_v0 }
0x1d6f   :  { %4219 = vmatpush3.bf16.msra.mxu0 %v4854_v47 }
0x1d70   :  { %4220 = vmatprep.subr.bf16.mxu0 %v4635_v0 }
0x1d73   :  { %4221 = vmatpush3.bf16.msra.mxu0 %v4861_v48 }
0x1d74   :  { %4222 = vmatprep.subr.bf16.mxu0 %v4635_v0 }
0x1d77   :  { %4223 = vmatpush3.bf16.msra.mxu0 %v4867_v49 }
0x1d78   :  { %4224 = vmatprep.subr.bf16.mxu0 %v4635_v0 }
0x1d7b   :  { %4225 = vmatpush3.bf16.msra.mxu0 %v4873_v50 }
0x1d7c   :  { %4226 = vmatprep.subr.bf16.mxu0 %v4635_v0 }
0x1d7f   :  { %4227 = vmatpush3.bf16.msra.mxu0 %v4879_v51 }
0x1d80   :  { %4228 = vmatprep.subr.bf16.mxu0 %v4635_v0 }
0x1d83   :  { %4229 = vmatpush3.bf16.msra.mxu0 %v4885_v52 }
0x1d84   :  { %4254 = vmatprep.subr.bf16.mxu0 %v4635_v0 }
0x1e26   :  { %v2355_v45 = vpop.f32.mrf.mxu0 }
0x1e27   :  { %v2356_v46 = vadd.f32 %v2355_v45, %v5011_v61 }
0x1e28   :  { %v4192_v47 = vpop.f32.mrf.mxu0 }
0x1e29   :  { %v2362_v48 = vmul.f32 0.125, %v2356_v46 }
0x1e2a   :  { %v2358_v49 = vpop.f32.mrf.mxu0 }
0x1e2b   :  { %v2364_v7 = vadd.f32 %v2362_v48, %v5785_v11  ;;  %v2359_v50 = vadd.f32 %v2358_v49, %v5011_v61 }
0x1e2c   :  { %v4193_v27 = vpop.f32.mrf.mxu0 }
0x1e2d   :  { %v2368_v32 = vmul.f32 1.442695, %v2364_v7  ;;  %v2363_v55 = vmul.f32 0.125, %v2359_v50  ;;  %vm2366_vm14 = vcmp.gt.f32.partialorder %v2364_v7, 0.0 }
0x1e2f   :  { %4474 = vpow2.f32 %v2368_v32  ;;  %v2365_v51 = vadd.f32 %v2363_v55, %v5789_v54 }
0x1e31   :  { %v2370_v1 = vmul.f32 1.442695, %v2365_v51  ;;  %vm2367_vm15 = vcmp.gt.f32.partialorder %v2365_v51, 0.0 }
0x1e33   :  { %4476 = vpow2.f32 %v2370_v1 }
0x1e3c   :  { %v4475_v52 = vpop.eup %4474 }
0x1e3d   :  { %v2971_v41 = vadd.f32 -1.0, %v4475_v52 }
0x1e3f   :  { %v2374_v2 = vsel %vm2366_vm14, %v2364_v7, %v2971_v41 }
0x1e40   :  { %v4477_v42 = vpop.eup %4476  ;;  %v2384_v31 = vadd.f32 %v2382_v30, %v2374_v2 }
0x1e41   :  { %v2972_v4 = vadd.f32 -1.0, %v4477_v42 }
0x1e43   :  { %v2375_v6 = vsel %vm2367_vm15, %v2365_v51, %v2972_v4 }
0x1e44   :  { %v2385_v11 = vadd.f32 %v2383_v38, %v2375_v6 }
0x1e46   :  { %v2386_v44 = vpack.c.bf16 %v2385_v11, %v2384_v31 }
0x1e48   :  { %4211 = vmatmul.mubr.bf16.vlgmr.msra.gmra.mxu1 %v2386_v44 }
0x1e49   :  { %4235 = vmatpush3.bf16.msra.mxu1 %v4916_v13  ;;  %4250 = vmatprep.mubr.msk.bf16.mxu1 %vm4636_vm1, %v4635_v0 }
0x1e4a   :  { %4236 = vmatprep.subr.bf16.mxu1 %v4635_v0 }
0x1e4d   :  { %4237 = vmatpush3.bf16.msra.mxu1 %v4918_v16 }
0x1e4e   :  { %4238 = vmatprep.subr.bf16.mxu1 %v4635_v0 }
0x1e51   :  { %4239 = vmatpush3.bf16.msra.mxu1 %v4924_v17 }
0x1e52   :  { %4240 = vmatprep.subr.bf16.mxu1 %v4635_v0 }
0x1e55   :  { %4241 = vmatpush3.bf16.msra.mxu1 %v4930_v18 }
0x1e56   :  { %4242 = vmatprep.subr.bf16.mxu1 %v4635_v0 }
0x1e59   :  { %4243 = vmatpush3.bf16.msra.mxu1 %v4936_v20 }
0x1e5a   :  { %4244 = vmatprep.subr.bf16.mxu1 %v4635_v0 }
0x1e5d   :  { %4245 = vmatpush3.bf16.msra.mxu1 %v4942_v21 }
0x1e5e   :  { %4246 = vmatprep.subr.bf16.mxu1 %v4635_v0 }
0x1e61   :  { %4247 = vmatpush3.bf16.msra.mxu1 %v4948_v22 }
0x1e62   :  { %4248 = vmatprep.subr.bf16.mxu1 %v4635_v0 }
0x1e65   :  { %4249 = vmatpush3.bf16.msra.mxu1 %v4954_v25 }
0x1e66   :  { %4274 = vmatprep.subr.bf16.mxu1 %v4635_v0 }
0x1f08   :  { %v2421_v54 = vpop.f32.mrf.mxu1 }
0x1f09   :  { %v2428_v57 = vmul.f32 0.020833334, %v2421_v54 }
0x1f0a   :  { %v4212_v53 = vpop.f32.mrf.mxu1 }
0x1f0b   :  { %v2430_v37 = vadd.f32 %v2428_v57, %v5754_v43 }
0x1f0c   :  { %v2424_v59 = vpop.f32.mrf.mxu1 }
0x1f0d   :  { %v2429_v10 = vmul.f32 0.020833334, %v2424_v59  ;;  %v5891_v36 = vadd.f32 %v2430_v37, %v5084_v26 }
0x1f0e   :  { %v4213_v35 = vpop.f32.mrf.mxu1 }
0x1f0f   :  { %v2431_v12 = vadd.f32 %v2429_v10, %v5757_v9 }
0x1f11   :  { %v5894_v62 = vadd.f32 %v2431_v12, %v5084_v26 }
0x1f13   :  { %v2434_v58 = vpack.c.bf16 %v5894_v62, %v5891_v36 }
0x1f15   :  { %4231 = vmatmul.mubr.bf16.vlgmr.msra.gmra.mxu0 %v2434_v58 }
0x1f16   :  { %4255 = vmatpush3.bf16.msra.mxu0 %v4916_v13  ;;  %4270 = vmatprep.mubr.msk.bf16.mxu0 %vm4636_vm1, %v4635_v0 }
0x1f17   :  { %4256 = vmatprep.subr.bf16.mxu0 %v4635_v0 }
0x1f1a   :  { %4257 = vmatpush3.bf16.msra.mxu0 %v4918_v16 }
0x1f1b   :  { %4258 = vmatprep.subr.bf16.mxu0 %v4635_v0 }
0x1f1e   :  { %4259 = vmatpush3.bf16.msra.mxu0 %v4924_v17 }
0x1f1f   :  { %4260 = vmatprep.subr.bf16.mxu0 %v4635_v0 }
0x1f22   :  { %4261 = vmatpush3.bf16.msra.mxu0 %v4930_v18 }
0x1f23   :  { %4262 = vmatprep.subr.bf16.mxu0 %v4635_v0 }
0x1f26   :  { %4263 = vmatpush3.bf16.msra.mxu0 %v4936_v20 }
0x1f27   :  { %4264 = vmatprep.subr.bf16.mxu0 %v4635_v0 }
0x1f2a   :  { %4265 = vmatpush3.bf16.msra.mxu0 %v4942_v21 }
0x1f2b   :  { %4266 = vmatprep.subr.bf16.mxu0 %v4635_v0 }
0x1f2e   :  { %4267 = vmatpush3.bf16.msra.mxu0 %v4948_v22 }
0x1f2f   :  { %4268 = vmatprep.subr.bf16.mxu0 %v4635_v0 }
0x1f32   :  { %4269 = vmatpush3.bf16.msra.mxu0 %v4954_v25 }
0x1f33   :  { %4294 = vmatprep.subr.bf16.mxu0 %v4635_v0 }
0x1fd5   :  { %v2469_v43 = vpop.f32.mrf.mxu0 }
0x1fd6   :  { %v5917_v9 = vadd.f32 %v5782_v3, %v2469_v43 }
0x1fd7   :  { %v4232_v63 = vpop.f32.mrf.mxu0 }
0x1fd8   :  { %v2478_v5 = vmul.f32 1.442695, %v5917_v9  ;;  %vm2476_vm2 = vcmp.gt.f32.partialorder %v5917_v9, 0.0 }
0x1fd9   :  { %v2472_v60 = vpop.f32.mrf.mxu0 }
0x1fda   :  { %v5921_v30 = vadd.f32 %v5782_v3, %v2472_v60  ;;  %4478 = vpow2.f32 %v2478_v5 }
0x1fdb   :  { %v4233_v39 = vpop.f32.mrf.mxu0 }
0x1fdc   :  { %v2480_v40 = vmul.f32 1.442695, %v5921_v30  ;;  %vm2477_vm3 = vcmp.gt.f32.partialorder %v5921_v30, 0.0 }
0x1fde   :  { %4480 = vpow2.f32 %v2480_v40 }
0x1fe7   :  { %v4479_v8 = vpop.eup %4478 }
0x1fe8   :  { %v2973_v29 = vadd.f32 -1.0, %v4479_v8 }
0x1fea   :  { %v5927_v46 = vsel %vm2476_vm2, %v5917_v9, %v2973_v29 }
0x1feb   :  { %v4481_v38 = vpop.eup %4480 }
0x1fec   :  { %v2974_v45 = vadd.f32 -1.0, %v4481_v38 }
0x1fee   :  { %v5930_v47 = vsel %vm2477_vm3, %v5921_v30, %v2974_v45 }
0x1fef   :  { %v2486_v3 = vpack.c.bf16 %v5930_v47, %v5927_v46 }
0x1ff1   :  { %4251 = vmatmul.mubr.bf16.vlgmr.msra.gmra.mxu1 %v2486_v3 }
0x1ff2   :  { %4275 = vmatpush3.bf16.msra.mxu1 %v4916_v13  ;;  %4290 = vmatprep.mubr.msk.bf16.mxu1 %vm4636_vm1, %v4635_v0 }
0x1ff3   :  { %4276 = vmatprep.subr.bf16.mxu1 %v4635_v0 }
0x1ff6   :  { %4277 = vmatpush3.bf16.msra.mxu1 %v4918_v16 }
0x1ff7   :  { %4278 = vmatprep.subr.bf16.mxu1 %v4635_v0 }
0x1ffa   :  { %4279 = vmatpush3.bf16.msra.mxu1 %v4924_v17 }
0x1ffb   :  { %4280 = vmatprep.subr.bf16.mxu1 %v4635_v0 }
0x1ffe   :  { %4281 = vmatpush3.bf16.msra.mxu1 %v4930_v18 }
0x1fff   :  { %4282 = vmatprep.subr.bf16.mxu1 %v4635_v0 }
0x2002   :  { %4283 = vmatpush3.bf16.msra.mxu1 %v4936_v20 }
0x2003   :  { %4284 = vmatprep.subr.bf16.mxu1 %v4635_v0 }
0x2006   :  { %4285 = vmatpush3.bf16.msra.mxu1 %v4942_v21 }
0x2007   :  { %4286 = vmatprep.subr.bf16.mxu1 %v4635_v0 }
0x200a   :  { %4287 = vmatpush3.bf16.msra.mxu1 %v4948_v22 }
0x200b   :  { %4288 = vmatprep.subr.bf16.mxu1 %v4635_v0 }
0x200e   :  { %4289 = vmatpush3.bf16.msra.mxu1 %v4954_v25 }
0x200f   :  { %4314 = vmatprep.subr.mxu1 %v4635_v0 }
0x20b1   :  { %v2521_v13 = vpop.f32.mrf.mxu1 }
0x20b2   :  { %v2522_v16 = vadd.f32 %v2521_v13, %v5011_v61 }
0x20b3   :  { %v4252_v17 = vpop.f32.mrf.mxu1 }
0x20b4   :  { %v2528_v18 = vmul.f32 0.0625, %v2522_v16 }
0x20b5   :  { %v2524_v20 = vpop.f32.mrf.mxu1 }
0x20b6   :  { %v2530_v48 = vadd.f32 %v2528_v18, %v5917_v9  ;;  %v2525_v21 = vadd.f32 %v2524_v20, %v5011_v61 }
0x20b7   :  { %v4253_v49 = vpop.f32.mrf.mxu1 }
0x20b8   :  { %v2534_v7 = vmul.f32 1.442695, %v2530_v48  ;;  %v2529_v50 = vmul.f32 0.0625, %v2525_v21  ;;  %vm2532_vm4 = vcmp.gt.f32.partialorder %v2530_v48, 0.0 }
0x20ba   :  { %4482 = vpow2.f32 %v2534_v7  ;;  %v2531_v22 = vadd.f32 %v2529_v50, %v5921_v30 }
0x20bc   :  { %v2536_v27 = vmul.f32 1.442695, %v2531_v22  ;;  %vm2533_vm5 = vcmp.gt.f32.partialorder %v2531_v22, 0.0 }
0x20be   :  { %4484 = vpow2.f32 %v2536_v27  ;;  %v2798_v27 = vld [vmem:[#allocation10 + $0x60] sm:$0xff] }
0x20c7   :  { %v4483_v25 = vpop.eup %4482 }
0x20c8   :  { %v2975_v32 = vadd.f32 -1.0, %v4483_v25  ;;  %v2797_v25 = vld [vmem:[#allocation10 + $0x58] sm:$0xff] }
0x20ca   :  { %v2540_v1 = vsel %vm2532_vm4, %v2530_v48, %v2975_v32  ;;  %v2796_v32 = vld [vmem:[#allocation10 + $0x50] sm:$0xff] }
0x20cb   :  { %v4485_v55 = vpop.eup %4484  ;;  %v2654_v11 = vmul.f32 2.0, %v2540_v1 }
0x20cc   :  { %v2976_v51 = vadd.f32 -1.0, %v4485_v55  ;;  %v2795_v55 = vld [vmem:[#allocation10 + $0x48] sm:$0xff] }
0x20cd   :  { %v2656_v53 = vadd.f32 %v2654_v11, %v5927_v46 }
0x20ce   :  { %v2541_v52 = vsel %vm2533_vm5, %v2531_v22, %v2976_v51  ;;  %v2800_v22 = vld [vmem:[#allocation10 + $0x70] sm:$0xff]  ;;  %v2794_v51 = vld [vmem:[#allocation10 + $0x40] sm:$0xff] }
0x20cf   :  { %v2542_v41 = vpack.c.bf16 %v2541_v52, %v2540_v1  ;;  %v2655_v59 = vmul.f32 2.0, %v2541_v52  ;;  %v2793_v1 = vld [vmem:[#allocation10 + $0x38] sm:$0xff]  ;;  %v2792_v52 = vld [vmem:[#allocation10 + $0x30] sm:$0xff] }
0x20d1   :  { %4271 = vmatmul.mubr.bf16.vlgmr.msra.gmra.mxu0 %v2542_v41  ;;  %v2657_v58 = vadd.f32 %v2655_v59, %v5930_v47  ;;  %v2791_v41 = vld [vmem:[#allocation10 + $0x28] sm:$0xff] }
0x20d2   :  { %4295 = vmatpush3.bf16.msra.mxu0 %v4813_v34  ;;  %4310 = vmatprep.mubr.msk.bf16.mxu0 %vm4636_vm1, %v4635_v0 }
0x20d3   :  { %4296 = vmatprep.subr.bf16.mxu0 %v4635_v0 }
0x20d6   :  { %4297 = vmatpush3.bf16.msra.mxu0 %v4809_v33 }
0x20d7   :  { %4298 = vmatprep.subr.bf16.mxu0 %v4635_v0 }
0x20da   :  { %4299 = vmatpush3.bf16.msra.mxu0 %v4795_v28 }
0x20db   :  { %4300 = vmatprep.subr.bf16.mxu0 %v4635_v0 }
0x20de   :  { %4301 = vmatpush3.bf16.msra.mxu0 %v4783_v24 }
0x20df   :  { %4302 = vmatprep.subr.bf16.mxu0 %v4635_v0 }
0x20e2   :  { %4303 = vmatpush3.bf16.msra.mxu0 %v4779_v23 }
0x20e3   :  { %4304 = vmatprep.subr.bf16.mxu0 %v4635_v0 }
0x20e6   :  { %4305 = vmatpush3.bf16.msra.mxu0 %v4767_v19 }
0x20e7   :  { %4306 = vmatprep.subr.bf16.mxu0 %v4635_v0 }
0x20ea   :  { %4307 = vmatpush3.bf16.msra.mxu0 %v4755_v15 }
0x20eb   :  { %4308 = vmatprep.subr.bf16.mxu0 %v4635_v0 }
0x20ee   :  { %4309 = vmatpush3.bf16.msra.mxu0 %v4751_v14 }
0x20ef   :  { %4321 = vmatprep.subr.mxu0 %v4635_v0 }
0x2191   :  { %v2577_v28 = vpop.f32.mrf.mxu0 }
0x2192   :  { %v2578_v24 = vadd.f32 %v2577_v28, %v5011_v61  ;;  %v2790_v28 = vld [vmem:[#allocation10 + $0x20] sm:$0xff] }
0x2193   :  { %v4272_v33 = vpop.f32.mrf.mxu0 }
0x2194   :  { %v2584_v34 = vmul.f32 0.0625, %v2578_v24  ;;  %v2789_v24 = vld [vmem:[#allocation10 + $0x18] sm:$0xff]  ;;  %v2788_v33 = vld [vmem:[#allocation10 + $0x10] sm:$0xff] }
0x2195   :  { %v2580_v23 = vpop.f32.mrf.mxu0 }
0x2196   :  { %v2586_v42 = vadd.f32 %v2584_v34, %v5917_v9  ;;  %v2581_v19 = vadd.f32 %v2580_v23, %v5011_v61  ;;  %v2787_v34 = vld [vmem:[#allocation10 + $0x8] sm:$0xff] }
0x2197   :  { %v4273_v2 = vpop.f32.mrf.mxu0 }
0x2198   :  { %v2590_v4 = vmul.f32 1.442695, %v2586_v42  ;;  %v2585_v6 = vmul.f32 0.0625, %v2581_v19  ;;  %vm2588_vm6 = vcmp.gt.f32.partialorder %v2586_v42, 0.0 }
0x219a   :  { %4486 = vpow2.f32 %v2590_v4  ;;  %v2587_v15 = vadd.f32 %v2585_v6, %v5921_v30 }
0x219c   :  { %v2592_v31 = vmul.f32 1.442695, %v2587_v15  ;;  %vm2589_vm7 = vcmp.gt.f32.partialorder %v2587_v15, 0.0 }
0x219e   :  { %4488 = vpow2.f32 %v2592_v31 }
0x21a7   :  { %v4487_v14 = vpop.eup %4486 }
0x21a8   :  { %v2977_v44 = vadd.f32 -1.0, %v4487_v14 }
0x21aa   :  { %v2596_v54 = vsel %vm2588_vm6, %v2586_v42, %v2977_v44  ;;  %v2712_v44 = vld [vmem:[%s6028_s9] sm:$0x3]  ;;  %s4637_s9 = smov [#allocation11]  }
0x21ab   :  { %v4489_v57 = vpop.eup %4488  ;;  %v2658_v37 = vmul.f32 2.0, %v2596_v54  ;;  %s2902_s26 = sshll.u32 %s4637_s9, 4  ;;  %s2903_s26 = int_to_ptr.vmem [resolvable:$true] %s2902_s26 }
0x21ac   :  { %v2978_v10 = vadd.f32 -1.0, %v4489_v57  ;;  %p4605_p12 = scmp.lt.s32.totalorder %s2903_s26, %s2903_s26 }
0x21ad   :  { %v2660_v35 = vadd.f32 %v2658_v37, %v2656_v53 }
0x21ae   :  { %v2597_v12 = vsel %vm2589_vm7, %v2587_v15, %v2978_v10 }
0x21af   :  { %v2659_v43 = vmul.f32 2.0, %v2597_v12  ;;  %v2598_v63 = vpack.c.bf16 %v2597_v12, %v2596_v54  ;;  %v2786_v54 = vld [vmem:[#allocation10] sm:$0xff] }
0x21b1   :  { %4291 = vmatmul.mubr.bf16.vlgmr.msra.gmra.mxu1 %v2598_v63  ;;  %v2661_v5 = vadd.f32 %v2659_v43, %v2657_v58 }
0x21b2   :  { %4318 = vmatprep.mubr.msk.f32.mxu1 %vm4636_vm1, %v4635_v0 }
0x2271   :  { %v2633_v60 = vpop.f32.mrf.mxu1 }
0x2272   :  { %v2634_v39 = vadd.f32 %v2633_v60, %v5011_v61 }
0x2273   :  { %v4292_v40 = vpop.f32.mrf.mxu1 }
0x2274   :  { %v2640_v8 = vmul.f32 0.125, %v2634_v39 }
0x2275   :  { %v2636_v29 = vpop.f32.mrf.mxu1 }
0x2276   :  { %v2642_v38 = vadd.f32 %v2640_v8, %v5917_v9  ;;  %v2637_v45 = vadd.f32 %v2636_v29, %v5011_v61  ;;  %v2801_v61 = vld [vmem:[#allocation10 + $0x78] sm:$0xff] }
0x2277   :  { %v4293_v46 = vpop.f32.mrf.mxu1 }
0x2278   :  { %v2646_v3 = vmul.f32 1.442695, %v2642_v38  ;;  %v2641_v47 = vmul.f32 0.125, %v2637_v45  ;;  %vm2644_vm8 = vcmp.gt.f32.partialorder %v2642_v38, 0.0 }
0x227a   :  { %4490 = vpow2.f32 %v2646_v3  ;;  %v2643_v13 = vadd.f32 %v2641_v47, %v5921_v30  ;;  %v2799_v30 = vld [vmem:[#allocation10 + $0x68] sm:$0xff] }
0x227c   :  { %v2648_v16 = vmul.f32 1.442695, %v2643_v13  ;;  %vm2645_vm9 = vcmp.gt.f32.partialorder %v2643_v13, 0.0 }
0x227e   :  { %4492 = vpow2.f32 %v2648_v16 }
0x2287   :  { %v4491_v17 = vpop.eup %4490 }
0x2288   :  { %v2979_v18 = vadd.f32 -1.0, %v4491_v17 }
0x228a   :  { %v2652_v48 = vsel %vm2644_vm8, %v2642_v38, %v2979_v18 }
0x228b   :  { %v4493_v20 = vpop.eup %4492  ;;  %v2662_v7 = vadd.f32 %v2660_v35, %v2652_v48 }
0x228c   :  { %v2980_v21 = vadd.f32 -1.0, %v4493_v20 }
0x228e   :  { %v2653_v49 = vsel %vm2645_vm9, %v2643_v13, %v2980_v21 }
0x228f   :  { %v2663_v9 = vadd.f32 %v2661_v5, %v2653_v49 }
0x2291   :  { %v2664_v50 = vpack.c.bf16 %v2663_v9, %v2662_v7 }
0x2293   :  { %4311 = vmatmul.mubr.bf16.vlgmr.msra.gmra.mxu0 %v2664_v50 }
0x2294   :  { %4353 = vmatprep.mubr.msk.f32.mxu0 %vm4636_vm1, %v4635_v0  ;;  %4322 = vmatpush3.msra.mxu0 %v2801_v61 }
0x2295   :  { %4323 = vmatprep.subr.mxu0 %v4635_v0 }
0x2296   :  { %4324 = vmatpush3.msra.mxu0 %v2800_v22 }
0x2297   :  { %4325 = vmatprep.subr.mxu0 %v4635_v0 }
0x2298   :  { %4326 = vmatpush3.msra.mxu0 %v2799_v30 }
0x2299   :  { %4327 = vmatprep.subr.mxu0 %v4635_v0 }
0x229a   :  { %4328 = vmatpush3.msra.mxu0 %v2798_v27 }
0x229b   :  { %4329 = vmatprep.subr.mxu0 %v4635_v0 }
0x229c   :  { %4330 = vmatpush3.msra.mxu0 %v2797_v25 }
0x229d   :  { %4331 = vmatprep.subr.mxu0 %v4635_v0 }
0x229e   :  { %4332 = vmatpush3.msra.mxu0 %v2796_v32 }
0x229f   :  { %4333 = vmatprep.subr.mxu0 %v4635_v0 }
0x22a0   :  { %4334 = vmatpush3.msra.mxu0 %v2795_v55 }
0x22a1   :  { %4335 = vmatprep.subr.mxu0 %v4635_v0 }
0x22a2   :  { %4336 = vmatpush3.msra.mxu0 %v2794_v51 }
0x22a3   :  { %4337 = vmatprep.subr.mxu0 %v4635_v0 }
0x22a4   :  { %4338 = vmatpush3.msra.mxu0 %v2793_v1 }
0x22a5   :  { %4339 = vmatprep.subr.mxu0 %v4635_v0 }
0x22a6   :  { %4340 = vmatpush3.msra.mxu0 %v2792_v52 }
0x22a7   :  { %4341 = vmatprep.subr.mxu0 %v4635_v0 }
0x22a8   :  { %4342 = vmatpush3.msra.mxu0 %v2791_v41 }
0x22a9   :  { %4343 = vmatprep.subr.mxu0 %v4635_v0 }
0x22aa   :  { %4344 = vmatpush3.msra.mxu0 %v2790_v28 }
0x22ab   :  { %4345 = vmatprep.subr.mxu0 %v4635_v0 }
0x22ac   :  { %4346 = vmatpush3.msra.mxu0 %v2789_v24 }
0x22ad   :  { %4347 = vmatprep.subr.mxu0 %v4635_v0 }
0x22ae   :  { %4348 = vmatpush3.msra.mxu0 %v2788_v33 }
0x22af   :  { %4349 = vmatprep.subr.mxu0 %v4635_v0 }
0x22b0   :  { %4350 = vmatpush3.msra.mxu0 %v2787_v34 }
0x22b1   :  { %4351 = vmatprep.subr.mxu0 %v4635_v0 }
0x22b2   :  { %4352 = vmatpush3.msra.mxu0 %v2786_v54 }
0x2353   :  { %v2699_v23 = vpop.f32.mrf.mxu0 }
0x2354   :  { %v2706_v19 = vmul.f32 0.020833334, %v2699_v23 }
0x2355   :  { %v4312_v42 = vpop.f32.mrf.mxu0 }
0x2356   :  { %v2708_v15 = vadd.f32 %v2706_v19, %v5891_v36 }
0x2357   :  { %v2702_v2 = vpop.f32.mrf.mxu0 }
0x2358   :  { %v2707_v4 = vmul.f32 0.020833334, %v2702_v2  ;;  %v2710_v11 = vadd.f32 %v2708_v15, %v5084_v26 }
0x2359   :  { %v4313_v6 = vpop.f32.mrf.mxu0 }
0x235a   :  { %v2709_v31 = vadd.f32 %v2707_v4, %v5894_v62  ;;  %v2880_v62 = vand.u32 127, %v477_v56 }
0x235c   :  { %v2711_v14 = vadd.f32 %v2709_v31, %v5084_v26  ;;  %v2982_v26 = vld [vmem:[%s6027_s8] ss:$0 sm:$0xff]  ;;  %vm2881_vm1 = vcmp.lt.s32.totalorder %v2880_v62, 2  ;;  %s4600_s8 = scalar_lea.vmem %s2903_s26, 32 }
0x235d   :  { %p4601_p11 = scmp.ne.s32.totalorder %s2903_s26, %s4600_s8  ;;  %p4606_p13 = scmp.lt.s32.totalorder %s4600_s8, %s4600_s8 }
0x235e   :  { %4315 = vmatpush3.msra.mxu1 %v2711_v14 }
0x235f   :  { %4316 = vmatprep.subr.mxu1 %v4635_v0  ;;  %p4607_p0 = por %p4606_p13, %p4605_p12 }
0x2360   :  { %4317 = vmatpush3.msra.mxu1 %v2710_v11 }
0x2361   :  { %4319 = vmatmul.mubr.msk.f32.vlgmr.msra.gmra.mxu1 %vm116_vm0, %v2712_v44  ;;  %p4608_p1 = pnand %p4607_p0, %p4601_p11 }
0x2421   :  { %v2782_v57 = vpop.f32.mrf.mxu1 }
0x2422   :  { %4354 = vmatmul.mubr.f32.vlgmr.msra.gmra.mxu0 %v2782_v57 }
0x2423   :  { %v4320_v36 = vpop.f32.mrf.mxu1 }
0x24e2   :  { %v2875_v53 = vpop.f32.mrf.mxu0 }
0x24e3   :  { %v2876_v59 = vadd.f32 %v2982_v26, %v2875_v53 }
0x24e4   :  { %v4355_v37 = vpop.f32.mrf.mxu0 }
0x24e5   :  { %v2882_v0 = vsel %vm2881_vm1, %v2876_v59, -inf }
0x24e6   :  { %v2884_v10 = vsel %vm2883_vm10, %v2882_v0, -inf }
0x24e7   :  { %2885 = vmax.xlane.f32.xlu0 %v2884_v10 }
0x2570   :  { %v2886_v35 = vpop.xlane.xlu0 %2885 }
0x2571   :  { %v2887_v12 = vsub.f32 %v2882_v0, %v2886_v35 }
0x2573   :  { %v2888_v58 = vmul.f32 1.442695, %v2887_v12 }
0x2575   :  { %4494 = vpow2.f32 %v2888_v58 }
0x2582   :  { %v4495_v43 = vpop.eup %4494 }
0x2583   :  { %v2890_v63 = vsel %vm2883_vm10, %v4495_v43, 0.0 }
0x2584   :  { %2891 = vadd.xlane.f32.xlu0 %v2890_v63 }
0x260d   :  { %v2892_v56 = vpop.xlane.xlu0 %2891 }
0x260e   :  { %4496 = vrcp.f32 %v2892_v56 }
0x261b   :  { %v4497_v5 = vpop.eup %4496 }
0x261c   :  { %v2894_v60 = vmul.f32 %v4497_v5, %v4495_v43 }
0x261e   :  { %2895 = vst [vmem:[#allocation11] sm:$0x3] %v2894_v60 }
0x261f   :  { %4611 = shalt.err (!%p4608_p1)
}
0x2620   :  { %2905 = dma.vmem_to_hbm [thread:$0]  %s2903_s26, 32, %s6029_s10, [#allocation4]  }
0x2621   :  { %4626 = dma.done.wait [#allocation4], 32  }
0x2622   :  { %4627 = vsyncadd [#allocation4], 4294967264 }
0x2623   :  { %2909 = vsyncpa [#allocation3], 1 }
0x2624   :  { %2910 = vsyncpa [#allocation6], 1 }
0x2625   :  { %2911 = vsyncpa [#allocation9], 1 }
0x2626   :  { %2912 = vsyncpa [#allocation4], 1 }

</bundles_post_ra>
